<compile_context>
chip_gen: v5e
topology: v5e:2x2
jax: 0.10.0
libtpu: 0.0.40
codegen_flags: <defaults>
</compile_context>

<pallas_src>
import functools
import numpy as np
import jax
import jax.numpy as jnp
from jax.experimental import pallas as pl
from jax.experimental.pallas import tpu as pltpu


def _round_up(a, b):
    return (a + b - 1) // b * b


# ----------------------------- Pallas kernel --------------------------------
def _gen_kernel(offs, x_ref, m1_ref, m2_ref, m3_ref, m4_ref, m5_ref, c_ref,
                o_ref):
    """One (TM, Hin*Cin) row tile of the fused 5-layer generator.

    x_ref : bf16 tile of spatial columns; features = flattened (H, C).
    m*_ref: bf16 folded deconv(+BN-scale) matrices (resident, single-buffered).
    c_ref : (1, f1+f2+f3+f4+f5p) f32 -- all additive shifts concatenated;
            sliced here at static, lane-aligned offsets.
    """
    o0, o1, o2, o3, o4, o5 = offs
    bf16 = jnp.bfloat16
    h = jnp.dot(x_ref[...], m1_ref[...], preferred_element_type=jnp.float32)
    h = jnp.maximum(h + c_ref[:, o0:o1], 0.0)                 # BN1 shift + ReLU
    h = jnp.dot(h.astype(bf16), m2_ref[...], preferred_element_type=jnp.float32)
    h = jnp.maximum(h + c_ref[:, o1:o2], 0.0)                 # BN2 shift + ReLU
    h = jnp.dot(h.astype(bf16), m3_ref[...], preferred_element_type=jnp.float32)
    h = jnp.maximum(h + c_ref[:, o2:o3], 0.0)                 # BN3 shift + ReLU
    h = jnp.dot(h.astype(bf16), m4_ref[...], preferred_element_type=jnp.float32)
    h = jnp.maximum(h + c_ref[:, o3:o4], 0.0)                 # BN4 shift + ReLU
    h = jnp.dot(h.astype(bf16), m5_ref[...], preferred_element_type=jnp.float32)
    o_ref[...] = jnp.tanh(h + c_ref[:, o4:o5])                # bias + Tanh


# ------------------------- host-side weight folding --------------------------
def _deconv_matrix(w, hin, stride=1, pad=0, dilation=1):
    """Fold ConvTranspose2d weight (Cin, Cout, K, 1) acting along H into a dense
    matrix (Hin*Cin, Hout*Cout); feature layout is (H, C) flattened."""
    cin, cout, ksz, _ = w.shape
    hout = (hin - 1) * stride - 2 * pad + dilation * (ksz - 1) + 1
    m = np.zeros((hin * cin, hout * cout), dtype=np.float32)
    for hi in range(hin):
        for kh in range(ksz):
            ho = hi * stride - pad + kh * dilation
            if 0 <= ho < hout:
                m[hi * cin:(hi + 1) * cin, ho * cout:(ho + 1) * cout] += w[:, :, kh, 0]
    return m, hout


def _fold_bn(conv_bias, gamma, beta, mean, var, hout, eps=1e-5):
    """Eval-mode BatchNorm folded to per-(H,C)-feature scale & shift vectors."""
    scale = gamma / np.sqrt(var + eps)
    shift = scale * (conv_bias - mean) + beta
    a = np.tile(scale[None, :], (hout, 1)).reshape(-1).astype(np.float32)
    c = np.tile(shift[None, :], (hout, 1)).reshape(1, -1).astype(np.float32)
    return a, c


def _fold_params(params, hin=1):
    """One-time folding of the 5 transposed convs + eval-mode BN into dense
    matmul operands.  Returns device arrays + static metadata."""
    couts = [params["w%d" % i].shape[1] for i in range(1, 6)]

    m1, h1 = _deconv_matrix(params["w1"], hin, stride=1, pad=0)              # H: 1 -> 4
    m2, h2 = _deconv_matrix(params["w2"], h1, stride=2, pad=1)               # H: 4 -> 8
    m3, h3 = _deconv_matrix(params["w3"], h2, stride=2, pad=1)               # H: 8 -> 16
    m4, h4 = _deconv_matrix(params["w4"], h3, stride=2, pad=1)               # H: 16 -> 32
    m5, h5 = _deconv_matrix(params["w5"], h4, stride=1, pad=0, dilation=2)   # H: 32 -> 46

    a1, c1 = _fold_bn(params["b1"], params["g1"], params["be1"], params["mu1"], params["var1"], h1)
    a2, c2 = _fold_bn(params["b2"], params["g2"], params["be2"], params["mu2"], params["var2"], h2)
    a3, c3 = _fold_bn(params["b3"], params["g3"], params["be3"], params["mu3"], params["var3"], h3)
    a4, c4 = _fold_bn(params["b4"], params["g4"], params["be4"], params["mu4"], params["var4"], h4)
    # Fold BN scales into the matmul columns (numerically identical).
    m1 *= a1[None, :]
    m2 *= a2[None, :]
    m3 *= a3[None, :]
    m4 *= a4[None, :]

    f_in = hin * params["w1"].shape[0]
    f1, f2, f3, f4 = h1 * couts[0], h2 * couts[1], h3 * couts[2], h4 * couts[3]
    f5 = h5 * couts[4]
    # Pad the last layer to a lane-dense (multiple of 128) width so the final
    # matmul and the output stores use full vregs; extra columns are zeros.
    f5p = max(128, _round_up(f5, 128))
    m5p = np.zeros((f4, f5p), dtype=np.float32)
    m5p[:, :f5] = m5
    c5 = np.zeros((1, f5p), dtype=np.float32)
    c5[:, :f5] = np.tile(params["b5"][None, :], (h5, 1)).reshape(1, -1)

    shifts = np.concatenate([c1, c2, c3, c4, c5], axis=1)          # (1, f_total)
    offs = tuple(int(v) for v in np.cumsum([0, f1, f2, f3, f4, f5p]))

    bf = jnp.bfloat16
    mats = tuple(jnp.asarray(m, dtype=bf) for m in (m1, m2, m3, m4, m5p))
    shifts = jnp.asarray(shifts, dtype=jnp.float32)
    meta = dict(hin=hin, f_in=f_in, f_dims=(f1, f2, f3, f4, f5p), offs=offs,
                f5=f5, f5p=f5p, h5=h5, cout5=couts[4])
    return mats, shifts, meta


# ------------------------------ forward builder -------------------------------
def make_generator_mhc(params, hin=1):
    """Fold weights once on the host, upload once, return a jitted forward(x)."""
    mats, shifts, meta = _fold_params(params, hin=hin)
    kernel = functools.partial(_gen_kernel, meta["offs"])
    f_in = meta["f_in"]
    f1, f2, f3, f4, f5p = meta["f_dims"]
    f5, h5, cout5 = meta["f5"], meta["h5"], meta["cout5"]
    f_total = meta["offs"][-1]

    @jax.jit
    def forward(x):
        n, _, _, wid = x.shape
        rows = n * wid
        # rows = (N*W) spatial columns, features = flattened (H, C).
        xcols = jnp.transpose(x, (0, 3, 2, 1)).reshape(rows, f_in)

        # Row-tile policy:
        #  * small problems: pad rows only to the bf16 sublane tile (16) and
        #    run a single grid step (block == full dim) -- no 128-row padding.
        #  * large problems: tm a multiple of 256 (full MXU height on v6e/v7x)
        #    with >= 2 tiles so ("parallel",) can shard across v7x's 2 TCs;
        #    capped at 512 to stay inside scoped-VMEM defaults on all gens.
        rows16 = _round_up(rows, 16)
        if rows16 <= 512:
            tm = rows16
        elif rows16 <= 2048:
            tm = 256
        else:
            tm = 512
        rows_pad = _round_up(rows, tm)
        xcols = jnp.pad(xcols, ((0, rows_pad - rows), (0, 0))).astype(jnp.bfloat16)

        const = lambda i: (0, 0)
        # Resident operands: block index never changes, so single-buffer them
        # (a second pipeline buffer would be pure VMEM waste).
        res = lambda shape: pl.BlockSpec(shape, const,
                                         pipeline_mode=pl.Buffered(1))

        out = pl.pallas_call(
            kernel,
            out_shape=jax.ShapeDtypeStruct((rows_pad, f5p), jnp.float32),
            grid_spec=pltpu.PrefetchScalarGridSpec(
                num_scalar_prefetch=0,
                grid=(rows_pad // tm,),
                in_specs=[
                    pl.BlockSpec((tm, f_in), lambda i: (i, 0)),
                    res((f_in, f1)), res((f1, f2)), res((f2, f3)),
                    res((f3, f4)), res((f4, f5p)),
                    res((1, f_total)),
                ],
                out_specs=pl.BlockSpec((tm, f5p), lambda i: (i, 0)),
            ),
            compiler_params=pltpu.CompilerParams(
                dimension_semantics=("parallel",)),
        )(xcols, *mats, shifts)

        out = out[:rows, :f5].reshape(n, wid, h5, cout5)     # (N, W, H, C)
        return jnp.transpose(out, (0, 3, 2, 1))              # NCHW: (N, 1, 46, W)

    return forward


# --------------------------- numpy reference ---------------------------------
def _ref_conv_transpose(x, w, b, stride, pad, dilation=1):
    n, cin, hin, wid = x.shape
    _, cout, k, _ = w.shape
    hout = (hin - 1) * stride - 2 * pad + dilation * (k - 1) + 1
    y = np.zeros((n, cout, hout, wid), dtype=np.float32)
    for hi in range(hin):
        for kh in range(k):
            ho = hi * stride - pad + kh * dilation
            if 0 <= ho < hout:
                y[:, :, ho, :] += np.einsum("ncw,cd->ndw",
                                            x[:, :, hi, :], w[:, :, kh, 0])
    return y + b[None, :, None, None]


def _ref_bn(y, g, be, mu, var, eps=1e-5):
    return (g[None, :, None, None] * (y - mu[None, :, None, None])
            / np.sqrt(var[None, :, None, None] + eps) + be[None, :, None, None])


def _ref_forward(x, p):
    y = _ref_conv_transpose(x, p["w1"], p["b1"], 1, 0)
    y = np.maximum(_ref_bn(y, p["g1"], p["be1"], p["mu1"], p["var1"]), 0.0)
    y = _ref_conv_transpose(y, p["w2"], p["b2"], 2, 1)
    y = np.maximum(_ref_bn(y, p["g2"], p["be2"], p["mu2"], p["var2"]), 0.0)
    y = _ref_conv_transpose(y, p["w3"], p["b3"], 2, 1)
    y = np.maximum(_ref_bn(y, p["g3"], p["be3"], p["mu3"], p["var3"]), 0.0)
    y = _ref_conv_transpose(y, p["w4"], p["b4"], 2, 1)
    y = np.maximum(_ref_bn(y, p["g4"], p["be4"], p["mu4"], p["var4"]), 0.0)
    y = _ref_conv_transpose(y, p["w5"], p["b5"], 1, 0, dilation=2)
    return np.tanh(y)


# --------------------------------- main --------------------------------------
if __name__ == "__main__":
    key = jax.random.PRNGKey(0)
    ks = jax.random.split(key, 32)

    def rnd(k, shape, scale=0.1):
        return np.asarray(jax.random.normal(k, shape, dtype=jnp.float32)) * scale

    features, channels = 16, 1
    ch1, ch2, ch3, ch4 = features * 8, features * 4, features * 2, features
    params = dict(
        w1=rnd(ks[0], (256, ch1, 4, 1)), b1=rnd(ks[1], (ch1,)),
        g1=1.0 + rnd(ks[2], (ch1,)), be1=rnd(ks[3], (ch1,)),
        mu1=rnd(ks[4], (ch1,)), var1=np.abs(rnd(ks[5], (ch1,))) + 1.0,
        w2=rnd(ks[6], (ch1, ch2, 4, 1)), b2=rnd(ks[7], (ch2,)),
        g2=1.0 + rnd(ks[8], (ch2,)), be2=rnd(ks[9], (ch2,)),
        mu2=rnd(ks[10], (ch2,)), var2=np.abs(rnd(ks[11], (ch2,))) + 1.0,
        w3=rnd(ks[12], (ch2, ch3, 4, 1)), b3=rnd(ks[13], (ch3,)),
        g3=1.0 + rnd(ks[14], (ch3,)), be3=rnd(ks[15], (ch3,)),
        mu3=rnd(ks[16], (ch3,)), var3=np.abs(rnd(ks[17], (ch3,))) + 1.0,
        w4=rnd(ks[18], (ch3, ch4, 4, 1)), b4=rnd(ks[19], (ch4,)),
        g4=1.0 + rnd(ks[20], (ch4,)), be4=rnd(ks[21], (ch4,)),
        mu4=rnd(ks[22], (ch4,)), var4=np.abs(rnd(ks[23], (ch4,))) + 1.0,
        w5=rnd(ks[24], (ch4, channels, 8, 1)), b5=rnd(ks[25], (channels,)),
    )

    n, w = 2, 12   # latent (N, 256, 1, 12) -> output (N, 1, 46, 12)
    x = jax.random.normal(ks[26], (n, 256, 1, w), dtype=jnp.float32)

    forward = make_generator_mhc(params)          # fold + upload weights once
    y = forward(x)                                # compile + run
    y = jax.block_until_ready(y)
    y = jax.block_until_ready(forward(x))         # cached path (no re-fold)
    assert y.shape == (n, channels, 46, w), y.shape

    y_ref = _ref_forward(np.asarray(x), params)
    # Matmul operands are bf16 (f32 accumulation), so allow ~1e-2-level error
    # vs. the pure-f32 reference across the 5 chained layers.
    np.testing.assert_allclose(np.asarray(y), y_ref, rtol=3e-2, atol=3e-2)

    print("KERNEL_OK")
</pallas_src>

<mosaic_0001>
module attributes {stable_mosaic.version = 11 : i64} {
  func.func @_gen_kernel(%arg0: i32, %arg1: memref<32x256xbf16, #tpu.memory_space<vmem>>, %arg2: memref<256x512xbf16, #tpu.memory_space<vmem>>, %arg3: memref<512x512xbf16, #tpu.memory_space<vmem>>, %arg4: memref<512x512xbf16, #tpu.memory_space<vmem>>, %arg5: memref<512x512xbf16, #tpu.memory_space<vmem>>, %arg6: memref<512x128xbf16, #tpu.memory_space<vmem>>, %arg7: memref<1x2176xf32, #tpu.memory_space<vmem>>, %arg8: memref<32x128xf32, #tpu.memory_space<vmem>>) attributes {dimension_semantics = [#tpu.dimension_semantics<parallel>], iteration_bounds = array<i64: 1>, scalar_prefetch = 0 : i64, scratch_operands = 0 : i64, tpu.core_type = #tpu.core_type<tc>, window_params = [{transform_indices = @transform_0, window_bounds = array<i64: 32, 256>}, {pipeline_mode = #tpu.pipeline_mode<synchronous>, transform_indices = @transform_1, window_bounds = array<i64: 256, 512>}, {pipeline_mode = #tpu.pipeline_mode<synchronous>, transform_indices = @transform_2, window_bounds = array<i64: 512, 512>}, {pipeline_mode = #tpu.pipeline_mode<synchronous>, transform_indices = @transform_3, window_bounds = array<i64: 512, 512>}, {pipeline_mode = #tpu.pipeline_mode<synchronous>, transform_indices = @transform_4, window_bounds = array<i64: 512, 512>}, {pipeline_mode = #tpu.pipeline_mode<synchronous>, transform_indices = @transform_5, window_bounds = array<i64: 512, 128>}, {pipeline_mode = #tpu.pipeline_mode<synchronous>, transform_indices = @transform_6, window_bounds = array<i64: 1, 2176>}, {transform_indices = @transform_7, window_bounds = array<i64: 32, 128>}]} {
    %c0 = arith.constant 0 : index
    %c0_0 = arith.constant 0 : index
    %0 = vector.load %arg1[%c0, %c0_0] : memref<32x256xbf16, #tpu.memory_space<vmem>>, vector<32x256xbf16>
    %c0_1 = arith.constant 0 : index
    %c0_2 = arith.constant 0 : index
    %1 = vector.load %arg2[%c0_1, %c0_2] : memref<256x512xbf16, #tpu.memory_space<vmem>>, vector<256x512xbf16>
    %cst = arith.constant dense<0.000000e+00> : vector<32x512xf32>
    %2 = tpu.matmul %0, %1, %cst {dimension_numbers = #tpu.dot_dimension_numbers<[1], [0], [0], [1], [0, 0, 1, 1], [], []>} : vector<32x256xbf16>, vector<256x512xbf16>, vector<32x512xf32> -> vector<32x512xf32>
    %c0_3 = arith.constant 0 : index
    %c0_4 = arith.constant 0 : index
    %3 = vector.load %arg7[%c0_3, %c0_4] : memref<1x2176xf32, #tpu.memory_space<vmem>>, vector<1x512xf32>
    %4 = vector.broadcast %3 : vector<1x512xf32> to vector<32x512xf32>
    %5 = arith.addf %2, %4 : vector<32x512xf32>
    %cst_5 = arith.constant 0.000000e+00 : f32
    %6 = vector.broadcast %cst_5 : f32 to vector<32x512xf32>
    %7 = arith.maximumf %5, %6 : vector<32x512xf32>
    %8 = arith.truncf %7 : vector<32x512xf32> to vector<32x512xbf16>
    %c0_6 = arith.constant 0 : index
    %c0_7 = arith.constant 0 : index
    %9 = vector.load %arg3[%c0_6, %c0_7] : memref<512x512xbf16, #tpu.memory_space<vmem>>, vector<512x512xbf16>
    %cst_8 = arith.constant dense<0.000000e+00> : vector<32x512xf32>
    %10 = tpu.matmul %8, %9, %cst_8 {dimension_numbers = #tpu.dot_dimension_numbers<[1], [0], [0], [1], [0, 0, 1, 1], [], []>} : vector<32x512xbf16>, vector<512x512xbf16>, vector<32x512xf32> -> vector<32x512xf32>
    %c0_9 = arith.constant 0 : index
    %c512 = arith.constant 512 : index
    %11 = vector.load %arg7[%c0_9, %c512] : memref<1x2176xf32, #tpu.memory_space<vmem>>, vector<1x512xf32>
    %12 = vector.broadcast %11 : vector<1x512xf32> to vector<32x512xf32>
    %13 = arith.addf %10, %12 : vector<32x512xf32>
    %cst_10 = arith.constant 0.000000e+00 : f32
    %14 = vector.broadcast %cst_10 : f32 to vector<32x512xf32>
    %15 = arith.maximumf %13, %14 : vector<32x512xf32>
    %16 = arith.truncf %15 : vector<32x512xf32> to vector<32x512xbf16>
    %c0_11 = arith.constant 0 : index
    %c0_12 = arith.constant 0 : index
    %17 = vector.load %arg4[%c0_11, %c0_12] : memref<512x512xbf16, #tpu.memory_space<vmem>>, vector<512x512xbf16>
    %cst_13 = arith.constant dense<0.000000e+00> : vector<32x512xf32>
    %18 = tpu.matmul %16, %17, %cst_13 {dimension_numbers = #tpu.dot_dimension_numbers<[1], [0], [0], [1], [0, 0, 1, 1], [], []>} : vector<32x512xbf16>, vector<512x512xbf16>, vector<32x512xf32> -> vector<32x512xf32>
    %c0_14 = arith.constant 0 : index
    %c1024 = arith.constant 1024 : index
    %19 = vector.load %arg7[%c0_14, %c1024] : memref<1x2176xf32, #tpu.memory_space<vmem>>, vector<1x512xf32>
    %20 = vector.broadcast %19 : vector<1x512xf32> to vector<32x512xf32>
    %21 = arith.addf %18, %20 : vector<32x512xf32>
    %cst_15 = arith.constant 0.000000e+00 : f32
    %22 = vector.broadcast %cst_15 : f32 to vector<32x512xf32>
    %23 = arith.maximumf %21, %22 : vector<32x512xf32>
    %24 = arith.truncf %23 : vector<32x512xf32> to vector<32x512xbf16>
    %c0_16 = arith.constant 0 : index
    %c0_17 = arith.constant 0 : index
    %25 = vector.load %arg5[%c0_16, %c0_17] : memref<512x512xbf16, #tpu.memory_space<vmem>>, vector<512x512xbf16>
    %cst_18 = arith.constant dense<0.000000e+00> : vector<32x512xf32>
    %26 = tpu.matmul %24, %25, %cst_18 {dimension_numbers = #tpu.dot_dimension_numbers<[1], [0], [0], [1], [0, 0, 1, 1], [], []>} : vector<32x512xbf16>, vector<512x512xbf16>, vector<32x512xf32> -> vector<32x512xf32>
    %c0_19 = arith.constant 0 : index
    %c1536 = arith.constant 1536 : index
    %27 = vector.load %arg7[%c0_19, %c1536] : memref<1x2176xf32, #tpu.memory_space<vmem>>, vector<1x512xf32>
    %28 = vector.broadcast %27 : vector<1x512xf32> to vector<32x512xf32>
    %29 = arith.addf %26, %28 : vector<32x512xf32>
    %cst_20 = arith.constant 0.000000e+00 : f32
    %30 = vector.broadcast %cst_20 : f32 to vector<32x512xf32>
    %31 = arith.maximumf %29, %30 : vector<32x512xf32>
    %32 = arith.truncf %31 : vector<32x512xf32> to vector<32x512xbf16>
    %c0_21 = arith.constant 0 : index
    %c0_22 = arith.constant 0 : index
    %33 = vector.load %arg6[%c0_21, %c0_22] : memref<512x128xbf16, #tpu.memory_space<vmem>>, vector<512x128xbf16>
    %cst_23 = arith.constant dense<0.000000e+00> : vector<32x128xf32>
    %34 = tpu.matmul %32, %33, %cst_23 {dimension_numbers = #tpu.dot_dimension_numbers<[1], [0], [0], [1], [0, 0, 1, 1], [], []>} : vector<32x512xbf16>, vector<512x128xbf16>, vector<32x128xf32> -> vector<32x128xf32>
    %c0_24 = arith.constant 0 : index
    %c2048 = arith.constant 2048 : index
    %35 = vector.load %arg7[%c0_24, %c2048] : memref<1x2176xf32, #tpu.memory_space<vmem>>, vector<1x128xf32>
    %36 = vector.broadcast %35 : vector<1x128xf32> to vector<32x128xf32>
    %37 = arith.addf %34, %36 : vector<32x128xf32>
    %38 = math.tanh %37 : vector<32x128xf32>
    %c0_25 = arith.constant 0 : index
    %c0_26 = arith.constant 0 : index
    %39 = vector.load %arg8[%c0_25, %c0_26] : memref<32x128xf32, #tpu.memory_space<vmem>>, vector<32x128xf32>
    tpu.vector_store %arg8[%c0_25, %c0_26], %38 {strides = array<i32>} : memref<32x128xf32, #tpu.memory_space<vmem>>, vector<32x128xf32>,
    return
  }
  func.func @transform_0(%arg0: i32) -> (i32, i32) {
    %c0_i32 = arith.constant 0 : i32
    %c0_i32_0 = arith.constant 0 : i32
    return %arg0, %c0_i32 : i32, i32
  }
  func.func @transform_1(%arg0: i32) -> (i32, i32) {
    %c0_i32 = arith.constant 0 : i32
    %c0_i32_0 = arith.constant 0 : i32
    %c0_i32_1 = arith.constant 0 : i32
    return %c0_i32, %c0_i32_0 : i32, i32
  }
  func.func @transform_2(%arg0: i32) -> (i32, i32) {
    %c0_i32 = arith.constant 0 : i32
    %c0_i32_0 = arith.constant 0 : i32
    %c0_i32_1 = arith.constant 0 : i32
    return %c0_i32, %c0_i32_0 : i32, i32
  }
  func.func @transform_3(%arg0: i32) -> (i32, i32) {
    %c0_i32 = arith.constant 0 : i32
    %c0_i32_0 = arith.constant 0 : i32
    %c0_i32_1 = arith.constant 0 : i32
    return %c0_i32, %c0_i32_0 : i32, i32
  }
  func.func @transform_4(%arg0: i32) -> (i32, i32) {
    %c0_i32 = arith.constant 0 : i32
    %c0_i32_0 = arith.constant 0 : i32
    %c0_i32_1 = arith.constant 0 : i32
    return %c0_i32, %c0_i32_0 : i32, i32
  }
  func.func @transform_5(%arg0: i32) -> (i32, i32) {
    %c0_i32 = arith.constant 0 : i32
    %c0_i32_0 = arith.constant 0 : i32
    %c0_i32_1 = arith.constant 0 : i32
    return %c0_i32, %c0_i32_0 : i32, i32
  }
  func.func @transform_6(%arg0: i32) -> (i32, i32) {
    %c0_i32 = arith.constant 0 : i32
    %c0_i32_0 = arith.constant 0 : i32
    %c0_i32_1 = arith.constant 0 : i32
    return %c0_i32, %c0_i32_0 : i32, i32
  }
  func.func @transform_7(%arg0: i32) -> (i32, i32) {
    %c0_i32 = arith.constant 0 : i32
    %c0_i32_0 = arith.constant 0 : i32
    return %arg0, %c0_i32 : i32, i32
  }
}

</mosaic_0001>

<bundles_post_ra>
// kernel: forward.1
= control target key start
LH: loop header
LB: loop body
LE: loop exit
PB: predicated region body
PF: predicated region fallthrough
CT: control target
= control target key end

     0   :  { %12 = vsyncpa [#allocation3], 0  ;;  %s7490_s0 = inlined_call_operand.vmem [shape: bf16[32,256], index: 0, kind: input, shape index: {}]   ;;  %s7491_s1 = inlined_call_operand.hbm [shape: bf16[256,512], index: 1, kind: input, shape index: {}]   ;;  %s7492_s2 = inlined_call_operand.hbm [shape: bf16[512,512], index: 2, kind: input, shape index: {}]   ;;  %s7493_s3 = inlined_call_operand.hbm [shape: bf16[512,512], index: 3, kind: input, shape index: {}]   ;;  %s7494_s4 = inlined_call_operand.hbm [shape: bf16[512,512], index: 4, kind: input, shape index: {}]   ;;  %s7495_s5 = inlined_call_operand.hbm [shape: bf16[512,128], index: 5, kind: input, shape index: {}]   ;;  %s7496_s6 = inlined_call_operand.vmem [shape: f32[1,2176], index: 6, kind: input, shape index: {}]   ;;  %s7497_s7 = inlined_call_operand.vmem [shape: f32[32,128], index: 7, kind: output, shape index: {}]  }
   0x1   :  { %13 = vsyncpa [#allocation5], 0 }
   0x2   :  { %14 = vsyncpa [#allocation8], 0  ;;  %s34_s26 = sshll.u32 %s7492_s2, 4  ;;  %s6931_s27 = smov [#allocation4]   ;;  %s35_s26 = int_to_ptr.hbm [resolvable:$true] %s34_s26 }
   0x3   :  { %s36_s28 = sshll.u32 %s6931_s27, 4  ;;  %s60_s8 = sshll.u32 %s7494_s4, 4  ;;  %s37_s28 = int_to_ptr.vmem [resolvable:$true] %s36_s28  ;;  %s61_s8 = int_to_ptr.hbm [resolvable:$true] %s60_s8 }
   0x4   :  { %s6932_s9 = smov 256   ;;  %s6933_s10 = smov 16  }
   0x5   :  { %42 = dma.hbm_to_vmem [thread:$0]  %s35_s26, 16384, %s37_s28, [#allocation5], %s6932_s9, %s6932_s9, %s6933_s10  }
   0x6   :  { %s6934_s11 = smov [#allocation7]   ;;  %s21_s15 = sshll.u32 %s7491_s1, 4  ;;  %s22_s15 = int_to_ptr.hbm [resolvable:$true] %s21_s15 }
   0x7   :  { %s62_s12 = sshll.u32 %s6934_s11, 4  ;;  %s47_s17 = sshll.u32 %s7493_s3, 4  ;;  %s63_s12 = int_to_ptr.vmem [resolvable:$true] %s62_s12  ;;  %s48_s17 = int_to_ptr.hbm [resolvable:$true] %s47_s17 }
   0x8   :  { %68 = dma.hbm_to_vmem [thread:$0]  %s61_s8, 16384, %s63_s12, [#allocation8], %s6932_s9, %s6932_s9, %s6933_s10  }
   0x9   :  { %s6935_s18 = smov [#allocation2]   ;;  %s6936_s4 = smov [#allocation6]  }
   0xa   :  { %s23_s19 = sshll.u32 %s6935_s18, 4  ;;  %s49_s20 = sshll.u32 %s6936_s4, 4  ;;  %s24_s19 = int_to_ptr.vmem [resolvable:$true] %s23_s19  ;;  %s50_s20 = int_to_ptr.vmem [resolvable:$true] %s49_s20 }
   0xb   :  { %29 = dma.hbm_to_vmem [thread:$0]  %s22_s15, 8192, %s24_s19, [#allocation3], %s6932_s9, %s6932_s9, %s6933_s10  }
   0xc   :  { %s73_s23 = sshll.u32 %s7495_s5, 4  ;;  %s6937_s1 = smov [#allocation9]   ;;  %s74_s23 = int_to_ptr.hbm [resolvable:$true] %s73_s23 }
   0xd   :  { %55 = dma.hbm_to_vmem [thread:$0]  %s48_s17, 16384, %s50_s20, [#allocation5], %s6932_s9, %s6932_s9, %s6933_s10  }
   0xe   :  { %s75_s24 = sshll.u32 %s6937_s1, 4  ;;  %s6938_s25 = smov 64   ;;  %s76_s24 = int_to_ptr.vmem [resolvable:$true] %s75_s24 }
   0xf   :  { %s6939_s26 = smov 4  }
  0x10   :  { %81 = dma.hbm_to_vmem [thread:$0]  %s74_s23, 4096, %s76_s24, [#allocation8], %s6938_s25, %s6938_s25, %s6939_s26  }
  0x11   :  { %6925 = dma.done.wait [#allocation3], 8192  }
  0x12   :  { %6926 = vsyncadd [#allocation3], 4294959104 }
  0x13   :  { %6927 = dma.done.wait [#allocation5], 32768  }
  0x14   :  { %6928 = vsyncadd [#allocation5], 4294934528 }
  0x15   :  { %6929 = dma.done.wait [#allocation8], 20480  }
  0x16   :  { %6930 = vsyncadd [#allocation8], 4294946816  ;;  %v4497_v0 = vld [vmem:[#allocation2 + $0xe0] sm:$0xf]  ;;  %v6337_v1 = vld [vmem:[#allocation2 + $0xec] sm:$0xf0] }
  0x17   :  { %v4625_v2 = vld [vmem:[#allocation2 + $0x1e0] sm:$0xf]  ;;  %v4498_v3 = vor.u32 %v6337_v1, %v4497_v0  ;;  %v6369_v4 = vld [vmem:[#allocation2 + $0x1ec] sm:$0xf0]  ;;  %v6335_v5 = vld [vmem:[#allocation2 + $0xe4] sm:$0xf] }
  0x18   :  { %v4499_v6 = vld [vmem:[#allocation2 + $0xf0] sm:$0xf0]  ;;  %v4626_v7 = vor.u32 %v6369_v4, %v4625_v2  ;;  %v6367_v9 = vld [vmem:[#allocation2 + $0x1e4] sm:$0xf]  ;;  %v4481_v11 = vld [vmem:[#allocation2 + $0xc0] sm:$0xf] }
  0x19   :  { %v4502_v8 = vor.u32 %v6335_v5, %v4499_v6  ;;  %v4627_v10 = vld [vmem:[#allocation2 + $0x1f0] sm:$0xf0]  ;;  %522 = vmatpush.bf16.msra.mxu0 %v4498_v3  ;;  %v6333_v13 = vld [vmem:[#allocation2 + $0xcc] sm:$0xf0]  ;;  %v4609_v14 = vld [vmem:[#allocation2 + $0x1c0] sm:$0xf] }
  0x1a   :  { %v4630_v12 = vor.u32 %v6367_v9, %v4627_v10  ;;  %v6365_v15 = vld [vmem:[#allocation2 + $0x1cc] sm:$0xf0]  ;;  %541 = vmatpush.bf16.msra.mxu1 %v4626_v7  ;;  %v4482_v16 = vor.u32 %v6333_v13, %v4481_v11  ;;  %v6331_v18 = vld [vmem:[#allocation2 + $0xc4] sm:$0xf]  ;;  %v4483_v19 = vld [vmem:[#allocation2 + $0xd0] sm:$0xf0] }
  0x1b   :  { %560 = vmatpush.bf16.msra.mxu2 %v4502_v8  ;;  %v4610_v17 = vor.u32 %v6365_v15, %v4609_v14  ;;  %v6363_v20 = vld [vmem:[#allocation2 + $0x1c4] sm:$0xf]  ;;  %v4486_v21 = vor.u32 %v6331_v18, %v4483_v19  ;;  %v4611_v22 = vld [vmem:[#allocation2 + $0x1d0] sm:$0xf0]  ;;  %v4465_v23 = vld [vmem:[#allocation2 + $0xa0] sm:$0xf] }
  0x1c   :  { %579 = vmatpush.bf16.msra.mxu3 %v4630_v12  ;;  %v6329_v24 = vld [vmem:[#allocation2 + $0xac] sm:$0xf0]  ;;  %v4614_v25 = vor.u32 %v6363_v20, %v4611_v22  ;;  %v4593_v26 = vld [vmem:[#allocation2 + $0x1a0] sm:$0xf]  ;;  %v6327_v28 = vld [vmem:[#allocation2 + $0xa4] sm:$0xf] }
  0x1d   :  { %v6361_v27 = vld [vmem:[#allocation2 + $0x1ac] sm:$0xf0]  ;;  %523 = vmatpush.bf16.msra.mxu0 %v4482_v16  ;;  %v4466_v29 = vor.u32 %v6329_v24, %v4465_v23  ;;  %v4467_v30 = vld [vmem:[#allocation2 + $0xb0] sm:$0xf0]  ;;  %v6359_v31 = vld [vmem:[#allocation2 + $0x1a4] sm:$0xf] }
  0x1e   :  { %v4595_v32 = vld [vmem:[#allocation2 + $0x1b0] sm:$0xf0]  ;;  %542 = vmatpush.bf16.msra.mxu1 %v4610_v17  ;;  %v4594_v33 = vor.u32 %v6361_v27, %v4593_v26  ;;  %v4470_v34 = vor.u32 %v6327_v28, %v4467_v30  ;;  %v4449_v35 = vld [vmem:[#allocation2 + $0x80] sm:$0xf]  ;;  %v6325_v36 = vld [vmem:[#allocation2 + $0x8c] sm:$0xf0] }
  0x1f   :  { %561 = vmatpush.bf16.msra.mxu2 %v4486_v21  ;;  %v4577_v37 = vld [vmem:[#allocation2 + $0x180] sm:$0xf]  ;;  %v4598_v38 = vor.u32 %v6359_v31, %v4595_v32  ;;  %v6357_v39 = vld [vmem:[#allocation2 + $0x18c] sm:$0xf0]  ;;  %v6323_v40 = vld [vmem:[#allocation2 + $0x84] sm:$0xf]  ;;  %v4450_v44 = vor.u32 %v6325_v36, %v4449_v35 }
  0x20   :  { %580 = vmatpush.bf16.msra.mxu3 %v4614_v25  ;;  %v4451_v41 = vld [vmem:[#allocation2 + $0x90] sm:$0xf0]  ;;  %v6355_v42 = vld [vmem:[#allocation2 + $0x184] sm:$0xf]  ;;  %v4578_v45 = vor.u32 %v6357_v39, %v4577_v37  ;;  %v4433_v47 = vld [vmem:[#allocation2 + $0x60] sm:$0xf] }
  0x21   :  { %v4579_v43 = vld [vmem:[#allocation2 + $0x190] sm:$0xf0]  ;;  %524 = vmatpush.bf16.msra.mxu0 %v4466_v29  ;;  %v4454_v46 = vor.u32 %v6323_v40, %v4451_v41  ;;  %v6321_v48 = vld [vmem:[#allocation2 + $0x6c] sm:$0xf0]  ;;  %v4561_v49 = vld [vmem:[#allocation2 + $0x160] sm:$0xf] }
  0x22   :  { %543 = vmatpush.bf16.msra.mxu1 %v4594_v33  ;;  %v4582_v50 = vor.u32 %v6355_v42, %v4579_v43  ;;  %v6353_v51 = vld [vmem:[#allocation2 + $0x16c] sm:$0xf0]  ;;  %v6319_v52 = vld [vmem:[#allocation2 + $0x64] sm:$0xf]  ;;  %v4435_v53 = vld [vmem:[#allocation2 + $0x70] sm:$0xf0]  ;;  %v4434_v56 = vor.u32 %v6321_v48, %v4433_v47 }
  0x23   :  { %562 = vmatpush.bf16.msra.mxu2 %v4470_v34  ;;  %v6351_v54 = vld [vmem:[#allocation2 + $0x164] sm:$0xf]  ;;  %v4563_v55 = vld [vmem:[#allocation2 + $0x170] sm:$0xf0]  ;;  %v4562_v57 = vor.u32 %v6353_v51, %v4561_v49  ;;  %v4438_v58 = vor.u32 %v6319_v52, %v4435_v53  ;;  %v4417_v59 = vld [vmem:[#allocation2 + $0x40] sm:$0xf] }
  0x24   :  { %581 = vmatpush.bf16.msra.mxu3 %v4598_v38  ;;  %v6317_v60 = vld [vmem:[#allocation2 + $0x4c] sm:$0xf0]  ;;  %v4545_v61 = vld [vmem:[#allocation2 + $0x140] sm:$0xf]  ;;  %v4566_v62 = vor.u32 %v6351_v54, %v4563_v55  ;;  %v6315_v0 = vld [vmem:[#allocation2 + $0x44] sm:$0xf] }
  0x25   :  { %525 = vmatpush.bf16.msra.mxu0 %v4450_v44  ;;  %v6349_v63 = vld [vmem:[#allocation2 + $0x14c] sm:$0xf0]  ;;  %v4419_v1 = vld [vmem:[#allocation2 + $0x50] sm:$0xf0]  ;;  %v6347_v2 = vld [vmem:[#allocation2 + $0x144] sm:$0xf]  ;;  %v4418_v4 = vor.u32 %v6317_v60, %v4417_v59 }
  0x26   :  { %544 = vmatpush.bf16.msra.mxu1 %v4578_v45  ;;  %v4547_v3 = vld [vmem:[#allocation2 + $0x150] sm:$0xf0]  ;;  %v4546_v5 = vor.u32 %v6349_v63, %v4545_v61  ;;  %v4422_v6 = vor.u32 %v6315_v0, %v4419_v1  ;;  %v4401_v7 = vld [vmem:[#allocation2 + $0x20] sm:$0xf]  ;;  %v6313_v8 = vld [vmem:[#allocation2 + $0x2c] sm:$0xf0] }
  0x27   :  { %563 = vmatpush.bf16.msra.mxu2 %v4454_v46  ;;  %v4529_v9 = vld [vmem:[#allocation2 + $0x120] sm:$0xf]  ;;  %v4550_v10 = vor.u32 %v6347_v2, %v4547_v3  ;;  %v6345_v11 = vld [vmem:[#allocation2 + $0x12c] sm:$0xf0]  ;;  %v6311_v12 = vld [vmem:[#allocation2 + $0x24] sm:$0xf]  ;;  %v4402_v16 = vor.u32 %v6313_v8, %v4401_v7 }
  0x28   :  { %582 = vmatpush.bf16.msra.mxu3 %v4582_v50  ;;  %v4403_v13 = vld [vmem:[#allocation2 + $0x30] sm:$0xf0]  ;;  %v6343_v14 = vld [vmem:[#allocation2 + $0x124] sm:$0xf]  ;;  %v4385_v17 = vld [vmem:[#allocation2] sm:$0xf]  ;;  %v4530_v19 = vor.u32 %v6345_v11, %v4529_v9 }
  0x29   :  { %526 = vmatpush.bf16.msra.mxu0 %v4434_v56  ;;  %v4531_v15 = vld [vmem:[#allocation2 + $0x130] sm:$0xf0]  ;;  %v6309_v18 = vld [vmem:[#allocation2 + $0xc] sm:$0xf0]  ;;  %v4406_v20 = vor.u32 %v6311_v12, %v4403_v13  ;;  %v4513_v21 = vld [vmem:[#allocation2 + $0x100] sm:$0xf] }
  0x2a   :  { %545 = vmatpush.bf16.msra.mxu1 %v4562_v57  ;;  %v6341_v22 = vld [vmem:[#allocation2 + $0x10c] sm:$0xf0]  ;;  %v6307_v23 = vld [vmem:[#allocation2 + $0x4] sm:$0xf]  ;;  %v4534_v24 = vor.u32 %v6343_v14, %v4531_v15  ;;  %v4387_v25 = vld [vmem:[#allocation2 + $0x10] sm:$0xf0]  ;;  %v4386_v31 = vor.u32 %v6309_v18, %v4385_v17 }
  0x2b   :  { %564 = vmatpush.bf16.msra.mxu2 %v4438_v58  ;;  %v6339_v26 = vld [vmem:[#allocation2 + $0x104] sm:$0xf]  ;;  %v4515_v27 = vld [vmem:[#allocation2 + $0x110] sm:$0xf0]  ;;  %v4369_v28 = vld [vmem:[%s7490_s0] sm:$0xf]  ;;  %v4514_v35 = vor.u32 %v6341_v22, %v4513_v21  ;;  %v4390_v36 = vor.u32 %v6307_v23, %v4387_v25 }
  0x2c   :  { %583 = vmatpush.bf16.msra.mxu3 %v4566_v62  ;;  %v6336_v29 = vld [vmem:[#allocation2 + $0xec] sm:$0xf]  ;;  %v4507_v30 = vld [vmem:[#allocation2 + $0xf8] sm:$0xf0]  ;;  %v6304_v32 = vld [vmem:[%s7490_s0 + $0x4] sm:$0xf0]  ;;  %v4518_v39 = vor.u32 %v6339_v26, %v4515_v27 }
  0x2d   :  { %527 = vmatpush.bf16.msra.mxu0 %v4418_v4  ;;  %v4633_v33 = vld [vmem:[#allocation2 + $0x1e8] sm:$0xf]  ;;  %v6370_v34 = vld [vmem:[#allocation2 + $0x1f4] sm:$0xf0]  ;;  %v6303_v37 = vld [vmem:[%s7490_s0 + $0x4] sm:$0xf]  ;;  %v4510_v40 = vor.u32 %v6336_v29, %v4507_v30  ;;  %v7007_v44 = vor.u32 %v6304_v32, %v4369_v28 }
  0x2e   :  { %546 = vmatpush.bf16.msra.mxu1 %v4546_v5  ;;  %v4371_v38 = vld [vmem:[%s7490_s0 + $0x8] sm:$0xf0]  ;;  %v4505_v41 = vld [vmem:[#allocation2 + $0xe8] sm:$0xf]  ;;  %v6338_v42 = vld [vmem:[#allocation2 + $0xf4] sm:$0xf0]  ;;  %v4634_v45 = vor.u32 %v6370_v34, %v4633_v33 }
  0x2f   :  { %565 = vmatpush.bf16.msra.mxu2 %v4422_v6  ;;  %v6368_v43 = vld [vmem:[#allocation2 + $0x1ec] sm:$0xf]  ;;  %v4635_v46 = vld [vmem:[#allocation2 + $0x1f8] sm:$0xf0]  ;;  %v7009_v49 = vor.u32 %v6303_v37, %v4371_v38  ;;  %v4617_v50 = vld [vmem:[#allocation2 + $0x1c8] sm:$0xf]  ;;  %v4506_v52 = vor.u32 %v6338_v42, %v4505_v41 }
  0x30   :  { %584 = vmatpush.bf16.msra.mxu3 %v4550_v10  ;;  %v6332_v47 = vld [vmem:[#allocation2 + $0xcc] sm:$0xf]  ;;  %v4491_v48 = vld [vmem:[#allocation2 + $0xd8] sm:$0xf0]  ;;  %v6366_v51 = vld [vmem:[#allocation2 + $0x1d4] sm:$0xf0]  ;;  %v4638_v53 = vor.u32 %v6368_v43, %v4635_v46 }
  0x31   :  { %528 = vmatpush.bf16.msra.mxu0 %v4402_v16  ;;  %v4494_v54 = vor.u32 %v6332_v47, %v4491_v48  ;;  %v4489_v55 = vld [vmem:[#allocation2 + $0xc8] sm:$0xf]  ;;  %v6334_v56 = vld [vmem:[#allocation2 + $0xd4] sm:$0xf0]  ;;  %v6364_v57 = vld [vmem:[#allocation2 + $0x1cc] sm:$0xf]  ;;  %v4618_v58 = vor.u32 %v6366_v51, %v4617_v50 }
  0x32   :  { %547 = vmatpush.bf16.msra.mxu1 %v4530_v19  ;;  %v4619_v59 = vld [vmem:[#allocation2 + $0x1d8] sm:$0xf0]  ;;  %v6328_v60 = vld [vmem:[#allocation2 + $0xac] sm:$0xf]  ;;  %v4601_v62 = vld [vmem:[#allocation2 + $0x1a8] sm:$0xf]  ;;  %v4490_v0 = vor.u32 %v6334_v56, %v4489_v55 }
  0x33   :  { %566 = vmatpush.bf16.msra.mxu2 %v4406_v20  ;;  %v4475_v61 = vld [vmem:[#allocation2 + $0xb8] sm:$0xf0]  ;;  %v6362_v63 = vld [vmem:[#allocation2 + $0x1b4] sm:$0xf0]  ;;  %v4622_v1 = vor.u32 %v6364_v57, %v4619_v59  ;;  %v4473_v3 = vld [vmem:[#allocation2 + $0xa8] sm:$0xf] }
  0x34   :  { %585 = vmatpush.bf16.msra.mxu3 %v4534_v24  ;;  %v4478_v2 = vor.u32 %v6328_v60, %v4475_v61  ;;  %v6330_v4 = vld [vmem:[#allocation2 + $0xb4] sm:$0xf0]  ;;  %v6360_v5 = vld [vmem:[#allocation2 + $0x1ac] sm:$0xf]  ;;  %v4602_v6 = vor.u32 %v6362_v63, %v4601_v62  ;;  %v4603_v7 = vld [vmem:[#allocation2 + $0x1b8] sm:$0xf0] }
  0x35   :  { %529 = vmatpush.bf16.msra.mxu0 %v4386_v31  ;;  %v6324_v8 = vld [vmem:[#allocation2 + $0x8c] sm:$0xf]  ;;  %v4459_v9 = vld [vmem:[#allocation2 + $0x98] sm:$0xf0]  ;;  %v4585_v10 = vld [vmem:[#allocation2 + $0x188] sm:$0xf]  ;;  %v4474_v12 = vor.u32 %v6330_v4, %v4473_v3  ;;  %v4606_v14 = vor.u32 %v6360_v5, %v4603_v7 }
  0x36   :  { %548 = vmatpush.bf16.msra.mxu1 %v4514_v35  ;;  %v6358_v11 = vld [vmem:[#allocation2 + $0x194] sm:$0xf0]  ;;  %v4457_v13 = vld [vmem:[#allocation2 + $0x88] sm:$0xf]  ;;  %v4462_v15 = vor.u32 %v6324_v8, %v4459_v9  ;;  %v6356_v17 = vld [vmem:[#allocation2 + $0x18c] sm:$0xf] }
  0x37   :  { %567 = vmatpush.bf16.msra.mxu2 %v4390_v36  ;;  %v6326_v16 = vld [vmem:[#allocation2 + $0x94] sm:$0xf0]  ;;  %v4587_v18 = vld [vmem:[#allocation2 + $0x198] sm:$0xf0]  ;;  %v4586_v19 = vor.u32 %v6358_v11, %v4585_v10  ;;  %v4377_v20 = vld [vmem:[%s7490_s0 + $0x10] sm:$0xf] }
  0x38   :  { %586 = vmatpush.bf16.msra.mxu3 %v4518_v39  ;;  %530 = vmatmul.bf16.vlgmr.msra.gmra.mxu0 %v7007_v44  ;;  %v6320_v21 = vld [vmem:[#allocation2 + $0x6c] sm:$0xf]  ;;  %v4443_v22 = vld [vmem:[#allocation2 + $0x78] sm:$0xf0]  ;;  %v6306_v23 = vld [vmem:[%s7490_s0 + $0x14] sm:$0xf0]  ;;  %v4458_v26 = vor.u32 %v6326_v16, %v4457_v13  ;;  %v4590_v30 = vor.u32 %v6356_v17, %v4587_v18 }
  0x39   :  { %549 = vmatmul.bf16.vlgmr.msra.gmra.mxu1 %v7009_v49  ;;  %598 = vmatpush.bf16.msrb.mxu0 %v4506_v52  ;;  %v4569_v24 = vld [vmem:[#allocation2 + $0x168] sm:$0xf]  ;;  %v6354_v25 = vld [vmem:[#allocation2 + $0x174] sm:$0xf0]  ;;  %v6305_v27 = vld [vmem:[%s7490_s0 + $0x14] sm:$0xf]  ;;  %v4446_v31 = vor.u32 %v6320_v21, %v4443_v22  ;;  %v7027_v34 = vor.u32 %v6306_v23, %v4377_v20 }
  0x3a   :  { %617 = vmatpush.bf16.msrb.mxu1 %v4634_v45  ;;  %568 = vmatmul.bf16.vlgmr.msra.gmra.mxu2 %v7007_v44  ;;  %v4379_v28 = vld [vmem:[%s7490_s0 + $0x18] sm:$0xf0]  ;;  %v4441_v29 = vld [vmem:[#allocation2 + $0x68] sm:$0xf]  ;;  %v6322_v32 = vld [vmem:[#allocation2 + $0x74] sm:$0xf0]  ;;  %v4570_v35 = vor.u32 %v6354_v25, %v4569_v24 }
  0x3b   :  { %636 = vmatpush.bf16.msrb.mxu2 %v4510_v40  ;;  %587 = vmatmul.bf16.vlgmr.msra.gmra.mxu3 %v7009_v49  ;;  %v6352_v33 = vld [vmem:[#allocation2 + $0x16c] sm:$0xf]  ;;  %v4571_v36 = vld [vmem:[#allocation2 + $0x178] sm:$0xf0]  ;;  %v7029_v39 = vor.u32 %v6305_v27, %v4379_v28  ;;  %v4553_v40 = vld [vmem:[#allocation2 + $0x148] sm:$0xf]  ;;  %v4442_v42 = vor.u32 %v6322_v32, %v4441_v29 }
  0x3c   :  { %655 = vmatpush.bf16.msrb.mxu3 %v4638_v53  ;;  %v6316_v37 = vld [vmem:[#allocation2 + $0x4c] sm:$0xf]  ;;  %v4427_v38 = vld [vmem:[#allocation2 + $0x58] sm:$0xf0]  ;;  %v6350_v41 = vld [vmem:[#allocation2 + $0x154] sm:$0xf0]  ;;  %v4574_v43 = vor.u32 %v6352_v33, %v4571_v36 }
  0x3d   :  { %599 = vmatpush.bf16.msrb.mxu0 %v4490_v0  ;;  %v4430_v45 = vor.u32 %v6316_v37, %v4427_v38  ;;  %v4425_v46 = vld [vmem:[#allocation2 + $0x48] sm:$0xf]  ;;  %v6318_v47 = vld [vmem:[#allocation2 + $0x54] sm:$0xf0]  ;;  %v6348_v48 = vld [vmem:[#allocation2 + $0x14c] sm:$0xf]  ;;  %v4554_v50 = vor.u32 %v6350_v41, %v4553_v40 }
  0x3e   :  { %618 = vmatpush.bf16.msrb.mxu1 %v4618_v58  ;;  %v4555_v51 = vld [vmem:[#allocation2 + $0x158] sm:$0xf0]  ;;  %v6312_v52 = vld [vmem:[#allocation2 + $0x2c] sm:$0xf]  ;;  %v6346_v55 = vld [vmem:[#allocation2 + $0x134] sm:$0xf0]  ;;  %v4426_v56 = vor.u32 %v6318_v47, %v4425_v46 }
  0x3f   :  { %637 = vmatpush.bf16.msrb.mxu2 %v4494_v54  ;;  %v4411_v53 = vld [vmem:[#allocation2 + $0x38] sm:$0xf0]  ;;  %v4537_v54 = vld [vmem:[#allocation2 + $0x128] sm:$0xf]  ;;  %v4558_v57 = vor.u32 %v6348_v48, %v4555_v51  ;;  %v6314_v60 = vld [vmem:[#allocation2 + $0x34] sm:$0xf0] }
  0x40   :  { %656 = vmatpush.bf16.msrb.mxu3 %v4622_v1  ;;  %v4414_v58 = vor.u32 %v6312_v52, %v4411_v53  ;;  %v4409_v59 = vld [vmem:[#allocation2 + $0x28] sm:$0xf]  ;;  %v6344_v61 = vld [vmem:[#allocation2 + $0x12c] sm:$0xf]  ;;  %v4538_v62 = vor.u32 %v6346_v55, %v4537_v54  ;;  %v4539_v63 = vld [vmem:[#allocation2 + $0x138] sm:$0xf0] }
  0x41   :  { %600 = vmatpush.bf16.msrb.mxu0 %v4474_v12  ;;  %v6308_v0 = vld [vmem:[#allocation2 + $0xc] sm:$0xf]  ;;  %v4395_v1 = vld [vmem:[#allocation2 + $0x18] sm:$0xf0]  ;;  %v6342_v3 = vld [vmem:[#allocation2 + $0x114] sm:$0xf0]  ;;  %v4410_v4 = vor.u32 %v6314_v60, %v4409_v59  ;;  %v4542_v7 = vor.u32 %v6344_v61, %v4539_v63 }
  0x42   :  { %619 = vmatpush.bf16.msrb.mxu1 %v4602_v6  ;;  %v4881_v5 = vld [vmem:[#allocation4 + $0x1e0] sm:$0xf]  ;;  %v6433_v6 = vld [vmem:[#allocation4 + $0x1ec] sm:$0xf0]  ;;  %v4398_v8 = vor.u32 %v6308_v0, %v4395_v1  ;;  %v4393_v9 = vld [vmem:[#allocation2 + $0x8] sm:$0xf] }
  0x43   :  { %638 = vmatpush.bf16.msrb.mxu2 %v4478_v2  ;;  %v4521_v2 = vld [vmem:[#allocation2 + $0x108] sm:$0xf]  ;;  %v6310_v10 = vld [vmem:[#allocation2 + $0x14] sm:$0xf0]  ;;  %v6340_v11 = vld [vmem:[#allocation2 + $0x10c] sm:$0xf]  ;;  %v4882_v16 = vor.u32 %v6433_v6, %v4881_v5 }
  0x44   :  { %657 = vmatpush.bf16.msrb.mxu3 %v4606_v14  ;;  %v4522_v12 = vor.u32 %v6342_v3, %v4521_v2  ;;  %v4523_v13 = vld [vmem:[#allocation2 + $0x118] sm:$0xf0]  ;;  %v4753_v14 = vld [vmem:[#allocation4 + $0xe0] sm:$0xf]  ;;  %v4394_v17 = vor.u32 %v6310_v10, %v4393_v9  ;;  %v6397_v21 = vld [vmem:[#allocation4 + $0xcc] sm:$0xf0] }
  0x45   :  { %601 = vmatpush.bf16.msrb.mxu0 %v4458_v26  ;;  %v4526_v18 = vor.u32 %v6340_v11, %v4523_v13  ;;  %v4737_v20 = vld [vmem:[#allocation4 + $0xc0] sm:$0xf]  ;;  %v6429_v23 = vld [vmem:[#allocation4 + $0x1cc] sm:$0xf0]  ;;  %v6399_v61 = vld [vmem:[#allocation4 + $0xe4] sm:$0xf] }
  0x46   :  { %620 = vmatpush.bf16.msrb.mxu1 %v4586_v19  ;;  %v4865_v22 = vld [vmem:[#allocation4 + $0x1c0] sm:$0xf]  ;;  %v4738_v24 = vor.u32 %v6397_v21, %v4737_v20  ;;  %v6393_v27 = vld [vmem:[#allocation4 + $0xac] sm:$0xf0]  ;;  %v4755_v63 = vld [vmem:[#allocation4 + $0xf0] sm:$0xf0] }
  0x47   :  { %639 = vmatpush.bf16.msrb.mxu2 %v4462_v15  ;;  %v6401_v15 = vld [vmem:[#allocation4 + $0xec] sm:$0xf0]  ;;  %v4866_v25 = vor.u32 %v6429_v23, %v4865_v22  ;;  %v4721_v26 = vld [vmem:[#allocation4 + $0xa0] sm:$0xf]  ;;  %v4758_v0 = vor.u32 %v6399_v61, %v4755_v63  ;;  %v6395_v6 = vld [vmem:[#allocation4 + $0xc4] sm:$0xf] }
  0x48   :  { %658 = vmatpush.bf16.msrb.mxu3 %v4590_v30  ;;  %535 = vmatmul.bf16.gmra.mxu0 %v7027_v34  ;;  %v4754_v19 = vor.u32 %v6401_v15, %v4753_v14  ;;  %v4722_v28 = vor.u32 %v6393_v27, %v4721_v26  ;;  %v4705_v29 = vld [vmem:[#allocation4 + $0x80] sm:$0xf]  ;;  %v6389_v30 = vld [vmem:[#allocation4 + $0x8c] sm:$0xf0]  ;;  %v4883_v14 = vld [vmem:[#allocation4 + $0x1f0] sm:$0xf0] }
  0x49   :  { %554 = vmatmul.bf16.gmra.mxu1 %v7029_v39  ;;  %602 = vmatpush.bf16.msrb.mxu0 %v4442_v42  ;;  %v4849_v32 = vld [vmem:[#allocation4 + $0x1a0] sm:$0xf]  ;;  %v6421_v38 = vld [vmem:[#allocation4 + $0x18c] sm:$0xf0]  ;;  %v4723_v20 = vld [vmem:[#allocation4 + $0xb0] sm:$0xf0] }
  0x4a   :  { %621 = vmatpush.bf16.msrb.mxu1 %v4570_v35  ;;  %573 = vmatmul.bf16.gmra.mxu2 %v7027_v34  ;;  %v6385_v35 = vld [vmem:[#allocation4 + $0x6c] sm:$0xf0]  ;;  %v4833_v37 = vld [vmem:[#allocation4 + $0x180] sm:$0xf]  ;;  %v4867_v27 = vld [vmem:[#allocation4 + $0x1d0] sm:$0xf0] }
  0x4b   :  { %640 = vmatpush.bf16.msrb.mxu2 %v4446_v31  ;;  %592 = vmatmul.bf16.gmra.mxu3 %v7029_v39  ;;  %v4706_v31 = vor.u32 %v6389_v30, %v4705_v29  ;;  %v4834_v40 = vor.u32 %v6421_v38, %v4833_v37  ;;  %v4673_v41 = vld [vmem:[#allocation4 + $0x40] sm:$0xf]  ;;  %v6381_v42 = vld [vmem:[#allocation4 + $0x4c] sm:$0xf0]  ;;  %v4675_v61 = vld [vmem:[#allocation4 + $0x50] sm:$0xf0] }
  0x4c   :  { %659 = vmatpush.bf16.msrb.mxu3 %v4574_v43  ;;  %v4674_v43 = vor.u32 %v6381_v42, %v4673_v41  ;;  %v6417_v46 = vld [vmem:[#allocation4 + $0x16c] sm:$0xf0]  ;;  %v4641_v53 = vld [vmem:[#allocation4] sm:$0xf]  ;;  %v4851_v41 = vld [vmem:[#allocation4 + $0x1b0] sm:$0xf0] }
  0x4d   :  { %603 = vmatpush.bf16.msrb.mxu0 %v4426_v56  ;;  %v6377_v47 = vld [vmem:[#allocation4 + $0x2c] sm:$0xf0]  ;;  %v4785_v56 = vld [vmem:[#allocation4 + $0x120] sm:$0xf] }
  0x4e   :  { %622 = vmatpush.bf16.msrb.mxu1 %v4554_v50  ;;  %v4801_v50 = vld [vmem:[#allocation4 + $0x140] sm:$0xf]  ;;  %v6413_v51 = vld [vmem:[#allocation4 + $0x14c] sm:$0xf0] }
  0x4f   :  { %641 = vmatpush.bf16.msrb.mxu2 %v4430_v45  ;;  %v4817_v45 = vld [vmem:[#allocation4 + $0x160] sm:$0xf]  ;;  %v4802_v52 = vor.u32 %v6413_v51, %v4801_v50  ;;  %v6373_v54 = vld [vmem:[#allocation4 + $0xc] sm:$0xf0] }
  0x50   :  { %660 = vmatpush.bf16.msrb.mxu3 %v4558_v57  ;;  %v4642_v55 = vor.u32 %v6373_v54, %v4641_v53  ;;  %v6409_v57 = vld [vmem:[#allocation4 + $0x12c] sm:$0xf0]  ;;  %v5009_v59 = vld [vmem:[#allocation4 + $0x2e0] sm:$0xf]  ;;  %v4835_v54 = vld [vmem:[#allocation4 + $0x190] sm:$0xf0] }
  0x51   :  { %604 = vmatpush.bf16.msrb.mxu0 %v4410_v4  ;;  %v6465_v60 = vld [vmem:[#allocation4 + $0x2ec] sm:$0xf0]  ;;  %v4769_v1 = vld [vmem:[#allocation4 + $0x100] sm:$0xf] }
  0x52   :  { %623 = vmatpush.bf16.msrb.mxu1 %v4538_v62  ;;  %v5010_v62 = vor.u32 %v6465_v60, %v5009_v59  ;;  %v6405_v2 = vld [vmem:[#allocation4 + $0x10c] sm:$0xf0]  ;;  %v4993_v4 = vld [vmem:[#allocation4 + $0x2c0] sm:$0xf]  ;;  %v6379_v60 = vld [vmem:[#allocation4 + $0x44] sm:$0xf] }
  0x53   :  { %642 = vmatpush.bf16.msrb.mxu2 %v4414_v58  ;;  %v4786_v58 = vor.u32 %v6409_v57, %v4785_v56  ;;  %v4770_v3 = vor.u32 %v6405_v2, %v4769_v1  ;;  %v6461_v5 = vld [vmem:[#allocation4 + $0x2cc] sm:$0xf0]  ;;  %v5137_v10 = vld [vmem:[#allocation4 + $0x3e0] sm:$0xf]  ;;  %v4678_v63 = vor.u32 %v6379_v60, %v4675_v61  ;;  %v6415_v2 = vld [vmem:[#allocation4 + $0x164] sm:$0xf] }
  0x54   :  { %661 = vmatpush.bf16.msrb.mxu3 %v4542_v7  ;;  %v4994_v7 = vor.u32 %v6461_v5, %v4993_v4  ;;  %v6497_v11 = vld [vmem:[#allocation4 + $0x3ec] sm:$0xf0]  ;;  %v5121_v22 = vld [vmem:[#allocation4 + $0x3c0] sm:$0xf] }
  0x55   :  { %605 = vmatpush.bf16.msrb.mxu0 %v4394_v17  ;;  %v5138_v13 = vor.u32 %v6497_v11, %v5137_v10  ;;  %v6457_v17 = vld [vmem:[#allocation4 + $0x2ac] sm:$0xf0]  ;;  %v4961_v29 = vld [vmem:[#allocation4 + $0x280] sm:$0xf] }
  0x56   :  { %624 = vmatpush.bf16.msrb.mxu1 %v4522_v12  ;;  %v6431_v12 = vld [vmem:[#allocation4 + $0x1e4] sm:$0xf]  ;;  %v6493_v23 = vld [vmem:[#allocation4 + $0x3cc] sm:$0xf0]  ;;  %v5089_v50 = vld [vmem:[#allocation4 + $0x380] sm:$0xf] }
  0x57   :  { %643 = vmatpush.bf16.msrb.mxu2 %v4398_v8  ;;  %v4739_v8 = vld [vmem:[#allocation4 + $0xd0] sm:$0xf0]  ;;  %v4886_v15 = vor.u32 %v6431_v12, %v4883_v14  ;;  %v5122_v26 = vor.u32 %v6493_v23, %v5121_v22  ;;  %v6453_v30 = vld [vmem:[#allocation4 + $0x28c] sm:$0xf0]  ;;  %v4929_v57 = vld [vmem:[#allocation4 + $0x240] sm:$0xf] }
  0x58   :  { %662 = vmatpush.bf16.msrb.mxu3 %v4526_v18  ;;  %606 = vmatmul.bf16.vlgmr.msrb.gmra.mxu0 %v7007_v44  ;;  %v4742_v9 = vor.u32 %v6395_v6, %v4739_v8  ;;  %v6391_v18 = vld [vmem:[#allocation4 + $0xa4] sm:$0xf]  ;;  %v6485_v51 = vld [vmem:[#allocation4 + $0x38c] sm:$0xf0]  ;;  %v4913_v12 = vld [vmem:[#allocation4 + $0x220] sm:$0xf] }
  0x59   :  { %1476 = vmatpush.bf16.msra.mxu0 %v4754_v19  ;;  %625 = vmatmul.bf16.vlgmr.msrb.gmra.mxu1 %v7009_v49  ;;  %v4726_v21 = vor.u32 %v6391_v18, %v4723_v20  ;;  %v5090_v53 = vor.u32 %v6485_v51, %v5089_v50  ;;  %v6481_v1 = vld [vmem:[#allocation4 + $0x36c] sm:$0xf0]  ;;  %v6375_v14 = vld [vmem:[#allocation4 + $0x24] sm:$0xf]  ;;  %v5011_v50 = vld [vmem:[#allocation4 + $0x2f0] sm:$0xf0] }
  0x5a   :  { %1495 = vmatpush.bf16.msra.mxu1 %v4882_v16  ;;  %644 = vmatmul.bf16.vlgmr.msrb.gmra.mxu2 %v7007_v44  ;;  %v6425_v44 = vld [vmem:[#allocation4 + $0x1ac] sm:$0xf0]  ;;  %v4977_v16 = vld [vmem:[#allocation4 + $0x2a0] sm:$0xf]  ;;  %v4761_v51 = vld [vmem:[#allocation4 + $0xe8] sm:$0xf] }
  0x5b   :  { %663 = vmatmul.bf16.vlgmr.msrb.gmra.mxu3 %v7009_v49  ;;  %v4850_v33 = vor.u32 %v6425_v44, %v4849_v32  ;;  %v4689_v49 = vld [vmem:[#allocation4 + $0x60] sm:$0xf]  ;;  %1514 = vmatpush.bf16.msra.mxu2 %v5010_v62  ;;  %v4978_v19 = vor.u32 %v6457_v17, %v4977_v16  ;;  %v4962_v32 = vor.u32 %v6453_v30, %v4961_v29  ;;  %v4707_v44 = vld [vmem:[#allocation4 + $0x90] sm:$0xf0]  ;;  %v6477_v20 = vld [vmem:[#allocation4 + $0x34c] sm:$0xf0] }
  0x5c   :  { %v4690_v36 = vor.u32 %v6385_v35, %v4689_v49  ;;  %1533 = vmatpush.bf16.msra.mxu3 %v5138_v13  ;;  %v5105_v49 = vld [vmem:[#allocation4 + $0x3a0] sm:$0xf]  ;;  %v6489_v35 = vld [vmem:[#allocation4 + $0x3ac] sm:$0xf0]  ;;  %v4659_v16 = vld [vmem:[#allocation4 + $0x30] sm:$0xf0] }
  0x5d   :  { %1477 = vmatpush.bf16.msra.mxu0 %v4738_v24  ;;  %v6427_v24 = vld [vmem:[#allocation4 + $0x1c4] sm:$0xf]  ;;  %v6441_v13 = vld [vmem:[#allocation4 + $0x22c] sm:$0xf0]  ;;  %v4662_v18 = vor.u32 %v6375_v14, %v4659_v16  ;;  %v4897_v29 = vld [vmem:[#allocation4 + $0x200] sm:$0xf] }
  0x5e   :  { %1496 = vmatpush.bf16.msra.mxu1 %v4866_v25  ;;  %v7046_v25 = vld [vmem:[%s7496_s6] sm:$0xf]  ;;  %v6437_v30 = vld [vmem:[#allocation4 + $0x20c] sm:$0xf0]  ;;  %v6434_v16 = vld [vmem:[#allocation4 + $0x1f4] sm:$0xf0] }
  0x5f   :  { %1515 = vmatpush.bf16.msra.mxu2 %v4994_v7  ;;  %v7049_v37 = vperm.slane %v7046_v25, 0  ;;  %v4819_v7 = vld [vmem:[#allocation4 + $0x170] sm:$0xf0] }
  0x60   :  { %1534 = vmatpush.bf16.msra.mxu3 %v5122_v26  ;;  %v4822_v11 = vor.u32 %v6415_v2, %v4819_v7  ;;  %v4995_v2 = vld [vmem:[#allocation4 + $0x2d0] sm:$0xf0]  ;;  %v6398_v7 = vld [vmem:[#allocation4 + $0xd4] sm:$0xf0] }
  0x61   :  { %1478 = vmatpush.bf16.msra.mxu0 %v4722_v28  ;;  %v4870_v28 = vor.u32 %v6427_v24, %v4867_v27  ;;  %v4803_v24 = vld [vmem:[#allocation4 + $0x150] sm:$0xf0] }
  0x62   :  { %1497 = vmatpush.bf16.msra.mxu1 %v4850_v33 }
  0x63   :  { %1516 = vmatpush.bf16.msra.mxu2 %v4978_v19  ;;  %v5057_v19 = vld [vmem:[#allocation4 + $0x340] sm:$0xf] }
  0x64   :  { %v5058_v23 = vor.u32 %v6477_v20, %v5057_v19 }
  0x65   :  { %1479 = vmatpush.bf16.msra.mxu0 %v4706_v31  ;;  %v6387_v31 = vld [vmem:[#allocation4 + $0x84] sm:$0xf] }
  0x66   :  { %1498 = vmatpush.bf16.msra.mxu1 %v4834_v40  ;;  %v4710_v33 = vor.u32 %v6387_v31, %v4707_v44  ;;  %v5106_v40 = vor.u32 %v6489_v35, %v5105_v49  ;;  %v4898_v31 = vor.u32 %v6437_v30, %v4897_v29  ;;  %v4643_v44 = vld [vmem:[#allocation4 + $0x10] sm:$0xf0]  ;;  %v6491_v29 = vld [vmem:[#allocation4 + $0x3c4] sm:$0xf] }
  0x67   :  { %1517 = vmatpush.bf16.msra.mxu2 %v4962_v32  ;;  %v6371_v32 = vld [vmem:[#allocation4 + $0x4] sm:$0xf]  ;;  %v5123_v30 = vld [vmem:[#allocation4 + $0x3d0] sm:$0xf0] }
  0x68   :  { %611 = vmatmul.bf16.gmra.mxu0 %v7027_v34  ;;  %1535 = vmatpush.bf16.msra.mxu3 %v5106_v40  ;;  %v4646_v35 = vor.u32 %v6371_v32, %v4643_v44  ;;  %v6407_v40 = vld [vmem:[#allocation4 + $0x124] sm:$0xf]  ;;  %v5126_v44 = vor.u32 %v6491_v29, %v5123_v30 }
  0x69   :  { %630 = vmatmul.bf16.gmra.mxu1 %v7029_v39  ;;  %1480 = vmatpush.bf16.msra.mxu0 %v4690_v36  ;;  %v6423_v36 = vld [vmem:[#allocation4 + $0x1a4] sm:$0xf] }
  0x6a   :  { %649 = vmatmul.bf16.gmra.mxu2 %v7027_v34  ;;  %v4818_v34 = vor.u32 %v6417_v46, %v4817_v45  ;;  %v4945_v45 = vld [vmem:[#allocation4 + $0x260] sm:$0xf]  ;;  %v6449_v46 = vld [vmem:[#allocation4 + $0x26c] sm:$0xf0] }
  0x6b   :  { %668 = vmatmul.bf16.gmra.mxu3 %v7029_v39  ;;  %v4657_v39 = vld [vmem:[#allocation4 + $0x20] sm:$0xf] }
  0x6c   :  { %1499 = vmatpush.bf16.msra.mxu1 %v4818_v34  ;;  %v4658_v48 = vor.u32 %v6377_v47, %v4657_v39  ;;  %v6383_v34 = vld [vmem:[#allocation4 + $0x64] sm:$0xf]  ;;  %v4946_v39 = vor.u32 %v6449_v46, %v4945_v45  ;;  %v4691_v47 = vld [vmem:[#allocation4 + $0x70] sm:$0xf0]  ;;  %1536 = vmatpush.bf16.msra.mxu3 %v5090_v53 }
  0x6d   :  { %1481 = vmatpush.bf16.msra.mxu0 %v4674_v43  ;;  %v4854_v43 = vor.u32 %v6423_v36, %v4851_v41  ;;  %v5041_v36 = vld [vmem:[#allocation4 + $0x320] sm:$0xf] }
  0x6e   :  { %1518 = vmatpush.bf16.msra.mxu2 %v4946_v39 }
  0x70   :  { %1500 = vmatpush.bf16.msra.mxu1 %v4802_v52  ;;  %v6419_v52 = vld [vmem:[#allocation4 + $0x184] sm:$0xf] }
  0x71   :  { %1482 = vmatpush.bf16.msra.mxu0 %v4658_v48  ;;  %v4694_v48 = vor.u32 %v6383_v34, %v4691_v47  ;;  %v4838_v56 = vor.u32 %v6419_v52, %v4835_v54  ;;  %v4787_v34 = vld [vmem:[#allocation4 + $0x130] sm:$0xf0]  ;;  %v6402_v54 = vld [vmem:[#allocation4 + $0xf4] sm:$0xf0] }
  0x72   :  { %v4790_v47 = vor.u32 %v6407_v40, %v4787_v34  ;;  %v4963_v40 = vld [vmem:[#allocation4 + $0x290] sm:$0xf0] }
  0x74   :  { %1501 = vmatpush.bf16.msra.mxu1 %v4786_v58  ;;  %v6445_v58 = vld [vmem:[#allocation4 + $0x24c] sm:$0xf0] }
  0x75   :  { %1483 = vmatpush.bf16.msra.mxu0 %v4642_v55  ;;  %v4930_v59 = vor.u32 %v6445_v58, %v4929_v57  ;;  %v6469_v57 = vld [vmem:[#allocation4 + $0x30c] sm:$0xf0]  ;;  %v6403_v58 = vld [vmem:[#allocation4 + $0x104] sm:$0xf] }
  0x77   :  { %1519 = vmatpush.bf16.msra.mxu2 %v4930_v59 }
  0x78   :  { %1502 = vmatpush.bf16.msra.mxu1 %v4770_v3  ;;  %v7053_v3 = vperm.slane %v7046_v25, 1 }
  0x79   :  { %1552 = vmatpush.bf16.msrb.mxu0 %v4758_v0  ;;  %v5073_v0 = vld [vmem:[#allocation4 + $0x360] sm:$0xf] }
  0x7a   :  { %v5074_v6 = vor.u32 %v6481_v1, %v5073_v0  ;;  %v6459_v1 = vld [vmem:[#allocation4 + $0x2c4] sm:$0xf] }
  0x7c   :  { %1571 = vmatpush.bf16.msrb.mxu1 %v4886_v15  ;;  %1537 = vmatpush.bf16.msra.mxu3 %v5074_v6  ;;  %v4914_v15 = vor.u32 %v6441_v13, %v4913_v12  ;;  %v4745_v6 = vld [vmem:[#allocation4 + $0xc8] sm:$0xf] }
  0x7d   :  { %1553 = vmatpush.bf16.msrb.mxu0 %v4742_v9  ;;  %v4889_v12 = vld [vmem:[#allocation4 + $0x1e8] sm:$0xf] }
  0x7e   :  { %1520 = vmatpush.bf16.msra.mxu2 %v4914_v15  ;;  %v4890_v20 = vor.u32 %v6434_v16, %v4889_v12  ;;  %v4931_v12 = vld [vmem:[#allocation4 + $0x250] sm:$0xf0] }
  0x80   :  { %1572 = vmatpush.bf16.msrb.mxu1 %v4870_v28  ;;  %1538 = vmatpush.bf16.msra.mxu3 %v5058_v23  ;;  %v4729_v23 = vld [vmem:[#allocation4 + $0xa8] sm:$0xf] }
  0x81   :  { %1554 = vmatpush.bf16.msrb.mxu0 %v4726_v21  ;;  %v6411_v21 = vld [vmem:[#allocation4 + $0x144] sm:$0xf] }
  0x82   :  { %v4806_v28 = vor.u32 %v6411_v21, %v4803_v24  ;;  %1521 = vmatpush.bf16.msra.mxu2 %v4898_v31  ;;  %v6455_v21 = vld [vmem:[#allocation4 + $0x2a4] sm:$0xf]  ;;  %v4873_v31 = vld [vmem:[#allocation4 + $0x1c8] sm:$0xf] }
  0x84   :  { %1573 = vmatpush.bf16.msrb.mxu1 %v4854_v43 }
  0x85   :  { %1555 = vmatpush.bf16.msrb.mxu0 %v4710_v33 }
  0x88   :  { %1574 = vmatpush.bf16.msrb.mxu1 %v4838_v56  ;;  %v5025_v56 = vld [vmem:[#allocation4 + $0x300] sm:$0xf] }
  0x89   :  { %1556 = vmatpush.bf16.msrb.mxu0 %v4694_v48  ;;  %v6463_v48 = vld [vmem:[#allocation4 + $0x2e4] sm:$0xf]  ;;  %v5026_v61 = vor.u32 %v6469_v57, %v5025_v56 }
  0x8a   :  { %v5014_v53 = vor.u32 %v6463_v48, %v5011_v50  ;;  %v4857_v48 = vld [vmem:[#allocation4 + $0x1a8] sm:$0xf] }
  0x8c   :  { %1575 = vmatpush.bf16.msrb.mxu1 %v4822_v11  ;;  %1590 = vmatpush.bf16.msrb.mxu2 %v5014_v53  ;;  %v5139_v11 = vld [vmem:[#allocation4 + $0x3f0] sm:$0xf0] }
  0x8d   :  { %1557 = vmatpush.bf16.msrb.mxu0 %v4678_v63 }
  0x90   :  { %1576 = vmatpush.bf16.msrb.mxu1 %v4806_v28 }
  0x91   :  { %1558 = vmatpush.bf16.msrb.mxu0 %v4662_v18 }
  0x94   :  { %1577 = vmatpush.bf16.msrb.mxu1 %v4790_v47  ;;  %v5107_v47 = vld [vmem:[#allocation4 + $0x3b0] sm:$0xf0] }
  0x95   :  { %1559 = vmatpush.bf16.msrb.mxu0 %v4646_v35 }
  0xb5   :  { %v531_v38 = vpop.f32.mrf.mxu0 }
  0xb6   :  { %v550_v42 = vpop.f32.mrf.mxu1  ;;  %v532_v55 = vadd.f32 %v531_v38, %v7049_v37  ;;  %v6473_v38 = vld [vmem:[#allocation4 + $0x32c] sm:$0xf0] }
  0xb7   :  { %v5042_v46 = vor.u32 %v6473_v38, %v5041_v36  ;;  %v6451_v38 = vld [vmem:[#allocation4 + $0x284] sm:$0xf] }
  0xb8   :  { %v551_v8 = vadd.f32 %v550_v42, %v532_v55  ;;  %v4762_v55 = vor.u32 %v6402_v54, %v4761_v51  ;;  %v6426_v54 = vld [vmem:[#allocation4 + $0x1b4] sm:$0xf0] }
  0xb9   :  { %1539 = vmatpush.bf16.msra.mxu3 %v5042_v46  ;;  %v4858_v57 = vor.u32 %v6426_v54, %v4857_v48  ;;  %v4649_v48 = vld [vmem:[#allocation4 + $0x8] sm:$0xf]  ;;  %v5043_v54 = vld [vmem:[#allocation4 + $0x330] sm:$0xf0] }
  0xba   :  { %v674_v26 = vmax.f32 %v551_v8, 0.0 }
  0xbd   :  { %v569_v62 = vpop.f32.mrf.mxu2  ;;  %v533_v5 = vpop.f32.mrf.mxu0  ;;  %1540 = vmatpush.bf16.msra.mxu3 %v5026_v61 }
  0xbe   :  { %v588_v4 = vpop.f32.mrf.mxu3  ;;  %v534_v9 = vadd.f32 %v533_v5, %v7049_v37  ;;  %v552_v10 = vpop.f32.mrf.mxu1  ;;  %v570_v22 = vadd.f32 %v569_v62, %v7053_v3  ;;  %v4771_v62 = vld [vmem:[#allocation4 + $0x110] sm:$0xf0]  ;;  %v4998_v5 = vor.u32 %v6459_v1, %v4995_v2  ;;  %v6483_v1 = vld [vmem:[#allocation4 + $0x384] sm:$0xf] }
  0xbf   :  { %v4774_v0 = vor.u32 %v6403_v58, %v4771_v62  ;;  %v6447_v58 = vld [vmem:[#allocation4 + $0x264] sm:$0xf]  ;;  %v7072_v62 = vperm.slane %v7046_v25, 2  ;;  %v5091_v2 = vld [vmem:[#allocation4 + $0x390] sm:$0xf0] }
  0xc0   :  { %v553_v17 = vadd.f32 %v552_v10, %v534_v9  ;;  %v589_v41 = vadd.f32 %v588_v4, %v570_v22  ;;  %v4746_v9 = vor.u32 %v6398_v7, %v4745_v6  ;;  %v6495_v10 = vld [vmem:[#allocation4 + $0x3e4] sm:$0xf]  ;;  %1591 = vmatpush.bf16.msrb.mxu2 %v4998_v5  ;;  %v4979_v22 = vld [vmem:[#allocation4 + $0x2b0] sm:$0xf0]  ;;  %v4841_v5 = vld [vmem:[#allocation4 + $0x188] sm:$0xf] }
  0xc1   :  { %1578 = vmatpush.bf16.msrb.mxu1 %v4774_v0  ;;  %v5142_v15 = vor.u32 %v6495_v10, %v5139_v11  ;;  %v4982_v24 = vor.u32 %v6455_v21, %v4979_v22  ;;  %v6443_v11 = vld [vmem:[#allocation4 + $0x244] sm:$0xf]  ;;  %v4825_v21 = vld [vmem:[#allocation4 + $0x168] sm:$0xf]  ;;  %v7078_v22 = vperm.slane %v7046_v25, 3 }
  0xc2   :  { %v678_v27 = vmax.f32 %v553_v17, 0.0  ;;  %v675_v59 = vmax.f32 %v589_v41, 0.0  ;;  %v4966_v41 = vor.u32 %v6451_v38, %v4963_v40  ;;  %v4934_v16 = vor.u32 %v6443_v11, %v4931_v12  ;;  %v5059_v38 = vld [vmem:[#allocation4 + $0x350] sm:$0xf0]  ;;  %v4763_v11 = vld [vmem:[#allocation4 + $0xf8] sm:$0xf0] }
  0xc3   :  { %1609 = vmatpush.bf16.msrb.mxu3 %v5142_v15  ;;  %v6467_v12 = vld [vmem:[#allocation4 + $0x304] sm:$0xf] }
  0xc4   :  { %v7057_v33 = vpack.c.bf16 %v678_v27, %v674_v26  ;;  %v6394_v26 = vld [vmem:[#allocation4 + $0xb4] sm:$0xf0]  ;;  %1592 = vmatpush.bf16.msrb.mxu2 %v4982_v24 }
  0xc5   :  { %v571_v49 = vpop.f32.mrf.mxu2  ;;  %v536_v45 = vpop.f32.mrf.mxu0  ;;  %v4730_v28 = vor.u32 %v6394_v26, %v4729_v23 }
  0xc6   :  { %v572_v42 = vadd.f32 %v571_v49, %v7053_v3  ;;  %v590_v43 = vpop.f32.mrf.mxu3  ;;  %v555_v39 = vpop.f32.mrf.mxu1  ;;  %1484 = vmatmul.bf16.vlgmr.msra.gmra.mxu0 %v7057_v33  ;;  %v537_v63 = vadd.f32 %v536_v45, %v7049_v37 }
  0xc7   :  { %1628 = vmatpush.bf16.msra.mxu0 %v4762_v55  ;;  %1610 = vmatpush.bf16.msrb.mxu3 %v5126_v44  ;;  %v4665_v44 = vld [vmem:[#allocation4 + $0x28] sm:$0xf] }
  0xc8   :  { %v591_v52 = vadd.f32 %v590_v43, %v572_v42  ;;  %v556_v17 = vadd.f32 %v555_v39, %v537_v63  ;;  %v4713_v42 = vld [vmem:[#allocation4 + $0x88] sm:$0xf]  ;;  %v6390_v43 = vld [vmem:[#allocation4 + $0x94] sm:$0xf0]  ;;  %v6487_v39 = vld [vmem:[#allocation4 + $0x3a4] sm:$0xf]  ;;  %1593 = vmatpush.bf16.msrb.mxu2 %v4966_v41 }
  0xc9   :  { %v4714_v34 = vor.u32 %v6390_v43, %v4713_v42  ;;  %v5110_v53 = vor.u32 %v6487_v39, %v5107_v47  ;;  %v4809_v42 = vld [vmem:[#allocation4 + $0x148] sm:$0xf]  ;;  %v6414_v43 = vld [vmem:[#allocation4 + $0x154] sm:$0xf0]  ;;  %v4899_v47 = vld [vmem:[#allocation4 + $0x210] sm:$0xf0] }
  0xca   :  { %v679_v60 = vmax.f32 %v591_v52, 0.0  ;;  %v682_v49 = vmax.f32 %v556_v17, 0.0  ;;  %v6382_v17 = vld [vmem:[#allocation4 + $0x54] sm:$0xf0]  ;;  %v4810_v39 = vor.u32 %v6414_v43, %v4809_v42  ;;  %v4985_v42 = vld [vmem:[#allocation4 + $0x2a8] sm:$0xf] }
  0xcb   :  { %1629 = vmatpush.bf16.msra.mxu0 %v4746_v9  ;;  %1611 = vmatpush.bf16.msrb.mxu3 %v5110_v53  ;;  %v6422_v9 = vld [vmem:[#allocation4 + $0x194] sm:$0xf0]  ;;  %v6471_v53 = vld [vmem:[#allocation4 + $0x324] sm:$0xf] }
  0xcc   :  { %v7062_v4 = vpack.c.bf16 %v679_v60, %v675_v59  ;;  %v4947_v59 = vld [vmem:[#allocation4 + $0x270] sm:$0xf0]  ;;  %v4697_v60 = vld [vmem:[#allocation4 + $0x68] sm:$0xf]  ;;  %v4842_v10 = vor.u32 %v6422_v9, %v4841_v5  ;;  %v6400_v9 = vld [vmem:[#allocation4 + $0xec] sm:$0xf] }
  0xcd   :  { %v574_v8 = vpop.f32.mrf.mxu2  ;;  %v538_v14 = vpop.f32.mrf.mxu0  ;;  %v4950_v63 = vor.u32 %v6447_v58, %v4947_v59  ;;  %v4793_v58 = vld [vmem:[#allocation4 + $0x128] sm:$0xf]  ;;  %v6410_v59 = vld [vmem:[#allocation4 + $0x134] sm:$0xf0] }
  0xce   :  { %v593_v13 = vpop.f32.mrf.mxu3  ;;  %1503 = vmatmul.bf16.vlgmr.msra.gmra.mxu1 %v7062_v4  ;;  %v539_v18 = vadd.f32 %v538_v14, %v7049_v37  ;;  %v557_v19 = vpop.f32.mrf.mxu1  ;;  %v575_v32 = vadd.f32 %v574_v8, %v7053_v3  ;;  %v6430_v37 = vld [vmem:[#allocation4 + $0x1d4] sm:$0xf0]  ;;  %v5094_v8 = vor.u32 %v6483_v1, %v5091_v2 }
  0xcf   :  { %1647 = vmatpush.bf16.msra.mxu1 %v4890_v20  ;;  %1630 = vmatpush.bf16.msra.mxu0 %v4730_v28  ;;  %v4874_v36 = vor.u32 %v6430_v37, %v4873_v31  ;;  %v5075_v20 = vld [vmem:[#allocation4 + $0x370] sm:$0xf0]  ;;  %v6439_v31 = vld [vmem:[#allocation4 + $0x224] sm:$0xf]  ;;  %v6458_v43 = vld [vmem:[#allocation4 + $0x2b4] sm:$0xf0] }
  0xd0   :  { %v558_v27 = vadd.f32 %v557_v19, %v539_v18  ;;  %v594_v50 = vadd.f32 %v593_v13, %v575_v32  ;;  %1594 = vmatpush.bf16.msrb.mxu2 %v4950_v63  ;;  %v4681_v13 = vld [vmem:[#allocation4 + $0x48] sm:$0xf]  ;;  %1612 = vmatpush.bf16.msrb.mxu3 %v5094_v8  ;;  %v6479_v19 = vld [vmem:[#allocation4 + $0x364] sm:$0xf]  ;;  %v4915_v32 = vld [vmem:[#allocation4 + $0x230] sm:$0xf0] }
  0xd1   :  { %v4682_v18 = vor.u32 %v6382_v17, %v4681_v13  ;;  %v5078_v26 = vor.u32 %v6479_v19, %v5075_v20  ;;  %v4918_v25 = vor.u32 %v6439_v31, %v4915_v32  ;;  %v6466_v8 = vld [vmem:[#allocation4 + $0x2f4] sm:$0xf0]  ;;  %v5027_v13 = vld [vmem:[#allocation4 + $0x310] sm:$0xf0]  ;;  %v5001_v20 = vld [vmem:[#allocation4 + $0x2c8] sm:$0xf] }
  0xd2   :  { %v686_v35 = vmax.f32 %v558_v27, 0.0  ;;  %v683_v6 = vmax.f32 %v594_v50, 0.0  ;;  %v6418_v27 = vld [vmem:[#allocation4 + $0x174] sm:$0xf0]  ;;  %v5030_v17 = vor.u32 %v6467_v12, %v5027_v13 }
  0xd3   :  { %1648 = vmatpush.bf16.msra.mxu1 %v4874_v36  ;;  %1631 = vmatpush.bf16.msra.mxu0 %v4714_v34  ;;  %v4826_v30 = vor.u32 %v6418_v27, %v4825_v21  ;;  %v6475_v36 = vld [vmem:[#allocation4 + $0x344] sm:$0xf]  ;;  %v6374_v50 = vld [vmem:[#allocation4 + $0x14] sm:$0xf0] }
  0xd4   :  { %v7067_v45 = vpack.c.bf16 %v686_v35, %v682_v49  ;;  %1595 = vmatpush.bf16.msrb.mxu2 %v4934_v16  ;;  %1613 = vmatpush.bf16.msrb.mxu3 %v5078_v26  ;;  %v6378_v35 = vld [vmem:[#allocation4 + $0x34] sm:$0xf0]  ;;  %v5062_v41 = vor.u32 %v6475_v36, %v5059_v38  ;;  %v4766_v16 = vor.u32 %v6400_v9, %v4763_v11  ;;  %v4747_v26 = vld [vmem:[#allocation4 + $0xd8] sm:$0xf0] }
  0xd5   :  { %v576_v46 = vpop.f32.mrf.mxu2  ;;  %v607_v55 = vpop.f32.mrf.mxu0  ;;  %v4666_v40 = vor.u32 %v6378_v35, %v4665_v44  ;;  %v6406_v19 = vld [vmem:[#allocation4 + $0x114] sm:$0xf0]  ;;  %v5145_v44 = vld [vmem:[#allocation4 + $0x3e8] sm:$0xf]  ;;  %v4891_v38 = vld [vmem:[#allocation4 + $0x1f8] sm:$0xf0] }
  0xd6   :  { %v577_v51 = vadd.f32 %v576_v46, %v7053_v3  ;;  %v595_v52 = vpop.f32.mrf.mxu3  ;;  %v626_v56 = vpop.f32.mrf.mxu1  ;;  %1489 = vmatmul.bf16.gmra.mxu0 %v7067_v45  ;;  %v6386_v3 = vld [vmem:[#allocation4 + $0x74] sm:$0xf0]  ;;  %v608_v15 = vadd.f32 %v607_v55, %v7072_v62  ;;  %v6435_v46 = vld [vmem:[#allocation4 + $0x204] sm:$0xf]  ;;  %v4859_v9 = vld [vmem:[#allocation4 + $0x1b8] sm:$0xf0] }
  0xd7   :  { %1649 = vmatpush.bf16.msra.mxu1 %v4858_v57  ;;  %v4698_v0 = vor.u32 %v6386_v3, %v4697_v60  ;;  %v4650_v57 = vor.u32 %v6374_v50, %v4649_v48  ;;  %v5046_v60 = vor.u32 %v6471_v53, %v5043_v54  ;;  %v4731_v48 = vld [vmem:[#allocation4 + $0xb8] sm:$0xf0]  ;;  %v5129_v50 = vld [vmem:[#allocation4 + $0x3c8] sm:$0xf] }
  0xd8   :  { %v596_v61 = vadd.f32 %v595_v52, %v577_v51  ;;  %v627_v37 = vadd.f32 %v626_v56, %v608_v15  ;;  %1596 = vmatpush.bf16.msrb.mxu2 %v4918_v25  ;;  %v4902_v52 = vor.u32 %v6435_v46, %v4899_v47  ;;  %1614 = vmatpush.bf16.msrb.mxu3 %v5062_v41  ;;  %v6392_v46 = vld [vmem:[#allocation4 + $0xac] sm:$0xf] }
  0xd9   :  { %1632 = vmatpush.bf16.msra.mxu0 %v4698_v0  ;;  %v4986_v47 = vor.u32 %v6458_v43, %v4985_v42  ;;  %v4734_v53 = vor.u32 %v6392_v46, %v4731_v48  ;;  %v5081_v42 = vld [vmem:[#allocation4 + $0x368] sm:$0xf]  ;;  %v6482_v43 = vld [vmem:[#allocation4 + $0x374] sm:$0xf0]  ;;  %v6416_v46 = vld [vmem:[#allocation4 + $0x16c] sm:$0xf] }
  0xda   :  { %v687_v7 = vmax.f32 %v596_v61, 0.0  ;;  %v676_v55 = vmax.f32 %v627_v37, 0.0  ;;  %v4794_v61 = vor.u32 %v6410_v59, %v4793_v58  ;;  %v6498_v37 = vld [vmem:[#allocation4 + $0x3f4] sm:$0xf0]  ;;  %v4921_v48 = vld [vmem:[#allocation4 + $0x228] sm:$0xf] }
  0xdb   :  { %1650 = vmatpush.bf16.msra.mxu1 %v4842_v10  ;;  %v5146_v36 = vor.u32 %v6498_v37, %v5145_v44  ;;  %v6446_v37 = vld [vmem:[#allocation4 + $0x254] sm:$0xf0] }
  0xdc   :  { %v7074_v14 = vpack.c.bf16 %v687_v7, %v683_v6  ;;  %1597 = vmatpush.bf16.msrb.mxu2 %v4902_v52  ;;  %v5017_v7 = vld [vmem:[#allocation4 + $0x2e8] sm:$0xf]  ;;  %1615 = vmatpush.bf16.msrb.mxu3 %v5046_v60  ;;  %v6454_v60 = vld [vmem:[#allocation4 + $0x294] sm:$0xf0] }
  0xdd   :  { %v645_v23 = vpop.f32.mrf.mxu2  ;;  %v609_v28 = vpop.f32.mrf.mxu0  ;;  %1633 = vmatpush.bf16.msra.mxu0 %v4682_v18  ;;  %v5018_v10 = vor.u32 %v6466_v8, %v5017_v7  ;;  %v4777_v18 = vld [vmem:[#allocation4 + $0x108] sm:$0xf]  ;;  %v6424_v8 = vld [vmem:[#allocation4 + $0x1ac] sm:$0xf] }
  0xde   :  { %v664_v24 = vpop.f32.mrf.mxu3  ;;  %1508 = vmatmul.bf16.gmra.mxu1 %v7074_v14  ;;  %v628_v29 = vpop.f32.mrf.mxu1  ;;  %v610_v49 = vadd.f32 %v609_v28, %v7072_v62  ;;  %v646_v51 = vadd.f32 %v645_v23, %v7078_v22  ;;  %v4778_v21 = vor.u32 %v6406_v19, %v4777_v18  ;;  %v6462_v23 = vld [vmem:[#allocation4 + $0x2d4] sm:$0xf0]  ;;  %v4862_v11 = vor.u32 %v6424_v8, %v4859_v9  ;;  %v6384_v19 = vld [vmem:[#allocation4 + $0x6c] sm:$0xf]  ;;  %v4795_v8 = vld [vmem:[#allocation4 + $0x138] sm:$0xf0] }
  0xdf   :  { %1651 = vmatpush.bf16.msra.mxu1 %v4826_v30  ;;  %v6450_v18 = vld [vmem:[#allocation4 + $0x274] sm:$0xf0] }
  0xe0   :  { %v629_v34 = vadd.f32 %v628_v29, %v610_v49  ;;  %v665_v1 = vadd.f32 %v664_v24, %v646_v51  ;;  %v6396_v24 = vld [vmem:[#allocation4 + $0xcc] sm:$0xf]  ;;  %v5002_v29 = vor.u32 %v6462_v23, %v5001_v20  ;;  %1616 = vmatpush.bf16.msrb.mxu3 %v5030_v17  ;;  %v6494_v51 = vld [vmem:[#allocation4 + $0x3d4] sm:$0xf0]  ;;  %v4953_v17 = vld [vmem:[#allocation4 + $0x268] sm:$0xf] }
  0xe1   :  { %1634 = vmatpush.bf16.msra.mxu0 %v4666_v40  ;;  %v4750_v30 = vor.u32 %v6396_v24, %v4747_v26  ;;  %v6432_v49 = vld [vmem:[#allocation4 + $0x1ec] sm:$0xf]  ;;  %v5130_v54 = vor.u32 %v6494_v51, %v5129_v50  ;;  %v4699_v23 = vld [vmem:[#allocation4 + $0x78] sm:$0xf0]  ;;  %v5097_v24 = vld [vmem:[#allocation4 + $0x388] sm:$0xf] }
  0xe2   :  { %v680_v56 = vmax.f32 %v629_v34, 0.0  ;;  %v677_v27 = vmax.f32 %v665_v1, 0.0  ;;  %v4894_v41 = vor.u32 %v6432_v49, %v4891_v38  ;;  %v5113_v1 = vld [vmem:[#allocation4 + $0x3a8] sm:$0xf]  ;;  %v6486_v26 = vld [vmem:[#allocation4 + $0x394] sm:$0xf0] }
  0xe3   :  { %1652 = vmatpush.bf16.msra.mxu1 %v4810_v39  ;;  %v6380_v49 = vld [vmem:[#allocation4 + $0x4c] sm:$0xf]  ;;  %v6442_v50 = vld [vmem:[#allocation4 + $0x234] sm:$0xf0] }
  0xe4   :  { %v7083_v63 = vpack.c.bf16 %v680_v56, %v676_v55  ;;  %v6428_v55 = vld [vmem:[#allocation4 + $0x1cc] sm:$0xf]  ;;  %v4875_v56 = vld [vmem:[#allocation4 + $0x1d8] sm:$0xf0] }
  0xe5   :  { %v647_v3 = vpop.f32.mrf.mxu2  ;;  %v612_v5 = vpop.f32.mrf.mxu0  ;;  %1635 = vmatpush.bf16.msra.mxu0 %v4650_v57  ;;  %v4969_v57 = vld [vmem:[#allocation4 + $0x288] sm:$0xf]  ;;  %v4878_v59 = vor.u32 %v6428_v55, %v4875_v56  ;;  %v6376_v51 = vld [vmem:[#allocation4 + $0x2c] sm:$0xf]  ;;  %v6478_v55 = vld [vmem:[#allocation4 + $0x354] sm:$0xf0] }
  0xe6   :  { %v666_v0 = vpop.f32.mrf.mxu3  ;;  %v648_v2 = vadd.f32 %v647_v3, %v7078_v22  ;;  %v631_v6 = vpop.f32.mrf.mxu1  ;;  %1560 = vmatmul.bf16.vlgmr.msrb.gmra.mxu0 %v7057_v33  ;;  %1522 = vmatmul.bf16.vlgmr.msra.gmra.mxu2 %v7083_v63  ;;  %v613_v31 = vadd.f32 %v612_v5, %v7072_v62  ;;  %v4715_v3 = vld [vmem:[#allocation4 + $0x98] sm:$0xf0] }
  0xe7   :  { %1653 = vmatpush.bf16.msra.mxu1 %v4794_v61  ;;  %1666 = vmatpush.bf16.msra.mxu2 %v5018_v10  ;;  %v6388_v61 = vld [vmem:[#allocation4 + $0x8c] sm:$0xf] }
  0xe8   :  { %v667_v15 = vadd.f32 %v666_v0, %v648_v2  ;;  %v632_v34 = vadd.f32 %v631_v6, %v613_v31  ;;  %v4970_v0 = vor.u32 %v6454_v60, %v4969_v57  ;;  %v6490_v2 = vld [vmem:[#allocation4 + $0x3b4] sm:$0xf0]  ;;  %v4718_v7 = vor.u32 %v6388_v61, %v4715_v3  ;;  %v4937_v31 = vld [vmem:[#allocation4 + $0x248] sm:$0xf] }
  0xe9   :  { %1704 = vmatpush.bf16.msrb.mxu0 %v4766_v16  ;;  %v5114_v10 = vor.u32 %v6490_v2, %v5113_v1  ;;  %v4938_v38 = vor.u32 %v6446_v37, %v4937_v31  ;;  %v4905_v60 = vld [vmem:[#allocation4 + $0x208] sm:$0xf]  ;;  %v6438_v3 = vld [vmem:[#allocation4 + $0x214] sm:$0xf0]  ;;  %v6492_v31 = vld [vmem:[#allocation4 + $0x3cc] sm:$0xf] }
  0xea   :  { %v681_v28 = vmax.f32 %v667_v15, 0.0  ;;  %v684_v5 = vmax.f32 %v632_v34, 0.0  ;;  %v5082_v34 = vor.u32 %v6482_v43, %v5081_v42  ;;  %v4906_v1 = vor.u32 %v6438_v3, %v4905_v60  ;;  %v5049_v2 = vld [vmem:[#allocation4 + $0x328] sm:$0xf]  ;;  %v5131_v37 = vld [vmem:[#allocation4 + $0x3d8] sm:$0xf0] }
  0xeb   :  { %1654 = vmatpush.bf16.msra.mxu1 %v4778_v21  ;;  %1667 = vmatpush.bf16.msra.mxu2 %v5002_v29  ;;  %v4954_v21 = vor.u32 %v6450_v18, %v4953_v17  ;;  %v5098_v29 = vor.u32 %v6486_v26, %v5097_v24  ;;  %v6470_v17 = vld [vmem:[#allocation4 + $0x314] sm:$0xf0]  ;;  %v6404_v18 = vld [vmem:[#allocation4 + $0x10c] sm:$0xf]  ;;  %v5067_v60 = vld [vmem:[#allocation4 + $0x358] sm:$0xf0] }
  0xec   :  { %v7089_v32 = vpack.c.bf16 %v681_v28, %v677_v27  ;;  %v4702_v28 = vor.u32 %v6384_v19, %v4699_v23  ;;  %v5003_v23 = vld [vmem:[#allocation4 + $0x2d8] sm:$0xf0]  ;;  %v6448_v43 = vld [vmem:[#allocation4 + $0x26c] sm:$0xf] }
  0xed   :  { %v650_v25 = vpop.f32.mrf.mxu2  ;;  %v614_v40 = vpop.f32.mrf.mxu0  ;;  %1705 = vmatpush.bf16.msrb.mxu0 %v4750_v30  ;;  %v6420_v30 = vld [vmem:[#allocation4 + $0x18c] sm:$0xf] }
  0xee   :  { %v669_v35 = vpop.f32.mrf.mxu3  ;;  %1579 = vmatmul.bf16.vlgmr.msrb.gmra.mxu1 %v7062_v4  ;;  %1541 = vmatmul.bf16.vlgmr.msra.gmra.mxu3 %v7089_v32  ;;  %v615_v39 = vadd.f32 %v614_v40, %v7072_v62  ;;  %v633_v52 = vpop.f32.mrf.mxu1  ;;  %v651_v62 = vadd.f32 %v650_v25, %v7078_v22  ;;  %v4683_v25 = vld [vmem:[#allocation4 + $0x58] sm:$0xf0]  ;;  %v6436_v3 = vld [vmem:[#allocation4 + $0x20c] sm:$0xf] }
  0xef   :  { %1685 = vmatpush.bf16.msra.mxu3 %v5146_v36  ;;  %1723 = vmatpush.bf16.msrb.mxu1 %v4894_v41  ;;  %v4686_v40 = vor.u32 %v6380_v49, %v4683_v25  ;;  %v6452_v49 = vld [vmem:[#allocation4 + $0x28c] sm:$0xf]  ;;  %v4971_v25 = vld [vmem:[#allocation4 + $0x298] sm:$0xf0] }
  0xf0   :  { %v634_v58 = vadd.f32 %v633_v52, %v615_v39  ;;  %1668 = vmatpush.bf16.msra.mxu2 %v4986_v47  ;;  %v670_v15 = vadd.f32 %v669_v35, %v651_v62  ;;  %v4827_v39 = vld [vmem:[#allocation4 + $0x178] sm:$0xf0]  ;;  %v4922_v52 = vor.u32 %v6442_v50, %v4921_v48  ;;  %v6372_v62 = vld [vmem:[#allocation4 + $0xc] sm:$0xf] }
  0xf1   :  { %1706 = vmatpush.bf16.msrb.mxu0 %v4734_v53  ;;  %v4830_v47 = vor.u32 %v6416_v46, %v4827_v39  ;;  %v4667_v53 = vld [vmem:[#allocation4 + $0x38] sm:$0xf0]  ;;  %v6484_v39 = vld [vmem:[#allocation4 + $0x38c] sm:$0xf] }
  0xf2   :  { %v688_v6 = vmax.f32 %v634_v58, 0.0  ;;  %v685_v35 = vmax.f32 %v670_v15, 0.0  ;;  %v4670_v56 = vor.u32 %v6376_v51, %v4667_v53  ;;  %v6412_v58 = vld [vmem:[#allocation4 + $0x14c] sm:$0xf]  ;;  %v4955_v46 = vld [vmem:[#allocation4 + $0x278] sm:$0xf0] }
  0xf3   :  { %1686 = vmatpush.bf16.msra.mxu3 %v5130_v54  ;;  %1724 = vmatpush.bf16.msrb.mxu1 %v4878_v59  ;;  %v5065_v54 = vld [vmem:[#allocation4 + $0x348] sm:$0xf]  ;;  %v4811_v59 = vld [vmem:[#allocation4 + $0x158] sm:$0xf0]  ;;  %v6444_v48 = vld [vmem:[#allocation4 + $0x24c] sm:$0xf] }
  0xf4   :  { %v7095_v12 = vpack.c.bf16 %v688_v6, %v684_v5  ;;  %1669 = vmatpush.bf16.msra.mxu2 %v4970_v0  ;;  %v5066_v57 = vor.u32 %v6478_v55, %v5065_v54  ;;  %v4814_v61 = vor.u32 %v6412_v58, %v4811_v59  ;;  %v4651_v0 = vld [vmem:[#allocation4 + $0x18] sm:$0xf0]  ;;  %v6474_v5 = vld [vmem:[#allocation4 + $0x334] sm:$0xf0]  ;;  %v6408_v6 = vld [vmem:[#allocation4 + $0x12c] sm:$0xf] }
  0xf5   :  { %v652_v13 = vpop.f32.mrf.mxu2  ;;  %1707 = vmatpush.bf16.msrb.mxu0 %v4718_v7  ;;  %v4654_v7 = vor.u32 %v6372_v62, %v4651_v0  ;;  %v5050_v9 = vor.u32 %v6474_v5, %v5049_v2  ;;  %v4939_v51 = vld [vmem:[#allocation4 + $0x258] sm:$0xf0]  ;;  %v6480_v53 = vld [vmem:[#allocation4 + $0x36c] sm:$0xf] }
  0xf6   :  { %v653_v16 = vadd.f32 %v652_v13, %v7078_v22  ;;  %1565 = vmatmul.bf16.gmra.mxu0 %v7067_v45  ;;  %v671_v20 = vpop.f32.mrf.mxu3  ;;  %1527 = vmatmul.bf16.gmra.mxu2 %v7095_v12  ;;  %v4843_v22 = vld [vmem:[#allocation4 + $0x198] sm:$0xf0]  ;;  %v6476_v58 = vld [vmem:[#allocation4 + $0x34c] sm:$0xf] }
  0xf7   :  { %1687 = vmatpush.bf16.msra.mxu3 %v5114_v10  ;;  %1725 = vmatpush.bf16.msrb.mxu1 %v4862_v11  ;;  %v4846_v44 = vor.u32 %v6420_v30, %v4843_v22  ;;  %v4798_v10 = vor.u32 %v6408_v6, %v4795_v8  ;;  %v6464_v11 = vld [vmem:[#allocation4 + $0x2ec] sm:$0xf]  ;;  %v5019_v13 = vld [vmem:[#allocation4 + $0x2f8] sm:$0xf0] }
  0xf8   :  { %v672_v27 = vadd.f32 %v671_v20, %v653_v16  ;;  %1670 = vmatpush.bf16.msra.mxu2 %v4954_v21  ;;  %v5022_v15 = vor.u32 %v6464_v11, %v5019_v13  ;;  %v5033_v16 = vld [vmem:[#allocation4 + $0x308] sm:$0xf]  ;;  %v4779_v20 = vld [vmem:[#allocation4 + $0x118] sm:$0xf0]  ;;  %v6460_v21 = vld [vmem:[#allocation4 + $0x2cc] sm:$0xf] }
  0xf9   :  { %1708 = vmatpush.bf16.msrb.mxu0 %v4702_v28  ;;  %v5034_v19 = vor.u32 %v6470_v17, %v5033_v16  ;;  %v4782_v24 = vor.u32 %v6404_v18, %v4779_v20  ;;  %v5006_v26 = vor.u32 %v6460_v21, %v5003_v23  ;;  %v5147_v28 = vld [vmem:[#allocation4 + $0x3f8] sm:$0xf0]  ;;  %v6456_v30 = vld [vmem:[#allocation4 + $0x2ac] sm:$0xf]  ;;  %v5249_v11 = vld [vmem:[#allocation6 + $0xc0] sm:$0xf] }
  0xfa   :  { %v689_v36 = vmax.f32 %v672_v27, 0.0  ;;  %v6496_v27 = vld [vmem:[#allocation4 + $0x3ec] sm:$0xf]  ;;  %v4987_v22 = vld [vmem:[#allocation4 + $0x2b8] sm:$0xf0] }
  0xfb   :  { %1688 = vmatpush.bf16.msra.mxu3 %v5098_v29  ;;  %1726 = vmatpush.bf16.msrb.mxu1 %v4846_v44  ;;  %v5150_v29 = vor.u32 %v6496_v27, %v5147_v28  ;;  %v4990_v44 = vor.u32 %v6456_v30, %v4987_v22  ;;  %v5083_v54 = vld [vmem:[#allocation4 + $0x378] sm:$0xf0]  ;;  %v6468_v6 = vld [vmem:[#allocation4 + $0x30c] sm:$0xf]  ;;  %v6525_v13 = vld [vmem:[#allocation6 + $0xcc] sm:$0xf0] }
  0xfc   :  { %v7100_v41 = vpack.c.bf16 %v689_v36, %v685_v35  ;;  %1671 = vmatpush.bf16.msra.mxu2 %v4938_v38  ;;  %v5134_v35 = vor.u32 %v6492_v31, %v5131_v37  ;;  %v6488_v36 = vld [vmem:[#allocation4 + $0x3ac] sm:$0xf]  ;;  %v5115_v38 = vld [vmem:[#allocation4 + $0x3b8] sm:$0xf0]  ;;  %v5086_v55 = vor.u32 %v6480_v53, %v5083_v54  ;;  %v5233_v16 = vld [vmem:[#allocation6 + $0xa0] sm:$0xf] }
  0xfd   :  { %1709 = vmatpush.bf16.msrb.mxu0 %v4686_v40  ;;  %v4974_v40 = vor.u32 %v6452_v49, %v4971_v25  ;;  %v5118_v42 = vor.u32 %v6488_v36, %v5115_v38  ;;  %v4907_v62 = vld [vmem:[#allocation4 + $0x218] sm:$0xf0]  ;;  %v6521_v17 = vld [vmem:[#allocation6 + $0xac] sm:$0xf0]  ;;  %v5201_v21 = vld [vmem:[#allocation6 + $0x60] sm:$0xf] }
  0xfe   :  { %1584 = vmatmul.bf16.gmra.mxu1 %v7074_v14  ;;  %1546 = vmatmul.bf16.gmra.mxu3 %v7100_v41  ;;  %v4910_v0 = vor.u32 %v6436_v3, %v4907_v62  ;;  %v5051_v2 = vld [vmem:[#allocation4 + $0x338] sm:$0xf0]  ;;  %v6517_v18 = vld [vmem:[#allocation6 + $0x8c] sm:$0xf0]  ;;  %v5393_v49 = vld [vmem:[#allocation6 + $0x1e0] sm:$0xf] }
  0xff   :  { %1689 = vmatpush.bf16.msra.mxu3 %v5082_v34  ;;  %1727 = vmatpush.bf16.msrb.mxu1 %v4830_v47  ;;  %v4958_v34 = vor.u32 %v6448_v43, %v4955_v46  ;;  %v5099_v47 = vld [vmem:[#allocation4 + $0x398] sm:$0xf0]  ;;  %v6513_v23 = vld [vmem:[#allocation6 + $0x6c] sm:$0xf0]  ;;  %v5235_v53 = vld [vmem:[#allocation6 + $0xb0] sm:$0xf0] }
 0x100   :  { %1672 = vmatpush.bf16.msra.mxu2 %v4922_v52  ;;  %v5102_v50 = vor.u32 %v6484_v39, %v5099_v47  ;;  %v4942_v52 = vor.u32 %v6444_v48, %v4939_v51  ;;  %v6509_v27 = vld [vmem:[#allocation6 + $0x4c] sm:$0xf0]  ;;  %v5251_v47 = vld [vmem:[#allocation6 + $0xd0] sm:$0xf0]  ;;  %v6519_v51 = vld [vmem:[#allocation6 + $0xa4] sm:$0xf] }
 0x101   :  { %1710 = vmatpush.bf16.msrb.mxu0 %v4670_v56  ;;  %v6440_v56 = vld [vmem:[#allocation4 + $0x22c] sm:$0xf]  ;;  %v6505_v30 = vld [vmem:[#allocation6 + $0x2c] sm:$0xf0]  ;;  %v5238_v54 = vor.u32 %v6519_v51, %v5235_v53  ;;  %v5219_v62 = vld [vmem:[#allocation6 + $0x90] sm:$0xf0] }
 0x102   :  { %v6561_v25 = vld [vmem:[#allocation6 + $0x1ec] sm:$0xf0]  ;;  %v5395_v51 = vld [vmem:[#allocation6 + $0x1f0] sm:$0xf0]  ;;  %v6530_v53 = vld [vmem:[#allocation6 + $0xf4] sm:$0xf0] }
 0x103   :  { %1690 = vmatpush.bf16.msra.mxu3 %v5066_v57  ;;  %1728 = vmatpush.bf16.msrb.mxu1 %v4814_v61  ;;  %v4923_v57 = vld [vmem:[#allocation4 + $0x238] sm:$0xf0]  ;;  %v5070_v61 = vor.u32 %v6476_v58, %v5067_v60  ;;  %v5394_v38 = vor.u32 %v6561_v25, %v5393_v49  ;;  %v6557_v46 = vld [vmem:[#allocation6 + $0x1cc] sm:$0xf0]  ;;  %v5345_v58 = vld [vmem:[#allocation6 + $0x180] sm:$0xf] }
 0x104   :  { %1673 = vmatpush.bf16.msra.mxu2 %v4906_v1  ;;  %v4926_v59 = vor.u32 %v6440_v56, %v4923_v57  ;;  %v6472_v1 = vld [vmem:[#allocation4 + $0x32c] sm:$0xf]  ;;  %v6515_v60 = vld [vmem:[#allocation6 + $0x84] sm:$0xf]  ;;  %v5281_v49 = vld [vmem:[#allocation6 + $0x100] sm:$0xf] }
 0x105   :  { %1711 = vmatpush.bf16.msrb.mxu0 %v4654_v7  ;;  %v5054_v5 = vor.u32 %v6472_v1, %v5051_v2  ;;  %v5035_v7 = vld [vmem:[#allocation4 + $0x318] sm:$0xf0]  ;;  %v5329_v2 = vld [vmem:[#allocation6 + $0x160] sm:$0xf]  ;;  %v6533_v25 = vld [vmem:[#allocation6 + $0x10c] sm:$0xf0] }
 0x106   :  { %1636 = vmatmul.bf16.vlgmr.msra.gmra.mxu0 %v7057_v33  ;;  %1598 = vmatmul.bf16.vlgmr.msrb.gmra.mxu2 %v7083_v63  ;;  %v5038_v8 = vor.u32 %v6468_v6, %v5035_v7  ;;  %v6511_v6 = vld [vmem:[#allocation6 + $0x64] sm:$0xf] }
 0x107   :  { %1691 = vmatpush.bf16.msra.mxu3 %v5050_v9  ;;  %1729 = vmatpush.bf16.msrb.mxu1 %v4798_v10  ;;  %v6529_v9 = vld [vmem:[#allocation6 + $0xec] sm:$0xf0] }
 0x108   :  { %1742 = vmatpush.bf16.msrb.mxu2 %v5022_v15  ;;  %v5250_v15 = vor.u32 %v6525_v13, %v5249_v11  ;;  %v5313_v13 = vld [vmem:[#allocation6 + $0x140] sm:$0xf] }
 0x10b   :  { %1692 = vmatpush.bf16.msra.mxu3 %v5034_v19  ;;  %1730 = vmatpush.bf16.msrb.mxu1 %v4782_v24  ;;  %v5202_v24 = vor.u32 %v6513_v23, %v5201_v21 }
 0x10c   :  { %1743 = vmatpush.bf16.msrb.mxu2 %v5006_v26  ;;  %v5185_v26 = vld [vmem:[#allocation6 + $0x40] sm:$0xf] }
 0x10d   :  { %v5186_v28 = vor.u32 %v6509_v27, %v5185_v26  ;;  %v5297_v26 = vld [vmem:[#allocation6 + $0x120] sm:$0xf]  ;;  %v6537_v27 = vld [vmem:[#allocation6 + $0x12c] sm:$0xf0] }
 0x10e   :  { %1655 = vmatmul.bf16.vlgmr.msra.gmra.mxu1 %v7062_v4  ;;  %1617 = vmatmul.bf16.vlgmr.msrb.gmra.mxu3 %v7089_v32 }
 0x10f   :  { %1761 = vmatpush.bf16.msrb.mxu3 %v5150_v29  ;;  %2601 = vmatpush.bf16.msra.mxu1 %v5394_v38  ;;  %v5282_v38 = vor.u32 %v6533_v25, %v5281_v49 }
 0x110   :  { %1744 = vmatpush.bf16.msrb.mxu2 %v4990_v44  ;;  %v5153_v44 = vld [vmem:[#allocation6] sm:$0xf] }
 0x113   :  { %1762 = vmatpush.bf16.msrb.mxu3 %v5134_v35  ;;  %v6527_v35 = vld [vmem:[#allocation6 + $0xe4] sm:$0xf] }
 0x114   :  { %1745 = vmatpush.bf16.msrb.mxu2 %v4974_v40  ;;  %v5267_v40 = vld [vmem:[#allocation6 + $0xf0] sm:$0xf0] }
 0x116   :  { %1641 = vmatmul.bf16.gmra.mxu0 %v7067_v45  ;;  %1603 = vmatmul.bf16.gmra.mxu2 %v7095_v12 }
 0x117   :  { %1763 = vmatpush.bf16.msrb.mxu3 %v5118_v42  ;;  %v5270_v42 = vor.u32 %v6527_v35, %v5267_v40  ;;  %v6499_v35 = vld [vmem:[#allocation6 + $0x4] sm:$0xf] }
 0x118   :  { %1746 = vmatpush.bf16.msrb.mxu2 %v4958_v34  ;;  %v6523_v34 = vld [vmem:[#allocation6 + $0xc4] sm:$0xf] }
 0x119   :  { %v5254_v48 = vor.u32 %v6523_v34, %v5251_v47  ;;  %v6593_v47 = vld [vmem:[#allocation6 + $0x2ec] sm:$0xf0] }
 0x11b   :  { %1764 = vmatpush.bf16.msrb.mxu3 %v5102_v50  ;;  %v6553_v50 = vld [vmem:[#allocation6 + $0x1ac] sm:$0xf0] }
 0x11c   :  { %1747 = vmatpush.bf16.msrb.mxu2 %v4942_v52 }
 0x11e   :  { %1660 = vmatmul.bf16.gmra.mxu1 %v7074_v14  ;;  %1622 = vmatmul.bf16.gmra.mxu3 %v7100_v41 }
 0x11f   :  { %1765 = vmatpush.bf16.msrb.mxu3 %v5086_v55  ;;  %v7139_v55 = vld [vmem:[%s7496_s6 + $0x4] sm:$0xf] }
 0x120   :  { %1748 = vmatpush.bf16.msrb.mxu2 %v4926_v59  ;;  %v6549_v59 = vld [vmem:[#allocation6 + $0x18c] sm:$0xf0]  ;;  %v7146_v1 = vperm.slane %v7139_v55, 0 }
 0x121   :  { %v5346_v3 = vor.u32 %v6549_v59, %v5345_v58 }
 0x123   :  { %1766 = vmatpush.bf16.msrb.mxu3 %v5070_v61 }
 0x124   :  { %1749 = vmatpush.bf16.msrb.mxu2 %v4910_v0  ;;  %v5222_v0 = vor.u32 %v6515_v60, %v5219_v62  ;;  %v6589_v62 = vld [vmem:[#allocation6 + $0x2cc] sm:$0xf0] }
 0x126   :  { %1712 = vmatmul.bf16.vlgmr.msrb.gmra.mxu0 %v7057_v33  ;;  %1674 = vmatmul.bf16.vlgmr.msra.gmra.mxu2 %v7083_v63  ;;  %v5265_v33 = vld [vmem:[#allocation6 + $0xe0] sm:$0xf] }
 0x127   :  { %1767 = vmatpush.bf16.msrb.mxu3 %v5054_v5  ;;  %v5266_v10 = vor.u32 %v6529_v9, %v5265_v33  ;;  %v6545_v5 = vld [vmem:[#allocation6 + $0x16c] sm:$0xf0] }
 0x128   :  { %v5330_v7 = vor.u32 %v6545_v5, %v5329_v2  ;;  %v5379_v5 = vld [vmem:[#allocation6 + $0x1d0] sm:$0xf0] }
 0x129   :  { %2582 = vmatpush.bf16.msra.mxu0 %v5266_v10 }
 0x12b   :  { %1768 = vmatpush.bf16.msrb.mxu3 %v5038_v8  ;;  %v5203_v8 = vld [vmem:[#allocation6 + $0x70] sm:$0xf0] }
 0x12c   :  { %v5206_v33 = vor.u32 %v6511_v6, %v5203_v8  ;;  %v5257_v6 = vld [vmem:[#allocation6 + $0xc8] sm:$0xf] }
 0x12d   :  { %2583 = vmatpush.bf16.msra.mxu0 %v5250_v15  ;;  %v6541_v15 = vld [vmem:[#allocation6 + $0x14c] sm:$0xf0] }
 0x12e   :  { %1731 = vmatmul.bf16.vlgmr.msrb.gmra.mxu1 %v7062_v4  ;;  %1693 = vmatmul.bf16.vlgmr.msra.gmra.mxu3 %v7089_v32  ;;  %v5234_v4 = vor.u32 %v6521_v17, %v5233_v16  ;;  %v6507_v16 = vld [vmem:[#allocation6 + $0x44] sm:$0xf] }
 0x131   :  { %2584 = vmatpush.bf16.msra.mxu0 %v5234_v4  ;;  %v5314_v4 = vor.u32 %v6541_v15, %v5313_v13  ;;  %v5489_v13 = vld [vmem:[#allocation6 + $0x2a0] sm:$0xf]  ;;  %v6585_v15 = vld [vmem:[#allocation6 + $0x2ac] sm:$0xf0] }
 0x136   :  { %1717 = vmatmul.bf16.gmra.mxu0 %v7067_v45  ;;  %1679 = vmatmul.bf16.gmra.mxu2 %v7095_v12  ;;  %v5217_v45 = vld [vmem:[#allocation6 + $0x80] sm:$0xf] }
 0x13e   :  { %1736 = vmatmul.bf16.gmra.mxu1 %v7074_v14  ;;  %1698 = vmatmul.bf16.gmra.mxu3 %v7100_v41  ;;  %v5218_v14 = vor.u32 %v6517_v18, %v5217_v45  ;;  %v5187_v45 = vld [vmem:[#allocation6 + $0x50] sm:$0xf0] }
 0x13f   :  { %v5190_v21 = vor.u32 %v6507_v16, %v5187_v45  ;;  %v6551_v16 = vld [vmem:[#allocation6 + $0x1a4] sm:$0xf]  ;;  %v5490_v45 = vor.u32 %v6585_v15, %v5489_v13  ;;  %v5299_v15 = vld [vmem:[#allocation6 + $0x130] sm:$0xf0] }
 0x140   :  { %2585 = vmatpush.bf16.msra.mxu0 %v5218_v14 }
 0x143   :  { %v7121_v19 = vpop.f32.mrf.mxu0 }
 0x144   :  { %2586 = vmatpush.bf16.msra.mxu0 %v5202_v24  ;;  %v1486_v10 = vadd.f32 %v7121_v19, %v7146_v1 }
 0x146   :  { %1750 = vmatmul.bf16.vlgmr.msrb.gmra.mxu2 %v7083_v63  ;;  %v5169_v63 = vld [vmem:[#allocation6 + $0x20] sm:$0xf] }
 0x147   :  { %v5170_v31 = vor.u32 %v6505_v30, %v5169_v63  ;;  %v5298_v63 = vor.u32 %v6537_v27, %v5297_v26  ;;  %v5171_v30 = vld [vmem:[#allocation6 + $0x30] sm:$0xf0] }
 0x148   :  { %2587 = vmatpush.bf16.msra.mxu0 %v5186_v28  ;;  %v6503_v28 = vld [vmem:[#allocation6 + $0x24] sm:$0xf] }
 0x14b   :  { %v7123_v20 = vpop.f32.mrf.mxu1  ;;  %v7126_v29 = vpop.f32.mrf.mxu0 }
 0x14c   :  { %2588 = vmatpush.bf16.msra.mxu0 %v5170_v31  ;;  %v1505_v18 = vadd.f32 %v7123_v20, %v1486_v10  ;;  %v1488_v14 = vadd.f32 %v7126_v29, %v7146_v1 }
 0x14e   :  { %1769 = vmatmul.bf16.vlgmr.msrb.gmra.mxu3 %v7089_v32  ;;  %v6501_v32 = vld [vmem:[#allocation6 + $0xc] sm:$0xf0] }
 0x14f   :  { %v5154_v37 = vor.u32 %v6501_v32, %v5153_v44  ;;  %v5174_v32 = vor.u32 %v6503_v28, %v5171_v30  ;;  %v5473_v28 = vld [vmem:[#allocation6 + $0x280] sm:$0xf]  ;;  %v6547_v30 = vld [vmem:[#allocation6 + $0x184] sm:$0xf] }
 0x151   :  { %2589 = vmatpush.bf16.msra.mxu0 %v5154_v37 }
 0x153   :  { %v7128_v22 = vpop.f32.mrf.mxu1  ;;  %v7132_v36 = vpop.f32.mrf.mxu0 }
 0x154   :  { %v1507_v19 = vadd.f32 %v7128_v22, %v1488_v14  ;;  %v5155_v22 = vld [vmem:[#allocation6 + $0x10] sm:$0xf0]  ;;  %v1491_v59 = vadd.f32 %v7132_v36, %v7146_v1  ;;  %v5241_v14 = vld [vmem:[#allocation6 + $0xa8] sm:$0xf] }
 0x155   :  { %2658 = vmatpush.bf16.msrb.mxu0 %v5270_v42 }
 0x156   :  { %1755 = vmatmul.bf16.gmra.mxu2 %v7095_v12  ;;  %v5377_v12 = vld [vmem:[#allocation6 + $0x1c0] sm:$0xf] }
 0x157   :  { %v5378_v39 = vor.u32 %v6557_v46, %v5377_v12  ;;  %v5158_v12 = vor.u32 %v6499_v35, %v5155_v22  ;;  %v7176_v35 = vperm.slane %v7139_v55, 1  ;;  %v5457_v22 = vld [vmem:[#allocation6 + $0x260] sm:$0xf] }
 0x159   :  { %2602 = vmatpush.bf16.msra.mxu1 %v5378_v39  ;;  %2659 = vmatpush.bf16.msrb.mxu0 %v5254_v48  ;;  %v5521_v39 = vld [vmem:[#allocation6 + $0x2e0] sm:$0xf]  ;;  %v6559_v48 = vld [vmem:[#allocation6 + $0x1e4] sm:$0xf] }
 0x15b   :  { %v7134_v43 = vpop.f32.mrf.mxu1  ;;  %v7141_v56 = vpop.f32.mrf.mxu0 }
 0x15c   :  { %v1510_v8 = vadd.f32 %v7134_v43, %v1491_v59  ;;  %v6522_v43 = vld [vmem:[#allocation6 + $0xb4] sm:$0xf0]  ;;  %v6573_v59 = vld [vmem:[#allocation6 + $0x24c] sm:$0xf0] }
 0x15d   :  { %2660 = vmatpush.bf16.msrb.mxu0 %v5238_v54  ;;  %v5398_v54 = vor.u32 %v6559_v48, %v5395_v51  ;;  %v6514_v48 = vld [vmem:[#allocation6 + $0x74] sm:$0xf0] }
 0x15e   :  { %1774 = vmatmul.bf16.gmra.mxu3 %v7100_v41  ;;  %v5361_v41 = vld [vmem:[#allocation6 + $0x1a0] sm:$0xf] }
 0x15f   :  { %v5362_v52 = vor.u32 %v6553_v50, %v5361_v41  ;;  %v5522_v50 = vor.u32 %v6593_v47, %v5521_v39  ;;  %v5331_v39 = vld [vmem:[#allocation6 + $0x170] sm:$0xf0]  ;;  %v5209_v47 = vld [vmem:[#allocation6 + $0x68] sm:$0xf] }
 0x160   :  { %v5210_v51 = vor.u32 %v6514_v48, %v5209_v47  ;;  %v6528_v47 = vld [vmem:[#allocation6 + $0xec] sm:$0xf]  ;;  %v5275_v48 = vld [vmem:[#allocation6 + $0xf8] sm:$0xf0] }
 0x161   :  { %2603 = vmatpush.bf16.msra.mxu1 %v5362_v52  ;;  %2661 = vmatpush.bf16.msrb.mxu0 %v5222_v0  ;;  %v5273_v52 = vld [vmem:[#allocation6 + $0xe8] sm:$0xf]  ;;  %v6555_v0 = vld [vmem:[#allocation6 + $0x1c4] sm:$0xf] }
 0x162   :  { %2620 = vmatpush.bf16.msra.mxu2 %v5522_v50 }
 0x163   :  { %v7143_v61 = vpop.f32.mrf.mxu1  ;;  %v7150_v17 = vpop.f32.mrf.mxu0 }
 0x165   :  { %2604 = vmatpush.bf16.msra.mxu1 %v5346_v3  ;;  %2662 = vmatpush.bf16.msrb.mxu0 %v5206_v33  ;;  %v5505_v3 = vld [vmem:[#allocation6 + $0x2c0] sm:$0xf]  ;;  %v1493_v33 = vadd.f32 %v7141_v56, %v7146_v1  ;;  %v5242_v1 = vor.u32 %v6522_v43, %v5241_v14 }
 0x166   :  { %v5506_v2 = vor.u32 %v6589_v62, %v5505_v3 }
 0x167   :  { %v1512_v36 = vadd.f32 %v7143_v61, %v1493_v33 }
 0x168   :  { %2621 = vmatpush.bf16.msra.mxu2 %v5506_v2  ;;  %v5193_v2 = vld [vmem:[#allocation6 + $0x48] sm:$0xf] }
 0x169   :  { %v1523_v57 = vpop.f32.mrf.mxu2  ;;  %2605 = vmatpush.bf16.msra.mxu1 %v5330_v7  ;;  %2663 = vmatpush.bf16.msrb.mxu0 %v5190_v21  ;;  %v6526_v7 = vld [vmem:[#allocation6 + $0xd4] sm:$0xf0] }
 0x16a   :  { %v1524_v24 = vadd.f32 %v1523_v57, %v1505_v18  ;;  %v5274_v57 = vor.u32 %v6530_v53, %v5273_v52  ;;  %v5258_v10 = vor.u32 %v6526_v7, %v5257_v6  ;;  %v5363_v18 = vld [vmem:[#allocation6 + $0x1b0] sm:$0xf0] }
 0x16b   :  { %v7155_v23 = vpop.f32.mrf.mxu1  ;;  %v7158_v46 = vpop.f32.mrf.mxu0  ;;  %v5366_v56 = vor.u32 %v6551_v16, %v5363_v18  ;;  %v5177_v16 = vld [vmem:[#allocation6 + $0x28] sm:$0xf] }
 0x16c   :  { %2622 = vmatpush.bf16.msra.mxu2 %v5490_v45  ;;  %v1564_v7 = vadd.f32 %v7158_v46, %v7176_v35  ;;  %v6506_v45 = vld [vmem:[#allocation6 + $0x34] sm:$0xf0] }
 0x16d   :  { %2606 = vmatpush.bf16.msra.mxu1 %v5314_v4  ;;  %2664 = vmatpush.bf16.msrb.mxu0 %v5174_v32  ;;  %v5225_v32 = vld [vmem:[#allocation6 + $0x88] sm:$0xf]  ;;  %v5178_v43 = vor.u32 %v6506_v45, %v5177_v16  ;;  %v5491_v16 = vld [vmem:[#allocation6 + $0x2b0] sm:$0xf0] }
 0x16e   :  { %v5369_v45 = vld [vmem:[#allocation6 + $0x1a8] sm:$0xf] }
 0x171   :  { %v1542_v9 = vpop.f32.mrf.mxu3  ;;  %v1525_v11 = vpop.f32.mrf.mxu2  ;;  %2607 = vmatpush.bf16.msra.mxu1 %v5298_v63  ;;  %2665 = vmatpush.bf16.msrb.mxu0 %v5158_v12  ;;  %v6581_v63 = vld [vmem:[#allocation6 + $0x28c] sm:$0xf0] }
 0x172   :  { %v1543_v31 = vadd.f32 %v1542_v9, %v1524_v24  ;;  %v1526_v44 = vadd.f32 %v1525_v11, %v1507_v19  ;;  %v5382_v9 = vor.u32 %v6555_v0, %v5379_v5  ;;  %v5315_v0 = vld [vmem:[#allocation6 + $0x150] sm:$0xf0]  ;;  %v6510_v5 = vld [vmem:[#allocation6 + $0x54] sm:$0xf0] }
 0x173   :  { %v7162_v41 = vpop.f32.mrf.mxu1  ;;  %v7171_v4 = vpop.f32.mrf.mxu0  ;;  %v5194_v33 = vor.u32 %v6510_v5, %v5193_v2  ;;  %v5507_v5 = vld [vmem:[#allocation6 + $0x2d0] sm:$0xf0] }
 0x174   :  { %v1780_v40 = vmax.f32 %v1543_v31, 0.0  ;;  %v5474_v31 = vor.u32 %v6581_v63, %v5473_v28  ;;  %v5161_v28 = vld [vmem:[#allocation6 + $0x8] sm:$0xf]  ;;  %v6502_v63 = vld [vmem:[#allocation6 + $0x14] sm:$0xf0] }
 0x175   :  { %2608 = vmatpush.bf16.msra.mxu1 %v5282_v38 }
 0x176   :  { %2623 = vmatpush.bf16.msra.mxu2 %v5474_v31 }
 0x179   :  { %v1544_v20 = vpop.f32.mrf.mxu3  ;;  %v1528_v29 = vpop.f32.mrf.mxu2  ;;  %2677 = vmatpush.bf16.msrb.mxu1 %v5398_v54  ;;  %v1562_v54 = vadd.f32 %v7150_v17, %v7176_v35  ;;  %v1583_v17 = vadd.f32 %v7162_v41, %v1564_v7  ;;  %v5409_v41 = vld [vmem:[#allocation6 + $0x200] sm:$0xf] }
 0x17a   :  { %v1545_v37 = vadd.f32 %v1544_v20, %v1526_v44  ;;  %v1529_v11 = vadd.f32 %v1528_v29, %v1510_v8  ;;  %v5347_v44 = vld [vmem:[#allocation6 + $0x190] sm:$0xf0]  ;;  %v6518_v20 = vld [vmem:[#allocation6 + $0x94] sm:$0xf0] }
 0x17b   :  { %v7173_v24 = vpop.f32.mrf.mxu1  ;;  %v5350_v49 = vor.u32 %v6547_v30, %v5347_v44  ;;  %v5226_v25 = vor.u32 %v6518_v20, %v5225_v32  ;;  %v7181_v52 = vpop.f32.mrf.mxu0  ;;  %v1581_v6 = vadd.f32 %v7155_v23, %v1562_v54  ;;  %v5162_v32 = vor.u32 %v6502_v63, %v5161_v28  ;;  %v6579_v28 = vld [vmem:[#allocation6 + $0x284] sm:$0xf] }
 0x17c   :  { %v1784_v42 = vmax.f32 %v1545_v37, 0.0  ;;  %v1567_v54 = vadd.f32 %v7171_v4, %v7176_v35  ;;  %v6524_v4 = vld [vmem:[#allocation6 + $0xcc] sm:$0xf] }
 0x17d   :  { %2678 = vmatpush.bf16.msrb.mxu1 %v5382_v9 }
 0x17e   :  { %v7160_v34 = vpack.c.bf16 %v1784_v42, %v1780_v40  ;;  %v6577_v40 = vld [vmem:[#allocation6 + $0x26c] sm:$0xf0]  ;;  %v6543_v42 = vld [vmem:[#allocation6 + $0x164] sm:$0xf] }
 0x17f   :  { %v5458_v12 = vor.u32 %v6577_v40, %v5457_v22  ;;  %v5334_v50 = vor.u32 %v6543_v42, %v5331_v39  ;;  %v6591_v22 = vld [vmem:[#allocation6 + $0x2e4] sm:$0xf]  ;;  %v5523_v40 = vld [vmem:[#allocation6 + $0x2f0] sm:$0xf0]  ;;  %v5401_v42 = vld [vmem:[#allocation6 + $0x1e8] sm:$0xf] }
 0x180   :  { %2590 = vmatmul.bf16.vlgmr.msra.gmra.mxu0 %v7160_v34  ;;  %v6562_v39 = vld [vmem:[#allocation6 + $0x1f4] sm:$0xf0] }
 0x181   :  { %v1547_v58 = vpop.f32.mrf.mxu3  ;;  %v1530_v60 = vpop.f32.mrf.mxu2  ;;  %2734 = vmatpush.bf16.msra.mxu0 %v5274_v57  ;;  %2679 = vmatpush.bf16.msrb.mxu1 %v5366_v56  ;;  %v6565_v56 = vld [vmem:[#allocation6 + $0x20c] sm:$0xf0] }
 0x182   :  { %v1548_v21 = vadd.f32 %v1547_v58, %v1529_v11  ;;  %v1531_v19 = vadd.f32 %v1530_v60, %v1512_v36  ;;  %2624 = vmatpush.bf16.msra.mxu2 %v5458_v12  ;;  %v5441_v58 = vld [vmem:[#allocation6 + $0x240] sm:$0xf]  ;;  %v6539_v60 = vld [vmem:[#allocation6 + $0x144] sm:$0xf]  ;;  %v6569_v36 = vld [vmem:[#allocation6 + $0x22c] sm:$0xf0]  ;;  %v5526_v12 = vor.u32 %v6591_v22, %v5523_v40 }
 0x183   :  { %v7185_v3 = vpop.f32.mrf.mxu1  ;;  %v5442_v62 = vor.u32 %v6573_v59, %v5441_v58  ;;  %v5318_v8 = vor.u32 %v6539_v60, %v5315_v0  ;;  %v6535_v11 = vld [vmem:[#allocation6 + $0x124] sm:$0xf]  ;;  %v5633_v58 = vld [vmem:[#allocation6 + $0x3c0] sm:$0xf]  ;;  %v6621_v59 = vld [vmem:[#allocation6 + $0x3cc] sm:$0xf0]  ;;  %v1569_v0 = vadd.f32 %v7181_v52, %v7176_v35 }
 0x184   :  { %v1788_v37 = vmax.f32 %v1548_v21, 0.0  ;;  %v5302_v14 = vor.u32 %v6535_v11, %v5299_v15  ;;  %v6587_v60 = vld [vmem:[#allocation6 + $0x2c4] sm:$0xf]  ;;  %v5634_v2 = vor.u32 %v6621_v59, %v5633_v58  ;;  %v5227_v22 = vld [vmem:[#allocation6 + $0x98] sm:$0xf0]  ;;  %v7210_v40 = vperm.slane %v7139_v55, 2 }
 0x185   :  { %2735 = vmatpush.bf16.msra.mxu0 %v5258_v10  ;;  %2680 = vmatpush.bf16.msrb.mxu1 %v5350_v49  ;;  %v5425_v10 = vld [vmem:[#allocation6 + $0x220] sm:$0xf]  ;;  %v6625_v49 = vld [vmem:[#allocation6 + $0x3ec] sm:$0xf0]  ;;  %v6583_v52 = vld [vmem:[#allocation6 + $0x2a4] sm:$0xf] }
 0x186   :  { %2625 = vmatpush.bf16.msra.mxu2 %v5442_v62  ;;  %v5426_v13 = vor.u32 %v6569_v36, %v5425_v10  ;;  %v1586_v62 = vadd.f32 %v7173_v24, %v1567_v54  ;;  %v6617_v24 = vld [vmem:[#allocation6 + $0x3ac] sm:$0xf0]  ;;  %v5459_v54 = vld [vmem:[#allocation6 + $0x270] sm:$0xf0]  ;;  %v6546_v58 = vld [vmem:[#allocation6 + $0x174] sm:$0xf0] }
 0x189   :  { %v1549_v26 = vpop.f32.mrf.mxu3  ;;  %v1599_v27 = vpop.f32.mrf.mxu2  ;;  %2736 = vmatpush.bf16.msra.mxu0 %v5242_v1  ;;  %2681 = vmatpush.bf16.msrb.mxu1 %v5334_v50  ;;  %v6531_v1 = vld [vmem:[#allocation6 + $0x104] sm:$0xf] }
 0x18a   :  { %v1550_v61 = vadd.f32 %v1549_v26, %v1531_v19  ;;  %v1600_v9 = vadd.f32 %v1599_v27, %v1581_v6  ;;  %2626 = vmatpush.bf16.msra.mxu2 %v5426_v13  ;;  %v7191_v26 = vpop.f32.mrf.mxu0  ;;  %v5283_v27 = vld [vmem:[#allocation6 + $0x110] sm:$0xf0]  ;;  %v5385_v6 = vld [vmem:[#allocation6 + $0x1c8] sm:$0xf]  ;;  %v5617_v13 = vld [vmem:[#allocation6 + $0x3a0] sm:$0xf] }
 0x18b   :  { %v5286_v44 = vor.u32 %v6531_v1, %v5283_v27  ;;  %v7193_v20 = vpop.f32.mrf.mxu1  ;;  %v5618_v35 = vor.u32 %v6617_v24, %v5617_v13  ;;  %v6613_v27 = vld [vmem:[#allocation6 + $0x38c] sm:$0xf0]  ;;  %v5443_v13 = vld [vmem:[#allocation6 + $0x250] sm:$0xf0]  ;;  %v5321_v24 = vld [vmem:[#allocation6 + $0x148] sm:$0xf] }
 0x18c   :  { %v1792_v29 = vmax.f32 %v1550_v61, 0.0  ;;  %v5410_v61 = vor.u32 %v6565_v56, %v5409_v41 }
 0x18d   :  { %2737 = vmatpush.bf16.msra.mxu0 %v5226_v25  ;;  %2682 = vmatpush.bf16.msrb.mxu1 %v5318_v8  ;;  %v5510_v8 = vor.u32 %v6587_v60, %v5507_v5  ;;  %v5211_v5 = vld [vmem:[#allocation6 + $0x78] sm:$0xf0] }
 0x18e   :  { %v7178_v38 = vpack.c.bf16 %v1792_v29, %v1788_v37  ;;  %2627 = vmatpush.bf16.msra.mxu2 %v5410_v61  ;;  %v5649_v29 = vld [vmem:[#allocation6 + $0x3e0] sm:$0xf] }
 0x18f   :  { %v5650_v25 = vor.u32 %v6625_v49, %v5649_v29  ;;  %v5601_v61 = vld [vmem:[#allocation6 + $0x380] sm:$0xf]  ;;  %v6550_v49 = vld [vmem:[#allocation6 + $0x194] sm:$0xf0] }
 0x190   :  { %2595 = vmatmul.bf16.gmra.mxu0 %v7178_v38 }
 0x191   :  { %v1618_v53 = vpop.f32.mrf.mxu3  ;;  %v1601_v57 = vpop.f32.mrf.mxu2  ;;  %2738 = vmatpush.bf16.msra.mxu0 %v5210_v51  ;;  %2683 = vmatpush.bf16.msrb.mxu1 %v5302_v14  ;;  %v5402_v51 = vor.u32 %v6562_v39, %v5401_v42  ;;  %v5494_v14 = vor.u32 %v6583_v52, %v5491_v16  ;;  %v6542_v52 = vld [vmem:[#allocation6 + $0x154] sm:$0xf0]  ;;  %v5195_v16 = vld [vmem:[#allocation6 + $0x58] sm:$0xf0] }
 0x192   :  { %v1619_v18 = vadd.f32 %v1618_v53, %v1600_v9  ;;  %v1602_v23 = vadd.f32 %v1601_v57, %v1583_v17  ;;  %2639 = vmatpush.bf16.msra.mxu3 %v5650_v25  ;;  %v5278_v53 = vor.u32 %v6528_v47, %v5275_v48  ;;  %2696 = vmatpush.bf16.msrb.mxu2 %v5526_v12  ;;  %v7204_v7 = vpop.f32.mrf.mxu0  ;;  %v5259_v17 = vld [vmem:[#allocation6 + $0xd8] sm:$0xf0]  ;;  %v6516_v25 = vld [vmem:[#allocation6 + $0x8c] sm:$0xf]  ;;  %v5585_v48 = vld [vmem:[#allocation6 + $0x360] sm:$0xf] }
 0x193   :  { %v1588_v9 = vadd.f32 %v7185_v3, %v1569_v0  ;;  %v5262_v11 = vor.u32 %v6524_v4, %v5259_v17  ;;  %v7207_v15 = vpop.f32.mrf.mxu1  ;;  %v6520_v3 = vld [vmem:[#allocation6 + $0xac] sm:$0xf]  ;;  %v5230_v39 = vor.u32 %v6516_v25, %v5227_v22  ;;  %v5569_v4 = vld [vmem:[#allocation6 + $0x340] sm:$0xf]  ;;  %v6605_v17 = vld [vmem:[#allocation6 + $0x34c] sm:$0xf0] }
 0x194   :  { %v1781_v30 = vmax.f32 %v1619_v18, 0.0  ;;  %v6563_v25 = vld [vmem:[#allocation6 + $0x204] sm:$0xf] }
 0x195   :  { %2739 = vmatpush.bf16.msra.mxu0 %v5194_v33  ;;  %2684 = vmatpush.bf16.msrb.mxu1 %v5286_v44  ;;  %v6558_v33 = vld [vmem:[#allocation6 + $0x1d4] sm:$0xf0]  ;;  %v5475_v44 = vld [vmem:[#allocation6 + $0x290] sm:$0xf0] }
 0x196   :  { %2640 = vmatpush.bf16.msra.mxu3 %v5634_v2  ;;  %v5386_v36 = vor.u32 %v6558_v33, %v5385_v6  ;;  %2697 = vmatpush.bf16.msrb.mxu2 %v5510_v8  ;;  %v5478_v29 = vor.u32 %v6579_v28, %v5475_v44  ;;  %v6512_v2 = vld [vmem:[#allocation6 + $0x6c] sm:$0xf]  ;;  %v1638_v6 = vadd.f32 %v7191_v26, %v7210_v40  ;;  %v5179_v28 = vld [vmem:[#allocation6 + $0x38] sm:$0xf0] }
 0x197   :  { %v5214_v33 = vor.u32 %v6512_v2, %v5211_v5  ;;  %v6508_v26 = vld [vmem:[#allocation6 + $0x4c] sm:$0xf]  ;;  %v5651_v2 = vld [vmem:[#allocation6 + $0x3f0] sm:$0xf0]  ;;  %v5529_v5 = vld [vmem:[#allocation6 + $0x2e8] sm:$0xf] }
 0x199   :  { %v1620_v46 = vpop.f32.mrf.mxu3  ;;  %v1604_v19 = vpop.f32.mrf.mxu2  ;;  %2740 = vmatpush.bf16.msra.mxu0 %v5178_v43  ;;  %v6554_v43 = vld [vmem:[#allocation6 + $0x1b4] sm:$0xf0] }
 0x19a   :  { %v1621_v21 = vadd.f32 %v1620_v46, %v1602_v23  ;;  %v1605_v10 = vadd.f32 %v1604_v19, %v1586_v62  ;;  %v5243_v46 = vld [vmem:[#allocation6 + $0xb8] sm:$0xf0]  ;;  %v5370_v19 = vor.u32 %v6554_v43, %v5369_v45  ;;  %2641 = vmatpush.bf16.msra.mxu3 %v5618_v35  ;;  %2698 = vmatpush.bf16.msrb.mxu2 %v5494_v14  ;;  %v7214_v47 = vpop.f32.mrf.mxu0  ;;  %v5553_v43 = vld [vmem:[#allocation6 + $0x320] sm:$0xf] }
 0x19b   :  { %v5246_v41 = vor.u32 %v6520_v3, %v5243_v46  ;;  %v7218_v59 = vpop.f32.mrf.mxu1  ;;  %v5198_v14 = vor.u32 %v6508_v26, %v5195_v16  ;;  %v5427_v46 = vld [vmem:[#allocation6 + $0x230] sm:$0xf0] }
 0x19c   :  { %v1785_v31 = vmax.f32 %v1621_v21, 0.0 }
 0x19d   :  { %2741 = vmatpush.bf16.msra.mxu0 %v5162_v32  ;;  %v5353_v32 = vld [vmem:[#allocation6 + $0x188] sm:$0xf] }
 0x19e   :  { %v7195_v37 = vpack.c.bf16 %v1785_v31, %v1781_v30  ;;  %v5602_v31 = vor.u32 %v6613_v27, %v5601_v61  ;;  %v5354_v12 = vor.u32 %v6550_v49, %v5353_v32  ;;  %2699 = vmatpush.bf16.msrb.mxu2 %v5478_v29  ;;  %v6538_v61 = vld [vmem:[#allocation6 + $0x134] sm:$0xf0]  ;;  %v6504_v27 = vld [vmem:[#allocation6 + $0x2c] sm:$0xf]  ;;  %v5537_v29 = vld [vmem:[#allocation6 + $0x300] sm:$0xf] }
 0x19f   :  { %v6597_v49 = vld [vmem:[#allocation6 + $0x30c] sm:$0xf0] }
 0x1a0   :  { %2609 = vmatmul.bf16.vlgmr.msra.gmra.mxu1 %v7195_v37  ;;  %2666 = vmatmul.bf16.vlgmr.msrb.gmra.mxu0 %v7160_v34 }
 0x1a1   :  { %v1623_v50 = vpop.f32.mrf.mxu3  ;;  %v1606_v57 = vpop.f32.mrf.mxu2  ;;  %2753 = vmatpush.bf16.msra.mxu1 %v5402_v51  ;;  %2810 = vmatpush.bf16.msrb.mxu0 %v5278_v53  ;;  %v6575_v51 = vld [vmem:[#allocation6 + $0x264] sm:$0xf] }
 0x1a2   :  { %v1624_v18 = vadd.f32 %v1623_v50, %v1605_v10  ;;  %v1607_v23 = vadd.f32 %v1606_v57, %v1588_v9  ;;  %2642 = vmatpush.bf16.msra.mxu3 %v5602_v31  ;;  %v6609_v50 = vld [vmem:[#allocation6 + $0x36c] sm:$0xf0]  ;;  %v5337_v57 = vld [vmem:[#allocation6 + $0x168] sm:$0xf]  ;;  %v5462_v62 = vor.u32 %v6575_v51, %v5459_v54  ;;  %v6571_v9 = vld [vmem:[#allocation6 + $0x244] sm:$0xf]  ;;  %v1657_v10 = vadd.f32 %v7193_v20, %v1638_v6 }
 0x1a3   :  { %v5586_v53 = vor.u32 %v6609_v50, %v5585_v48  ;;  %v5338_v0 = vor.u32 %v6546_v58, %v5337_v57  ;;  %v5446_v35 = vor.u32 %v6571_v9, %v5443_v13  ;;  %v6601_v20 = vld [vmem:[#allocation6 + $0x32c] sm:$0xf0]  ;;  %v1663_v32 = vpop.f32.mrf.mxu1  ;;  %v5411_v48 = vld [vmem:[#allocation6 + $0x210] sm:$0xf0]  ;;  %v5289_v50 = vld [vmem:[#allocation6 + $0x108] sm:$0xf] }
 0x1a4   :  { %v1789_v63 = vmax.f32 %v1624_v18, 0.0  ;;  %2700 = vmatpush.bf16.msrb.mxu2 %v5462_v62  ;;  %v5554_v3 = vor.u32 %v6601_v20, %v5553_v43  ;;  %v5414_v51 = vor.u32 %v6563_v25, %v5411_v48  ;;  %v6500_v54 = vld [vmem:[#allocation6 + $0xc] sm:$0xf]  ;;  %v5163_v57 = vld [vmem:[#allocation6 + $0x18] sm:$0xf0] }
 0x1a5   :  { %2754 = vmatpush.bf16.msra.mxu1 %v5386_v36  ;;  %2811 = vmatpush.bf16.msrb.mxu0 %v5262_v11  ;;  %v1640_v36 = vadd.f32 %v7204_v7, %v7210_v40  ;;  %v5570_v11 = vor.u32 %v6605_v17, %v5569_v4  ;;  %v6567_v7 = vld [vmem:[#allocation6 + $0x224] sm:$0xf]  ;;  %v5166_v62 = vor.u32 %v6500_v54, %v5163_v57  ;;  %v5403_v4 = vld [vmem:[#allocation6 + $0x1f8] sm:$0xf0] }
 0x1a6   :  { %2643 = vmatpush.bf16.msra.mxu3 %v5586_v53  ;;  %v6534_v53 = vld [vmem:[#allocation6 + $0x114] sm:$0xf0]  ;;  %v5387_v43 = vld [vmem:[#allocation6 + $0x1d8] sm:$0xf0]  ;;  %v6615_v20 = vld [vmem:[#allocation6 + $0x3a4] sm:$0xf] }
 0x1a7   :  { %v1659_v45 = vadd.f32 %v7207_v15, %v1640_v36  ;;  %v1643_v36 = vadd.f32 %v7214_v47, %v7210_v40 }
 0x1a8   :  { %2701 = vmatpush.bf16.msrb.mxu2 %v5446_v35  ;;  %v5635_v35 = vld [vmem:[#allocation6 + $0x3d0] sm:$0xf0] }
 0x1a9   :  { %v1625_v21 = vpop.f32.mrf.mxu3  ;;  %v1675_v1 = vpop.f32.mrf.mxu2  ;;  %2755 = vmatpush.bf16.msra.mxu1 %v5370_v19  ;;  %2812 = vmatpush.bf16.msrb.mxu0 %v5246_v41  ;;  %v1662_v26 = vadd.f32 %v7218_v59, %v1643_v36  ;;  %v6552_v59 = vld [vmem:[#allocation6 + $0x1ac] sm:$0xf] }
 0x1aa   :  { %v1626_v56 = vadd.f32 %v1625_v21, %v1607_v23  ;;  %v1676_v18 = vadd.f32 %v1675_v1, %v1657_v10  ;;  %2644 = vmatpush.bf16.msra.mxu3 %v5570_v11  ;;  %v5322_v23 = vor.u32 %v6542_v52, %v5321_v24  ;;  %v5305_v21 = vld [vmem:[#allocation6 + $0x128] sm:$0xf]  ;;  %v5182_v1 = vor.u32 %v6504_v27, %v5179_v28  ;;  %v6619_v24 = vld [vmem:[#allocation6 + $0x3c4] sm:$0xf]  ;;  %v5371_v28 = vld [vmem:[#allocation6 + $0x1b8] sm:$0xf0] }
 0x1ab   :  { %v5306_v15 = vor.u32 %v6538_v61, %v5305_v21  ;;  %v5513_v52 = vld [vmem:[#allocation6 + $0x2c8] sm:$0xf] }
 0x1ac   :  { %v1793_v30 = vmax.f32 %v1626_v56, 0.0  ;;  %v5430_v56 = vor.u32 %v6567_v7, %v5427_v46 }
 0x1ad   :  { %2756 = vmatpush.bf16.msra.mxu1 %v5354_v12  ;;  %2813 = vmatpush.bf16.msrb.mxu0 %v5230_v39  ;;  %v5538_v39 = vor.u32 %v6597_v49, %v5537_v29 }
 0x1ae   :  { %v7212_v42 = vpack.c.bf16 %v1793_v30, %v1789_v63  ;;  %v1644_v63 = vpop.f32.mrf.mxu0  ;;  %2645 = vmatpush.bf16.msra.mxu3 %v5554_v3  ;;  %2702 = vmatpush.bf16.msrb.mxu2 %v5430_v56  ;;  %v5619_v3 = vld [vmem:[#allocation6 + $0x3b0] sm:$0xf0]  ;;  %v6586_v56 = vld [vmem:[#allocation6 + $0x2b4] sm:$0xf0] }
 0x1af   :  { %v1645_v16 = vadd.f32 %v1644_v63, %v7210_v40 }
 0x1b0   :  { %2614 = vmatmul.bf16.gmra.mxu1 %v7212_v42  ;;  %2671 = vmatmul.bf16.gmra.mxu0 %v7178_v38 }
 0x1b1   :  { %v1694_v60 = vpop.f32.mrf.mxu3  ;;  %v1677_v8 = vpop.f32.mrf.mxu2  ;;  %2757 = vmatpush.bf16.msra.mxu1 %v5338_v0  ;;  %2814 = vmatpush.bf16.msrb.mxu0 %v5214_v33  ;;  %v6623_v0 = vld [vmem:[#allocation6 + $0x3e4] sm:$0xf]  ;;  %v6560_v33 = vld [vmem:[#allocation6 + $0x1ec] sm:$0xf]  ;;  %v1664_v7 = vadd.f32 %v1663_v32, %v1645_v16  ;;  %v5481_v32 = vld [vmem:[#allocation6 + $0x288] sm:$0xf] }
 0x1b2   :  { %v1695_v19 = vadd.f32 %v1694_v60, %v1676_v18  ;;  %v1678_v41 = vadd.f32 %v1677_v8, %v1659_v45  ;;  %2646 = vmatpush.bf16.msra.mxu3 %v5538_v39  ;;  %v5290_v60 = vor.u32 %v6534_v53, %v5289_v50  ;;  %2703 = vmatpush.bf16.msrb.mxu2 %v5414_v51  ;;  %v6594_v8 = vld [vmem:[#allocation6 + $0x2f4] sm:$0xf0]  ;;  %v5355_v50 = vld [vmem:[#allocation6 + $0x198] sm:$0xf0]  ;;  %v7240_v51 = vperm.slane %v7139_v55, 3 }
 0x1b3   :  { %v5654_v6 = vor.u32 %v6623_v0, %v5651_v2  ;;  %v5530_v9 = vor.u32 %v6594_v8, %v5529_v5  ;;  %v5406_v10 = vor.u32 %v6560_v33, %v5403_v4  ;;  %v5638_v45 = vor.u32 %v6619_v24, %v5635_v35  ;;  %v6590_v18 = vld [vmem:[#allocation6 + $0x2d4] sm:$0xf0]  ;;  %v5465_v0 = vld [vmem:[#allocation6 + $0x268] sm:$0xf]  ;;  %v5339_v8 = vld [vmem:[#allocation6 + $0x178] sm:$0xf0] }
 0x1b4   :  { %v1782_v22 = vmax.f32 %v1695_v19, 0.0  ;;  %v5514_v47 = vor.u32 %v6590_v18, %v5513_v52  ;;  %v5622_v19 = vor.u32 %v6615_v20, %v5619_v3  ;;  %v6578_v5 = vld [vmem:[#allocation6 + $0x274] sm:$0xf0]  ;;  %v6540_v52 = vld [vmem:[#allocation6 + $0x14c] sm:$0xf] }
 0x1b5   :  { %2758 = vmatpush.bf16.msra.mxu1 %v5322_v23  ;;  %2815 = vmatpush.bf16.msrb.mxu0 %v5198_v14  ;;  %v6556_v23 = vld [vmem:[#allocation6 + $0x1cc] sm:$0xf]  ;;  %v7237_v14 = vpop.f32.mrf.mxu1  ;;  %v5466_v33 = vor.u32 %v6578_v5, %v5465_v0  ;;  %v6574_v35 = vld [vmem:[#allocation6 + $0x254] sm:$0xf0]  ;;  %v5555_v18 = vld [vmem:[#allocation6 + $0x330] sm:$0xf0] }
 0x1b6   :  { %2715 = vmatpush.bf16.msrb.mxu3 %v5654_v6  ;;  %v7233_v13 = vpop.f32.mrf.mxu0  ;;  %v5390_v21 = vor.u32 %v6556_v23, %v5387_v43  ;;  %v6544_v6 = vld [vmem:[#allocation6 + $0x16c] sm:$0xf]  ;;  %v5433_v43 = vld [vmem:[#allocation6 + $0x228] sm:$0xf]  ;;  %v6570_v20 = vld [vmem:[#allocation6 + $0x234] sm:$0xf0] }
 0x1b7   :  { %v5342_v4 = vor.u32 %v6544_v6, %v5339_v8  ;;  %v1714_v36 = vadd.f32 %v7233_v13, %v7240_v51  ;;  %v5641_v5 = vld [vmem:[#allocation6 + $0x3c8] sm:$0xf]  ;;  %v6622_v6 = vld [vmem:[#allocation6 + $0x3d4] sm:$0xf0] }
 0x1b9   :  { %v1696_v30 = vpop.f32.mrf.mxu3  ;;  %v1680_v44 = vpop.f32.mrf.mxu2  ;;  %2759 = vmatpush.bf16.msra.mxu1 %v5306_v15  ;;  %2816 = vmatpush.bf16.msrb.mxu0 %v5182_v1  ;;  %v1733_v23 = vadd.f32 %v7237_v14, %v1714_v36 }
 0x1ba   :  { %v1697_v31 = vadd.f32 %v1696_v30, %v1678_v41  ;;  %v1681_v46 = vadd.f32 %v1680_v44, %v1662_v26  ;;  %2716 = vmatpush.bf16.msrb.mxu3 %v5638_v45  ;;  %v5497_v41 = vld [vmem:[#allocation6 + $0x2a8] sm:$0xf]  ;;  %v5374_v30 = vor.u32 %v6552_v59, %v5371_v28  ;;  %v5603_v44 = vld [vmem:[#allocation6 + $0x390] sm:$0xf0]  ;;  %v5323_v26 = vld [vmem:[#allocation6 + $0x158] sm:$0xf0] }
 0x1bb   :  { %v5498_v27 = vor.u32 %v6586_v56, %v5497_v41  ;;  %v6599_v45 = vld [vmem:[#allocation6 + $0x324] sm:$0xf]  ;;  %v5326_v3 = vor.u32 %v6540_v52, %v5323_v26  ;;  %v5434_v56 = vor.u32 %v6570_v20, %v5433_v43  ;;  %v6618_v52 = vld [vmem:[#allocation6 + $0x3b4] sm:$0xf0]  ;;  %v6584_v26 = vld [vmem:[#allocation6 + $0x2ac] sm:$0xf] }
 0x1bc   :  { %v1786_v12 = vmax.f32 %v1697_v31, 0.0  ;;  %v6611_v31 = vld [vmem:[#allocation6 + $0x384] sm:$0xf] }
 0x1bd   :  { %2760 = vmatpush.bf16.msra.mxu1 %v5290_v60  ;;  %2817 = vmatpush.bf16.msrb.mxu0 %v5166_v62  ;;  %v5606_v25 = vor.u32 %v6611_v31, %v5603_v44  ;;  %v1734_v57 = vpop.f32.mrf.mxu1  ;;  %v6607_v60 = vld [vmem:[#allocation6 + $0x364] sm:$0xf]  ;;  %v5587_v62 = vld [vmem:[#allocation6 + $0x370] sm:$0xf0]  ;;  %v6566_v44 = vld [vmem:[#allocation6 + $0x214] sm:$0xf0] }
 0x1be   :  { %v7226_v58 = vpack.c.bf16 %v1786_v12, %v1782_v22  ;;  %2717 = vmatpush.bf16.msrb.mxu3 %v5622_v19  ;;  %v6582_v22 = vld [vmem:[#allocation6 + $0x294] sm:$0xf0]  ;;  %v6548_v12 = vld [vmem:[#allocation6 + $0x18c] sm:$0xf]  ;;  %v1715_v39 = vpop.f32.mrf.mxu0  ;;  %v5590_v2 = vor.u32 %v6607_v60, %v5587_v62  ;;  %v5307_v19 = vld [vmem:[#allocation6 + $0x138] sm:$0xf0] }
 0x1bf   :  { %v5482_v48 = vor.u32 %v6582_v22, %v5481_v32  ;;  %v5358_v54 = vor.u32 %v6548_v12, %v5355_v50  ;;  %v6595_v59 = vld [vmem:[#allocation6 + $0x304] sm:$0xf]  ;;  %v6532_v32 = vld [vmem:[#allocation6 + $0x10c] sm:$0xf]  ;;  %v5291_v22 = vld [vmem:[#allocation6 + $0x118] sm:$0xf0] }
 0x1c0   :  { %2628 = vmatmul.bf16.vlgmr.msra.gmra.mxu2 %v7226_v58  ;;  %2685 = vmatmul.bf16.vlgmr.msrb.gmra.mxu1 %v7195_v37  ;;  %v6626_v50 = vld [vmem:[#allocation6 + $0x3f4] sm:$0xf0]  ;;  %v5531_v60 = vld [vmem:[#allocation6 + $0x2f8] sm:$0xf0] }
 0x1c1   :  { %2742 = vmatmul.bf16.vlgmr.msra.gmra.mxu0 %v7160_v34  ;;  %v1699_v17 = vpop.f32.mrf.mxu3  ;;  %v1682_v11 = vpop.f32.mrf.mxu2  ;;  %2772 = vmatpush.bf16.msra.mxu2 %v5530_v9  ;;  %v5571_v9 = vld [vmem:[#allocation6 + $0x350] sm:$0xf0] }
 0x1c2   :  { %2829 = vmatpush.bf16.msrb.mxu1 %v5406_v10  ;;  %v1700_v61 = vadd.f32 %v1699_v17, %v1681_v46  ;;  %v1683_v40 = vadd.f32 %v1682_v11, %v1664_v7  ;;  %2718 = vmatpush.bf16.msrb.mxu3 %v5606_v25  ;;  %v6603_v17 = vld [vmem:[#allocation6 + $0x344] sm:$0xf]  ;;  %v5449_v10 = vld [vmem:[#allocation6 + $0x248] sm:$0xf]  ;;  %v5558_v46 = vor.u32 %v6599_v45, %v5555_v18  ;;  %v5499_v45 = vld [vmem:[#allocation6 + $0x2b8] sm:$0xf0] }
 0x1c3   :  { %v5574_v24 = vor.u32 %v6603_v17, %v5571_v9  ;;  %v5450_v16 = vor.u32 %v6574_v35, %v5449_v10  ;;  %v5515_v17 = vld [vmem:[#allocation6 + $0x2d8] sm:$0xf0]  ;;  %v5625_v35 = vld [vmem:[#allocation6 + $0x3a8] sm:$0xf]  ;;  %v5502_v20 = vor.u32 %v6584_v26, %v5499_v45  ;;  %v6596_v45 = vld [vmem:[#allocation6 + $0x30c] sm:$0xf] }
 0x1c4   :  { %v1790_v29 = vmax.f32 %v1700_v61, 0.0  ;;  %v5539_v61 = vld [vmem:[#allocation6 + $0x310] sm:$0xf0]  ;;  %v5609_v18 = vld [vmem:[#allocation6 + $0x388] sm:$0xf] }
 0x1c5   :  { %2773 = vmatpush.bf16.msra.mxu2 %v5514_v47  ;;  %v1716_v47 = vadd.f32 %v1715_v39, %v7240_v51  ;;  %v1737_v14 = vpop.f32.mrf.mxu1  ;;  %v5294_v39 = vor.u32 %v6532_v32, %v5291_v22  ;;  %v5561_v32 = vld [vmem:[#allocation6 + $0x328] sm:$0xf]  ;;  %v5435_v22 = vld [vmem:[#allocation6 + $0x238] sm:$0xf0] }
 0x1c6   :  { %2830 = vmatpush.bf16.msrb.mxu1 %v5390_v21  ;;  %2719 = vmatpush.bf16.msrb.mxu3 %v5590_v2  ;;  %v6536_v21 = vld [vmem:[#allocation6 + $0x12c] sm:$0xf]  ;;  %v1718_v41 = vpop.f32.mrf.mxu0  ;;  %v5563_v26 = vld [vmem:[#allocation6 + $0x338] sm:$0xf0] }
 0x1c7   :  { %v1735_v7 = vadd.f32 %v1734_v57, %v1716_v47  ;;  %v1719_v8 = vadd.f32 %v1718_v41, %v7240_v51 }
 0x1c9   :  { %v1701_v63 = vpop.f32.mrf.mxu3  ;;  %v1751_v1 = vpop.f32.mrf.mxu2  ;;  %2774 = vmatpush.bf16.msra.mxu2 %v5498_v27  ;;  %v1738_v9 = vadd.f32 %v1737_v14, %v1719_v8  ;;  %v5467_v14 = vld [vmem:[#allocation6 + $0x278] sm:$0xf0] }
 0x1ca   :  { %v1702_v15 = vadd.f32 %v1701_v63, %v1683_v40  ;;  %2831 = vmatpush.bf16.msrb.mxu1 %v5374_v30  ;;  %v1752_v13 = vadd.f32 %v1751_v1, %v1733_v23  ;;  %2720 = vmatpush.bf16.msrb.mxu3 %v5574_v24  ;;  %v5310_v63 = vor.u32 %v6536_v21, %v5307_v19  ;;  %v5417_v1 = vld [vmem:[#allocation6 + $0x208] sm:$0xf]  ;;  %v6614_v23 = vld [vmem:[#allocation6 + $0x394] sm:$0xf0] }
 0x1cb   :  { %v5418_v25 = vor.u32 %v6566_v44, %v5417_v1  ;;  %v5451_v1 = vld [vmem:[#allocation6 + $0x258] sm:$0xf0] }
 0x1cc   :  { %v1794_v49 = vmax.f32 %v1702_v15, 0.0  ;;  %v5542_v15 = vor.u32 %v6595_v59, %v5539_v61  ;;  %v5593_v59 = vld [vmem:[#allocation6 + $0x368] sm:$0xf]  ;;  %v6610_v61 = vld [vmem:[#allocation6 + $0x374] sm:$0xf0] }
 0x1cd   :  { %2775 = vmatpush.bf16.msra.mxu2 %v5482_v48  ;;  %v5657_v48 = vld [vmem:[#allocation6 + $0x3e8] sm:$0xf] }
 0x1ce   :  { %v7242_v53 = vpack.c.bf16 %v1794_v49, %v1790_v29  ;;  %2832 = vmatpush.bf16.msrb.mxu1 %v5358_v54  ;;  %2721 = vmatpush.bf16.msrb.mxu3 %v5558_v46  ;;  %v6592_v54 = vld [vmem:[#allocation6 + $0x2ec] sm:$0xf]  ;;  %v5658_v57 = vor.u32 %v6626_v50, %v5657_v48  ;;  %v1720_v62 = vpop.f32.mrf.mxu0  ;;  %v5483_v46 = vld [vmem:[#allocation6 + $0x298] sm:$0xf0]  ;;  %v6598_v48 = vld [vmem:[#allocation6 + $0x314] sm:$0xf0] }
 0x1cf   :  { %v5534_v2 = vor.u32 %v6592_v54, %v5531_v60  ;;  %v1721_v10 = vadd.f32 %v1720_v62, %v7240_v51  ;;  %v5610_v51 = vor.u32 %v6614_v23, %v5609_v18  ;;  %v6564_v54 = vld [vmem:[#allocation6 + $0x20c] sm:$0xf]  ;;  %v5547_v18 = vld [vmem:[#allocation6 + $0x318] sm:$0xf0] }
 0x1d0   :  { %2633 = vmatmul.bf16.gmra.mxu2 %v7242_v53  ;;  %2690 = vmatmul.bf16.gmra.mxu1 %v7212_v42  ;;  %v6624_v62 = vld [vmem:[#allocation6 + $0x3ec] sm:$0xf]  ;;  %v5550_v23 = vor.u32 %v6596_v45, %v5547_v18  ;;  %v5841_v18 = vld [vmem:[#allocation7 + $0x160] sm:$0xf] }
 0x1d1   :  { %2747 = vmatmul.bf16.gmra.mxu0 %v7178_v38  ;;  %v1770_v55 = vpop.f32.mrf.mxu3  ;;  %v1753_v11 = vpop.f32.mrf.mxu2  ;;  %2776 = vmatpush.bf16.msra.mxu2 %v5466_v33 }
 0x1d2   :  { %2833 = vmatpush.bf16.msrb.mxu1 %v5342_v4  ;;  %v1771_v40 = vadd.f32 %v1770_v55, %v1752_v13  ;;  %v1754_v27 = vadd.f32 %v1753_v11, %v1735_v7  ;;  %2722 = vmatpush.bf16.msrb.mxu3 %v5542_v15  ;;  %v5642_v55 = vor.u32 %v6622_v6, %v5641_v5  ;;  %v1739_v33 = vpop.f32.mrf.mxu1  ;;  %v6588_v4 = vld [vmem:[#allocation6 + $0x2cc] sm:$0xf]  ;;  %v5643_v6 = vld [vmem:[#allocation6 + $0x3d8] sm:$0xf0] }
 0x1d3   :  { %v5518_v36 = vor.u32 %v6588_v4, %v5515_v17  ;;  %v1740_v24 = vadd.f32 %v1739_v33, %v1721_v10  ;;  %v6580_v13 = vld [vmem:[#allocation6 + $0x28c] sm:$0xf]  ;;  %v5627_v33 = vld [vmem:[#allocation6 + $0x3b8] sm:$0xf0] }
 0x1d4   :  { %v1783_v29 = vmax.f32 %v1771_v40, 0.0  ;;  %v5486_v41 = vor.u32 %v6580_v13, %v5483_v46  ;;  %v6576_v40 = vld [vmem:[#allocation6 + $0x26c] sm:$0xf]  ;;  %v6649_v13 = vld [vmem:[#allocation7 + $0xac] sm:$0xf0] }
 0x1d5   :  { %2777 = vmatpush.bf16.msra.mxu2 %v5450_v16  ;;  %v5626_v16 = vor.u32 %v6618_v52, %v5625_v35  ;;  %v6620_v5 = vld [vmem:[#allocation6 + $0x3cc] sm:$0xf] }
 0x1d6   :  { %2834 = vmatpush.bf16.msrb.mxu1 %v5326_v3  ;;  %v5646_v8 = vor.u32 %v6620_v5, %v5643_v6  ;;  %v6612_v17 = vld [vmem:[#allocation6 + $0x38c] sm:$0xf] }
 0x1d7   :  { %v6600_v52 = vld [vmem:[#allocation6 + $0x32c] sm:$0xf] }
 0x1d9   :  { %v1772_v28 = vpop.f32.mrf.mxu3  ;;  %v1756_v31 = vpop.f32.mrf.mxu2  ;;  %2778 = vmatpush.bf16.msra.mxu2 %v5434_v56 }
 0x1da   :  { %v1773_v30 = vadd.f32 %v1772_v28, %v1754_v27  ;;  %2835 = vmatpush.bf16.msrb.mxu1 %v5310_v63  ;;  %v5594_v27 = vor.u32 %v6610_v61, %v5593_v59  ;;  %v5470_v28 = vor.u32 %v6576_v40, %v5467_v14  ;;  %v5577_v63 = vld [vmem:[#allocation6 + $0x348] sm:$0xf]  ;;  %v6641_v61 = vld [vmem:[#allocation7 + $0x6c] sm:$0xf0]  ;;  %v5697_v14 = vld [vmem:[#allocation7 + $0x40] sm:$0xf] }
 0x1dc   :  { %v1787_v49 = vmax.f32 %v1773_v30, 0.0  ;;  %v6606_v30 = vld [vmem:[#allocation6 + $0x354] sm:$0xf0] }
 0x1dd   :  { %2779 = vmatpush.bf16.msra.mxu2 %v5418_v25  ;;  %v5578_v15 = vor.u32 %v6606_v30, %v5577_v63 }
 0x1de   :  { %v7251_v12 = vpack.c.bf16 %v1787_v49, %v1783_v29  ;;  %2836 = vmatpush.bf16.msrb.mxu1 %v5294_v39  ;;  %v6602_v29 = vld [vmem:[#allocation6 + $0x334] sm:$0xf0]  ;;  %v6568_v49 = vld [vmem:[#allocation6 + $0x22c] sm:$0xf]  ;;  %v5545_v39 = vld [vmem:[#allocation6 + $0x308] sm:$0xf] }
 0x1df   :  { %v5562_v25 = vor.u32 %v6602_v29, %v5561_v32  ;;  %v5438_v50 = vor.u32 %v6568_v49, %v5435_v22  ;;  %v6629_v29 = vld [vmem:[#allocation7 + $0xc] sm:$0xf0]  ;;  %v5905_v22 = vld [vmem:[#allocation7 + $0x1e0] sm:$0xf] }
 0x1e0   :  { %2647 = vmatmul.bf16.vlgmr.msra.gmra.mxu3 %v7251_v12  ;;  %2704 = vmatmul.bf16.vlgmr.msrb.gmra.mxu2 %v7226_v58 }
 0x1e1   :  { %2761 = vmatmul.bf16.vlgmr.msra.gmra.mxu1 %v7195_v37  ;;  %2818 = vmatmul.bf16.vlgmr.msrb.gmra.mxu0 %v7160_v34  ;;  %v1775_v0 = vpop.f32.mrf.mxu3  ;;  %v1758_v11 = vpop.f32.mrf.mxu2  ;;  %v1757_v34 = vadd.f32 %v1756_v31, %v1738_v9  ;;  %v6572_v31 = vld [vmem:[#allocation6 + $0x24c] sm:$0xf]  ;;  %v5611_v9 = vld [vmem:[#allocation6 + $0x398] sm:$0xf0] }
 0x1e2   :  { %2791 = vmatpush.bf16.msra.mxu3 %v5658_v57  ;;  %2848 = vmatpush.bf16.msrb.mxu2 %v5534_v2  ;;  %v1759_v43 = vadd.f32 %v1758_v11, %v1740_v24  ;;  %v5454_v44 = vor.u32 %v6572_v31, %v5451_v1  ;;  %v5419_v57 = vld [vmem:[#allocation6 + $0x218] sm:$0xf0]  ;;  %v5614_v10 = vor.u32 %v6612_v17, %v5611_v9  ;;  %v5681_v31 = vld [vmem:[#allocation7 + $0x20] sm:$0xf]  ;;  %v6633_v1 = vld [vmem:[#allocation7 + $0x2c] sm:$0xf0] }
 0x1e3   :  { %v1776_v47 = vadd.f32 %v1775_v0, %v1757_v34  ;;  %v5422_v60 = vor.u32 %v6564_v54, %v5419_v57  ;;  %v5659_v0 = vld [vmem:[#allocation6 + $0x3f8] sm:$0xf0]  ;;  %v6604_v34 = vld [vmem:[#allocation6 + $0x34c] sm:$0xf]  ;;  %v5747_v17 = vld [vmem:[#allocation7 + $0xb0] sm:$0xf0] }
 0x1e4   :  { %v5662_v2 = vor.u32 %v6624_v62, %v5659_v0  ;;  %v5595_v11 = vld [vmem:[#allocation6 + $0x378] sm:$0xf0]  ;;  %v5889_v62 = vld [vmem:[#allocation7 + $0x1c0] sm:$0xf]  ;;  %v6685_v0 = vld [vmem:[#allocation7 + $0x1cc] sm:$0xf0] }
 0x1e5   :  { %v1791_v21 = vmax.f32 %v1776_v47, 0.0  ;;  %v6657_v47 = vld [vmem:[#allocation7 + $0xec] sm:$0xf0]  ;;  %v5890_v5 = vor.u32 %v6685_v0, %v5889_v62  ;;  %v5667_v62 = vld [vmem:[#allocation7 + $0x10] sm:$0xf0] }
 0x1e6   :  { %2792 = vmatpush.bf16.msra.mxu3 %v5642_v55  ;;  %2849 = vmatpush.bf16.msrb.mxu2 %v5518_v36  ;;  %v6616_v55 = vld [vmem:[#allocation6 + $0x3ac] sm:$0xf] }
 0x1e7   :  { %v5630_v4 = vor.u32 %v6616_v55, %v5627_v33  ;;  %v6608_v36 = vld [vmem:[#allocation6 + $0x36c] sm:$0xf]  ;;  %v6681_v55 = vld [vmem:[#allocation7 + $0x1ac] sm:$0xf0]  ;;  %v6647_v33 = vld [vmem:[#allocation7 + $0xa4] sm:$0xf] }
 0x1e8   :  { %v5598_v24 = vor.u32 %v6608_v36, %v5595_v11  ;;  %v7300_v36 = vld [vmem:[%s7496_s6 + $0x8] sm:$0xf] }
 0x1e9   :  { %v1777_v3 = vpop.f32.mrf.mxu3  ;;  %v7307_v45 = vperm.slane %v7300_v36, 0 }
 0x1ea   :  { %v1778_v7 = vadd.f32 %v1777_v3, %v1759_v43  ;;  %2793 = vmatpush.bf16.msra.mxu3 %v5626_v16  ;;  %2850 = vmatpush.bf16.msrb.mxu2 %v5502_v20  ;;  %v5566_v16 = vor.u32 %v6600_v52, %v5563_v26  ;;  %v5761_v20 = vld [vmem:[#allocation7 + $0xc0] sm:$0xf]  ;;  %v6653_v3 = vld [vmem:[#allocation7 + $0xcc] sm:$0xf0]  ;;  %v5731_v52 = vld [vmem:[#allocation7 + $0x90] sm:$0xf0] }
 0x1ec   :  { %v1795_v19 = vmax.f32 %v1778_v7, 0.0  ;;  %v5762_v7 = vor.u32 %v6653_v3, %v5761_v20 }
 0x1ee   :  { %v7259_v56 = vpack.c.bf16 %v1795_v19, %v1791_v21  ;;  %2794 = vmatpush.bf16.msra.mxu3 %v5610_v51  ;;  %2851 = vmatpush.bf16.msrb.mxu2 %v5486_v41  ;;  %v5745_v51 = vld [vmem:[#allocation7 + $0xa0] sm:$0xf] }
 0x1ef   :  { %v5746_v46 = vor.u32 %v6649_v13, %v5745_v51  ;;  %v5729_v19 = vld [vmem:[#allocation7 + $0x80] sm:$0xf] }
 0x1f0   :  { %2652 = vmatmul.bf16.gmra.mxu3 %v7259_v56  ;;  %2709 = vmatmul.bf16.gmra.mxu2 %v7242_v53  ;;  %v5825_v13 = vld [vmem:[#allocation7 + $0x140] sm:$0xf] }
 0x1f1   :  { %2766 = vmatmul.bf16.gmra.mxu1 %v7212_v42  ;;  %2823 = vmatmul.bf16.gmra.mxu0 %v7178_v38  ;;  %v5546_v38 = vor.u32 %v6598_v48, %v5545_v39  ;;  %v6689_v39 = vld [vmem:[#allocation7 + $0x1ec] sm:$0xf0]  ;;  %v6655_v48 = vld [vmem:[#allocation7 + $0xe4] sm:$0xf] }
 0x1f2   :  { %2795 = vmatpush.bf16.msra.mxu3 %v5594_v27  ;;  %2852 = vmatpush.bf16.msrb.mxu2 %v5470_v28  ;;  %v6637_v28 = vld [vmem:[#allocation7 + $0x4c] sm:$0xf0] }
 0x1f3   :  { %v5698_v63 = vor.u32 %v6637_v28, %v5697_v14 }
 0x1f6   :  { %2796 = vmatpush.bf16.msra.mxu3 %v5578_v15  ;;  %2853 = vmatpush.bf16.msrb.mxu2 %v5454_v44  ;;  %v5682_v44 = vor.u32 %v6633_v1, %v5681_v31  ;;  %v5809_v31 = vld [vmem:[#allocation7 + $0x120] sm:$0xf]  ;;  %v6665_v1 = vld [vmem:[#allocation7 + $0x12c] sm:$0xf0] }
 0x1fa   :  { %2797 = vmatpush.bf16.msra.mxu3 %v5562_v25  ;;  %2854 = vmatpush.bf16.msrb.mxu2 %v5438_v50  ;;  %v5906_v50 = vor.u32 %v6689_v39, %v5905_v22 }
 0x1fc   :  { %3707 = vmatpush.bf16.msra.mxu1 %v5906_v50 }
 0x1fd   :  { %v7275_v21 = vpop.f32.mrf.mxu0 }
 0x1fe   :  { %2798 = vmatpush.bf16.msra.mxu3 %v5546_v38  ;;  %2855 = vmatpush.bf16.msrb.mxu2 %v5422_v60  ;;  %v5779_v38 = vld [vmem:[#allocation7 + $0xf0] sm:$0xf0] }
 0x1ff   :  { %v5782_v57 = vor.u32 %v6655_v48, %v5779_v38  ;;  %v6661_v48 = vld [vmem:[#allocation7 + $0x10c] sm:$0xf0] }
 0x200   :  { %2723 = vmatmul.bf16.vlgmr.msrb.gmra.mxu3 %v7251_v12  ;;  %2780 = vmatmul.bf16.vlgmr.msra.gmra.mxu2 %v7226_v58 }
 0x201   :  { %2837 = vmatmul.bf16.vlgmr.msrb.gmra.mxu1 %v7195_v37  ;;  %v5579_v37 = vld [vmem:[#allocation6 + $0x358] sm:$0xf0] }
 0x202   :  { %2867 = vmatpush.bf16.msrb.mxu3 %v5662_v2  ;;  %v5582_v35 = vor.u32 %v6604_v34, %v5579_v37  ;;  %v6651_v2 = vld [vmem:[#allocation7 + $0xc4] sm:$0xf]  ;;  %3708 = vmatpush.bf16.msra.mxu1 %v5890_v5  ;;  %v6677_v34 = vld [vmem:[#allocation7 + $0x18c] sm:$0xf0] }
 0x203   :  { %v6643_v37 = vld [vmem:[#allocation7 + $0x84] sm:$0xf] }
 0x205   :  { %v7282_v30 = vpop.f32.mrf.mxu0 }
 0x206   :  { %2868 = vmatpush.bf16.msrb.mxu3 %v5646_v8  ;;  %v5873_v8 = vld [vmem:[#allocation7 + $0x1a0] sm:$0xf] }
 0x20a   :  { %2869 = vmatpush.bf16.msrb.mxu3 %v5630_v4  ;;  %v5874_v4 = vor.u32 %v6681_v55, %v5873_v8  ;;  %v6687_v8 = vld [vmem:[#allocation7 + $0x1e4] sm:$0xf] }
 0x20c   :  { %3709 = vmatpush.bf16.msra.mxu1 %v5874_v4  ;;  %v5785_v4 = vld [vmem:[#allocation7 + $0xe8] sm:$0xf] }
 0x20d   :  { %v7289_v25 = vpop.f32.mrf.mxu0 }
 0x20e   :  { %2870 = vmatpush.bf16.msrb.mxu3 %v5614_v10  ;;  %v5750_v10 = vor.u32 %v6647_v33, %v5747_v17  ;;  %v5907_v33 = vld [vmem:[#allocation7 + $0x1f0] sm:$0xf0]  ;;  %v6658_v17 = vld [vmem:[#allocation7 + $0xf4] sm:$0xf0] }
 0x210   :  { %2728 = vmatmul.bf16.gmra.mxu3 %v7259_v56  ;;  %2785 = vmatmul.bf16.gmra.mxu2 %v7242_v53 }
 0x211   :  { %2842 = vmatmul.bf16.gmra.mxu1 %v7212_v42  ;;  %v5777_v42 = vld [vmem:[#allocation7 + $0xe0] sm:$0xf] }
 0x212   :  { %2871 = vmatpush.bf16.msrb.mxu3 %v5598_v24  ;;  %v5778_v43 = vor.u32 %v6657_v47, %v5777_v42  ;;  %v5857_v24 = vld [vmem:[#allocation7 + $0x180] sm:$0xf]  ;;  %v6639_v42 = vld [vmem:[#allocation7 + $0x64] sm:$0xf] }
 0x214   :  { %3688 = vmatpush.bf16.msra.mxu0 %v5778_v43  ;;  %v5715_v43 = vld [vmem:[#allocation7 + $0x70] sm:$0xf0] }
 0x215   :  { %v7295_v9 = vpop.f32.mrf.mxu0  ;;  %v5718_v3 = vor.u32 %v6639_v42, %v5715_v43  ;;  %v5891_v43 = vld [vmem:[#allocation7 + $0x1d0] sm:$0xf0] }
 0x216   :  { %2872 = vmatpush.bf16.msrb.mxu3 %v5582_v35  ;;  %v5858_v35 = vor.u32 %v6677_v34, %v5857_v24  ;;  %v5910_v34 = vor.u32 %v6687_v8, %v5907_v33  ;;  %v5721_v8 = vld [vmem:[#allocation7 + $0x68] sm:$0xf] }
 0x218   :  { %3689 = vmatpush.bf16.msra.mxu0 %v5762_v7  ;;  %3710 = vmatpush.bf16.msra.mxu1 %v5858_v35  ;;  %v2592_v7 = vadd.f32 %v7275_v21, %v7307_v45  ;;  %v2597_v35 = vadd.f32 %v7289_v25, %v7307_v45 }
 0x21a   :  { %2873 = vmatpush.bf16.msrb.mxu3 %v5566_v16  ;;  %v5734_v16 = vor.u32 %v6643_v37, %v5731_v52  ;;  %v5786_v37 = vor.u32 %v6658_v17, %v5785_v4  ;;  %v6017_v52 = vld [vmem:[#allocation7 + $0x2c0] sm:$0xf] }
 0x21c   :  { %3690 = vmatpush.bf16.msra.mxu0 %v5746_v46  ;;  %v6669_v46 = vld [vmem:[#allocation7 + $0x14c] sm:$0xf0] }
 0x21d   :  { %v7277_v59 = vpop.f32.mrf.mxu1  ;;  %v7311_v51 = vpop.f32.mrf.mxu0 }
 0x21e   :  { %2874 = vmatpush.bf16.msrb.mxu3 %v5550_v23  ;;  %v6673_v23 = vld [vmem:[#allocation7 + $0x16c] sm:$0xf0] }
 0x21f   :  { %v5842_v47 = vor.u32 %v6673_v23, %v5841_v18  ;;  %v6683_v18 = vld [vmem:[#allocation7 + $0x1c4] sm:$0xf]  ;;  %v2599_v23 = vadd.f32 %v7295_v9, %v7307_v45 }
 0x220   :  { %2799 = vmatmul.bf16.vlgmr.msra.gmra.mxu3 %v7251_v12  ;;  %2856 = vmatmul.bf16.vlgmr.msrb.gmra.mxu2 %v7226_v58  ;;  %v6645_v58 = vld [vmem:[#allocation7 + $0x8c] sm:$0xf0] }
 0x221   :  { %v5730_v41 = vor.u32 %v6645_v58, %v5729_v19  ;;  %3711 = vmatpush.bf16.msra.mxu1 %v5842_v47  ;;  %v6635_v19 = vld [vmem:[#allocation7 + $0x44] sm:$0xf]  ;;  %v2594_v58 = vadd.f32 %v7282_v30, %v7307_v45 }
 0x223   :  { %3691 = vmatpush.bf16.msra.mxu0 %v5730_v41  ;;  %v2611_v41 = vadd.f32 %v7277_v59, %v2592_v7  ;;  %v5810_v59 = vor.u32 %v6665_v1, %v5809_v31  ;;  %v6654_v7 = vld [vmem:[#allocation7 + $0xd4] sm:$0xf0] }
 0x225   :  { %v7284_v15 = vpop.f32.mrf.mxu1  ;;  %v7323_v0 = vpop.f32.mrf.mxu0 }
 0x226   :  { %v2613_v28 = vadd.f32 %v7284_v15, %v2594_v58  ;;  %v5793_v15 = vld [vmem:[#allocation7 + $0x100] sm:$0xf] }
 0x227   :  { %v6001_v58 = vld [vmem:[#allocation7 + $0x2a0] sm:$0xf] }
 0x22d   :  { %v7291_v54 = vpop.f32.mrf.mxu1 }
 0x22e   :  { %v2616_v42 = vadd.f32 %v7291_v54, %v2597_v35  ;;  %v5953_v35 = vld [vmem:[#allocation7 + $0x240] sm:$0xf] }
 0x230   :  { %2804 = vmatmul.bf16.gmra.mxu3 %v7259_v56  ;;  %2861 = vmatmul.bf16.gmra.mxu2 %v7242_v53  ;;  %v5713_v53 = vld [vmem:[#allocation7 + $0x60] sm:$0xf] }
 0x231   :  { %v5714_v40 = vor.u32 %v6641_v61, %v5713_v53  ;;  %v5826_v53 = vor.u32 %v6669_v46, %v5825_v13  ;;  %v5699_v61 = vld [vmem:[#allocation7 + $0x50] sm:$0xf0] }
 0x232   :  { %v5702_v14 = vor.u32 %v6635_v19, %v5699_v61  ;;  %v7339_v19 = vpop.f32.mrf.mxu0  ;;  %v5875_v61 = vld [vmem:[#allocation7 + $0x1b0] sm:$0xf0] }
 0x233   :  { %3692 = vmatpush.bf16.msra.mxu0 %v5714_v40  ;;  %3712 = vmatpush.bf16.msra.mxu1 %v5826_v53  ;;  %v6679_v53 = vld [vmem:[#allocation7 + $0x1a4] sm:$0xf] }
 0x235   :  { %v7302_v11 = vpop.f32.mrf.mxu1 }
 0x236   :  { %v2618_v13 = vadd.f32 %v7302_v11, %v2599_v23 }
 0x237   :  { %3693 = vmatpush.bf16.msra.mxu0 %v5698_v63  ;;  %3713 = vmatpush.bf16.msra.mxu1 %v5810_v59  ;;  %v6675_v59 = vld [vmem:[#allocation7 + $0x184] sm:$0xf] }
 0x23a   :  { %v7352_v33 = vpop.f32.mrf.mxu0 }
 0x23b   :  { %3694 = vmatpush.bf16.msra.mxu0 %v5682_v44  ;;  %v6631_v44 = vld [vmem:[#allocation7 + $0x24] sm:$0xf] }
 0x23d   :  { %v7316_v40 = vpop.f32.mrf.mxu1 }
 0x240   :  { %2875 = vmatmul.bf16.vlgmr.msrb.gmra.mxu3 %v7251_v12  ;;  %v5665_v12 = vld [vmem:[#allocation7] sm:$0xf] }
 0x241   :  { %v5666_v49 = vor.u32 %v6629_v29, %v5665_v12  ;;  %v5683_v29 = vld [vmem:[#allocation7 + $0x30] sm:$0xf0] }
 0x242   :  { %v5686_v22 = vor.u32 %v6631_v44, %v5683_v29 }
 0x243   :  { %v7280_v27 = vpop.f32.mrf.mxu2  ;;  %3695 = vmatpush.bf16.msra.mxu0 %v5666_v49 }
 0x244   :  { %v2630_v21 = vadd.f32 %v7280_v27, %v2611_v41  ;;  %v6627_v27 = vld [vmem:[#allocation7 + $0x4] sm:$0xf]  ;;  %v6713_v41 = vld [vmem:[#allocation7 + $0x2ac] sm:$0xf0] }
 0x245   :  { %v6002_v45 = vor.u32 %v6713_v41, %v6001_v58  ;;  %v6697_v58 = vld [vmem:[#allocation7 + $0x22c] sm:$0xf0] }
 0x247   :  { %3764 = vmatpush.bf16.msrb.mxu0 %v5782_v57  ;;  %v5794_v57 = vor.u32 %v6661_v48, %v5793_v15  ;;  %v6646_v48 = vld [vmem:[#allocation7 + $0x94] sm:$0xf0] }
 0x249   :  { %3714 = vmatpush.bf16.msra.mxu1 %v5794_v57  ;;  %v5969_v57 = vld [vmem:[#allocation7 + $0x260] sm:$0xf] }
 0x24b   :  { %v7286_v32 = vpop.f32.mrf.mxu2 }
 0x24c   :  { %v2632_v30 = vadd.f32 %v7286_v32, %v2613_v28  ;;  %v7327_v32 = vpop.f32.mrf.mxu1  ;;  %v6650_v28 = vld [vmem:[#allocation7 + $0xb4] sm:$0xf0] }
 0x24d   :  { %3783 = vmatpush.bf16.msrb.mxu1 %v5910_v34 }
 0x250   :  { %2880 = vmatmul.bf16.gmra.mxu3 %v7259_v56  ;;  %v5763_v56 = vld [vmem:[#allocation7 + $0xd0] sm:$0xf0] }
 0x251   :  { %v5766_v6 = vor.u32 %v6651_v2, %v5763_v56  ;;  %v5670_v2 = vor.u32 %v6627_v27, %v5667_v62  ;;  %v6033_v56 = vld [vmem:[#allocation7 + $0x2e0] sm:$0xf]  ;;  %v7347_v27 = vperm.slane %v7300_v36, 1  ;;  %v6705_v62 = vld [vmem:[#allocation7 + $0x26c] sm:$0xf0] }
 0x253   :  { %v7293_v60 = vpop.f32.mrf.mxu2  ;;  %3765 = vmatpush.bf16.msrb.mxu0 %v5766_v6  ;;  %v6721_v6 = vld [vmem:[#allocation7 + $0x2ec] sm:$0xf0]  ;;  %v2668_v34 = vadd.f32 %v7311_v51, %v7347_v27  ;;  %v6638_v51 = vld [vmem:[#allocation7 + $0x54] sm:$0xf0] }
 0x254   :  { %v6034_v55 = vor.u32 %v6721_v6, %v6033_v56  ;;  %v2635_v25 = vadd.f32 %v7293_v60, %v2616_v42  ;;  %v5878_v60 = vor.u32 %v6679_v53, %v5875_v61  ;;  %v5970_v56 = vor.u32 %v6705_v62, %v5969_v57  ;;  %v5843_v6 = vld [vmem:[#allocation7 + $0x170] sm:$0xf0]  ;;  %v6719_v57 = vld [vmem:[#allocation7 + $0x2e4] sm:$0xf] }
 0x255   :  { %v2687_v23 = vadd.f32 %v7316_v40, %v2668_v34  ;;  %v2673_v34 = vadd.f32 %v7339_v19, %v7347_v27  ;;  %v6686_v19 = vld [vmem:[#allocation7 + $0x1d4] sm:$0xf0] }
 0x256   :  { %3726 = vmatpush.bf16.msra.mxu2 %v6034_v55  ;;  %v6642_v55 = vld [vmem:[#allocation7 + $0x74] sm:$0xf0] }
 0x257   :  { %3766 = vmatpush.bf16.msrb.mxu0 %v5750_v10 }
 0x25b   :  { %v7304_v26 = vpop.f32.mrf.mxu2  ;;  %3767 = vmatpush.bf16.msrb.mxu0 %v5734_v16  ;;  %v6717_v16 = vld [vmem:[#allocation7 + $0x2cc] sm:$0xf0] }
 0x25c   :  { %v6018_v47 = vor.u32 %v6717_v16, %v6017_v52  ;;  %v2637_v9 = vadd.f32 %v7304_v26, %v2618_v13  ;;  %v6701_v52 = vld [vmem:[#allocation7 + $0x24c] sm:$0xf0]  ;;  %v6667_v16 = vld [vmem:[#allocation7 + $0x144] sm:$0xf] }
 0x25d   :  { %v5954_v42 = vor.u32 %v6701_v52, %v5953_v35  ;;  %v6145_v52 = vld [vmem:[#allocation7 + $0x3c0] sm:$0xf] }
 0x25e   :  { %3727 = vmatpush.bf16.msra.mxu2 %v6018_v47  ;;  %v5827_v47 = vld [vmem:[#allocation7 + $0x150] sm:$0xf0] }
 0x25f   :  { %3768 = vmatpush.bf16.msrb.mxu0 %v5718_v3  ;;  %v5894_v3 = vor.u32 %v6683_v18, %v5891_v43  ;;  %v2670_v18 = vadd.f32 %v7323_v0, %v7347_v27  ;;  %v5705_v43 = vld [vmem:[#allocation7 + $0x48] sm:$0xf]  ;;  %v6663_v0 = vld [vmem:[#allocation7 + $0x124] sm:$0xf] }
 0x261   :  { %3784 = vmatpush.bf16.msrb.mxu1 %v5894_v3  ;;  %v5830_v3 = vor.u32 %v6667_v16, %v5827_v47  ;;  %v6749_v16 = vld [vmem:[#allocation7 + $0x3cc] sm:$0xf0] }
 0x262   :  { %3728 = vmatpush.bf16.msra.mxu2 %v6002_v45  ;;  %v6634_v45 = vld [vmem:[#allocation7 + $0x34] sm:$0xf0]  ;;  %v6146_v47 = vor.u32 %v6749_v16, %v6145_v52  ;;  %v5849_v52 = vld [vmem:[#allocation7 + $0x168] sm:$0xf] }
 0x263   :  { %v2648_v20 = vpop.f32.mrf.mxu3  ;;  %v7320_v63 = vpop.f32.mrf.mxu2  ;;  %3769 = vmatpush.bf16.msrb.mxu0 %v5702_v14  ;;  %v5753_v14 = vld [vmem:[#allocation7 + $0xa8] sm:$0xf]  ;;  %v6674_v16 = vld [vmem:[#allocation7 + $0x174] sm:$0xf0] }
 0x264   :  { %v2649_v12 = vadd.f32 %v2648_v20, %v2630_v21  ;;  %v5769_v20 = vld [vmem:[#allocation7 + $0xc8] sm:$0xf]  ;;  %v7342_v21 = vpop.f32.mrf.mxu1  ;;  %v5754_v31 = vor.u32 %v6650_v28, %v5753_v14  ;;  %v2706_v13 = vadd.f32 %v7320_v63, %v2687_v23  ;;  %v7366_v63 = vpop.f32.mrf.mxu0  ;;  %v2675_v23 = vadd.f32 %v7352_v33, %v7347_v27  ;;  %v6129_v27 = vld [vmem:[#allocation7 + $0x3a0] sm:$0xf]  ;;  %v6745_v33 = vld [vmem:[#allocation7 + $0x3ac] sm:$0xf0] }
 0x265   :  { %v5770_v46 = vor.u32 %v6654_v7, %v5769_v20  ;;  %3785 = vmatpush.bf16.msrb.mxu1 %v5878_v60  ;;  %v2689_v7 = vadd.f32 %v7327_v32, %v2670_v18  ;;  %v6693_v60 = vld [vmem:[#allocation7 + $0x20c] sm:$0xf0]  ;;  %v6715_v18 = vld [vmem:[#allocation7 + $0x2c4] sm:$0xf] }
 0x266   :  { %v2886_v50 = vmax.f32 %v2649_v12, 0.0  ;;  %v6709_v12 = vld [vmem:[#allocation7 + $0x28c] sm:$0xf0] }
 0x267   :  { %3770 = vmatpush.bf16.msrb.mxu0 %v5686_v22  ;;  %v5859_v22 = vld [vmem:[#allocation7 + $0x190] sm:$0xf0] }
 0x268   :  { %v5862_v15 = vor.u32 %v6675_v59, %v5859_v22  ;;  %v5673_v59 = vld [vmem:[#allocation7 + $0x8] sm:$0xf] }
 0x26a   :  { %3786 = vmatpush.bf16.msrb.mxu1 %v5862_v15 }
 0x26b   :  { %v2650_v49 = vpop.f32.mrf.mxu3  ;;  %3771 = vmatpush.bf16.msrb.mxu0 %v5670_v2  ;;  %v7330_v10 = vpop.f32.mrf.mxu2  ;;  %v6671_v2 = vld [vmem:[#allocation7 + $0x164] sm:$0xf] }
 0x26c   :  { %v2651_v39 = vadd.f32 %v2650_v49, %v2632_v30  ;;  %v5985_v30 = vld [vmem:[#allocation7 + $0x280] sm:$0xf]  ;;  %v5846_v17 = vor.u32 %v6671_v2, %v5843_v6  ;;  %v2708_v40 = vadd.f32 %v7330_v10, %v2689_v7  ;;  %v6035_v2 = vld [vmem:[#allocation7 + $0x2f0] sm:$0xf0]  ;;  %v6690_v6 = vld [vmem:[#allocation7 + $0x1f4] sm:$0xf0] }
 0x26d   :  { %v5986_v49 = vor.u32 %v6709_v12, %v5985_v30  ;;  %v5795_v12 = vld [vmem:[#allocation7 + $0x110] sm:$0xf0] }
 0x26e   :  { %v2890_v38 = vmax.f32 %v2651_v39, 0.0  ;;  %v5737_v39 = vld [vmem:[#allocation7 + $0x88] sm:$0xf]  ;;  %3787 = vmatpush.bf16.msrb.mxu1 %v5846_v17  ;;  %v6656_v17 = vld [vmem:[#allocation7 + $0xec] sm:$0xf] }
 0x26f   :  { %3729 = vmatpush.bf16.msra.mxu2 %v5986_v49  ;;  %v6630_v49 = vld [vmem:[#allocation7 + $0x14] sm:$0xf0] }
 0x270   :  { %v7325_v5 = vpack.c.bf16 %v2890_v38, %v2886_v50  ;;  %v5738_v38 = vor.u32 %v6646_v48, %v5737_v39  ;;  %v5674_v39 = vor.u32 %v6630_v49, %v5673_v59  ;;  %v6161_v48 = vld [vmem:[#allocation7 + $0x3e0] sm:$0xf]  ;;  %v5987_v49 = vld [vmem:[#allocation7 + $0x290] sm:$0xf0] }
 0x272   :  { %3696 = vmatmul.bf16.vlgmr.msra.gmra.mxu0 %v7325_v5  ;;  %3788 = vmatpush.bf16.msrb.mxu1 %v5830_v3  ;;  %v5897_v3 = vld [vmem:[#allocation7 + $0x1c8] sm:$0xf] }
 0x273   :  { %v2653_v24 = vpop.f32.mrf.mxu3  ;;  %3840 = vmatpush.bf16.msra.mxu0 %v5786_v37  ;;  %v7344_v44 = vpop.f32.mrf.mxu2  ;;  %3730 = vmatpush.bf16.msra.mxu2 %v5970_v56  ;;  %v5913_v56 = vld [vmem:[#allocation7 + $0x1e8] sm:$0xf] }
 0x274   :  { %v2654_v54 = vadd.f32 %v2653_v24, %v2635_v25  ;;  %v5722_v24 = vor.u32 %v6642_v55, %v5721_v8  ;;  %v7356_v37 = vpop.f32.mrf.mxu1  ;;  %v5706_v25 = vor.u32 %v6638_v51, %v5705_v43  ;;  %v6038_v55 = vor.u32 %v6719_v57, %v6035_v2  ;;  %v6019_v43 = vld [vmem:[#allocation7 + $0x2d0] sm:$0xf0]  ;;  %v7381_v51 = vpop.f32.mrf.mxu0  ;;  %v6644_v57 = vld [vmem:[#allocation7 + $0x8c] sm:$0xf] }
 0x275   :  { %v6022_v7 = vor.u32 %v6715_v18, %v6019_v43  ;;  %v7391_v2 = vperm.slane %v7300_v36, 2  ;;  %v6640_v43 = vld [vmem:[#allocation7 + $0x6c] sm:$0xf] }
 0x276   :  { %v2894_v26 = vmax.f32 %v2654_v54, 0.0  ;;  %v5689_v54 = vld [vmem:[#allocation7 + $0x28] sm:$0xf] }
 0x277   :  { %3841 = vmatpush.bf16.msra.mxu0 %v5770_v46  ;;  %3731 = vmatpush.bf16.msra.mxu2 %v5954_v42  ;;  %v5937_v46 = vld [vmem:[#allocation7 + $0x220] sm:$0xf]  ;;  %v5690_v28 = vor.u32 %v6634_v45, %v5689_v54  ;;  %v2692_v42 = vadd.f32 %v7342_v21, %v2673_v34  ;;  %v5881_v54 = vld [vmem:[#allocation7 + $0x1a8] sm:$0xf] }
 0x278   :  { %v5938_v53 = vor.u32 %v6697_v58, %v5937_v46  ;;  %v2694_v46 = vadd.f32 %v7356_v37, %v2675_v23 }
 0x279   :  { %v2711_v58 = vadd.f32 %v7344_v44, %v2692_v42  ;;  %v6648_v44 = vld [vmem:[#allocation7 + $0xac] sm:$0xf] }
 0x27b   :  { %v2655_v11 = vpop.f32.mrf.mxu3  ;;  %3842 = vmatpush.bf16.msra.mxu0 %v5754_v31  ;;  %v7361_v20 = vpop.f32.mrf.mxu2  ;;  %3732 = vmatpush.bf16.msra.mxu2 %v5938_v53  ;;  %v6659_v31 = vld [vmem:[#allocation7 + $0x104] sm:$0xf] }
 0x27c   :  { %v2656_v1 = vadd.f32 %v2655_v11, %v2637_v9  ;;  %v5811_v9 = vld [vmem:[#allocation7 + $0x130] sm:$0xf0]  ;;  %v5921_v11 = vld [vmem:[#allocation7 + $0x200] sm:$0xf]  ;;  %v6711_v53 = vld [vmem:[#allocation7 + $0x2a4] sm:$0xf]  ;;  %v2713_v45 = vadd.f32 %v7361_v20, %v2694_v46 }
 0x27d   :  { %v5814_v14 = vor.u32 %v6663_v0, %v5811_v9  ;;  %v5922_v10 = vor.u32 %v6693_v60, %v5921_v11  ;;  %v5898_v0 = vor.u32 %v6686_v19, %v5897_v3  ;;  %v6003_v9 = vld [vmem:[#allocation7 + $0x2b0] sm:$0xf0]  ;;  %v5723_v3 = vld [vmem:[#allocation7 + $0x78] sm:$0xf0]  ;;  %v6733_v46 = vld [vmem:[#allocation7 + $0x34c] sm:$0xf0] }
 0x27e   :  { %v2898_v29 = vmax.f32 %v2656_v1, 0.0  ;;  %v6006_v37 = vor.u32 %v6711_v53, %v6003_v9  ;;  %v5726_v19 = vor.u32 %v6640_v43, %v5723_v3  ;;  %v6636_v9 = vld [vmem:[#allocation7 + $0x4c] sm:$0xf]  ;;  %v6163_v43 = vld [vmem:[#allocation7 + $0x3f0] sm:$0xf0] }
 0x27f   :  { %3843 = vmatpush.bf16.msra.mxu0 %v5738_v38  ;;  %3789 = vmatpush.bf16.msrb.mxu1 %v5814_v14  ;;  %v6753_v38 = vld [vmem:[#allocation7 + $0x3ec] sm:$0xf0]  ;;  %v6682_v14 = vld [vmem:[#allocation7 + $0x1b4] sm:$0xf0]  ;;  %v6041_v3 = vld [vmem:[#allocation7 + $0x2e8] sm:$0xf] }
 0x280   :  { %v7349_v50 = vpack.c.bf16 %v2898_v29, %v2894_v26  ;;  %v7368_v26 = vpop.f32.mrf.mxu1  ;;  %v5798_v29 = vor.u32 %v6659_v31, %v5795_v12  ;;  %3733 = vmatpush.bf16.msra.mxu2 %v5922_v10  ;;  %v6162_v62 = vor.u32 %v6753_v38, %v6161_v48  ;;  %v5882_v60 = vor.u32 %v6682_v14, %v5881_v54  ;;  %v6741_v10 = vld [vmem:[#allocation7 + $0x38c] sm:$0xf0]  ;;  %v6707_v12 = vld [vmem:[#allocation7 + $0x284] sm:$0xf]  ;;  %v6678_v38 = vld [vmem:[#allocation7 + $0x194] sm:$0xf0] }
 0x281   :  { %v5990_v48 = vor.u32 %v6707_v12, %v5987_v49  ;;  %v5707_v54 = vld [vmem:[#allocation7 + $0x58] sm:$0xf0]  ;;  %v6632_v12 = vld [vmem:[#allocation7 + $0x2c] sm:$0xf] }
 0x282   :  { %3701 = vmatmul.bf16.gmra.mxu0 %v7349_v50  ;;  %3745 = vmatpush.bf16.msra.mxu3 %v6162_v62  ;;  %v5739_v62 = vld [vmem:[#allocation7 + $0x98] sm:$0xf0]  ;;  %v5710_v14 = vor.u32 %v6636_v9, %v5707_v54 }
 0x283   :  { %v2724_v4 = vpop.f32.mrf.mxu3  ;;  %3844 = vmatpush.bf16.msra.mxu0 %v5722_v24  ;;  %v7372_v15 = vpop.f32.mrf.mxu2  ;;  %3790 = vmatpush.bf16.msrb.mxu1 %v5798_v29  ;;  %v5787_v24 = vld [vmem:[#allocation7 + $0xf8] sm:$0xf0] }
 0x284   :  { %v2725_v41 = vadd.f32 %v2724_v4, %v2706_v13  ;;  %v5914_v4 = vor.u32 %v6690_v6, %v5913_v56  ;;  %v5790_v35 = vor.u32 %v6656_v17, %v5787_v24  ;;  %3802 = vmatpush.bf16.msrb.mxu2 %v6038_v55  ;;  %v6652_v13 = vld [vmem:[#allocation7 + $0xcc] sm:$0xf]  ;;  %v7395_v55 = vpop.f32.mrf.mxu0  ;;  %v6737_v17 = vld [vmem:[#allocation7 + $0x36c] sm:$0xf0]  ;;  %v6703_v24 = vld [vmem:[#allocation7 + $0x264] sm:$0xf] }
 0x286   :  { %v2887_v1 = vmax.f32 %v2725_v41, 0.0  ;;  %3746 = vmatpush.bf16.msra.mxu3 %v6146_v47  ;;  %v6130_v41 = vor.u32 %v6745_v33, %v6129_v27  ;;  %v5850_v47 = vor.u32 %v6674_v16, %v5849_v52  ;;  %v5955_v33 = vld [vmem:[#allocation7 + $0x250] sm:$0xf0]  ;;  %v5675_v52 = vld [vmem:[#allocation7 + $0x18] sm:$0xf0] }
 0x287   :  { %3845 = vmatpush.bf16.msra.mxu0 %v5706_v25  ;;  %v5771_v25 = vld [vmem:[#allocation7 + $0xd8] sm:$0xf0] }
 0x288   :  { %v7385_v21 = vpop.f32.mrf.mxu1  ;;  %3803 = vmatpush.bf16.msrb.mxu2 %v6022_v7  ;;  %v2744_v7 = vadd.f32 %v7366_v63, %v7391_v2  ;;  %v6670_v63 = vld [vmem:[#allocation7 + $0x154] sm:$0xf0] }
 0x28a   :  { %3747 = vmatpush.bf16.msra.mxu3 %v6130_v41  ;;  %v5833_v41 = vld [vmem:[#allocation7 + $0x148] sm:$0xf] }
 0x28b   :  { %v2726_v61 = vpop.f32.mrf.mxu3  ;;  %3846 = vmatpush.bf16.msra.mxu0 %v5690_v28  ;;  %v5755_v28 = vld [vmem:[#allocation7 + $0xb8] sm:$0xf0] }
 0x28c   :  { %v2727_v32 = vadd.f32 %v2726_v61, %v2708_v40  ;;  %v5774_v40 = vor.u32 %v6652_v13, %v5771_v25  ;;  %v5758_v31 = vor.u32 %v6648_v44, %v5755_v28  ;;  %3804 = vmatpush.bf16.msrb.mxu2 %v6006_v37  ;;  %v6081_v25 = vld [vmem:[#allocation7 + $0x340] sm:$0xf]  ;;  %v5834_v37 = vor.u32 %v6670_v63, %v5833_v41  ;;  %v6695_v28 = vld [vmem:[#allocation7 + $0x224] sm:$0xf]  ;;  %v6025_v63 = vld [vmem:[#allocation7 + $0x2c8] sm:$0xf] }
 0x28d   :  { %v6082_v27 = vor.u32 %v6733_v46, %v6081_v25  ;;  %v6065_v44 = vld [vmem:[#allocation7 + $0x320] sm:$0xf]  ;;  %v6688_v25 = vld [vmem:[#allocation7 + $0x1ec] sm:$0xf]  ;;  %v5915_v46 = vld [vmem:[#allocation7 + $0x1f8] sm:$0xf0] }
 0x28e   :  { %v2891_v30 = vmax.f32 %v2727_v32, 0.0  ;;  %v7388_v32 = vpop.f32.mrf.mxu2  ;;  %v6747_v41 = vld [vmem:[#allocation7 + $0x3c4] sm:$0xf] }
 0x28f   :  { %3847 = vmatpush.bf16.msra.mxu0 %v5674_v39  ;;  %v5865_v39 = vld [vmem:[#allocation7 + $0x188] sm:$0xf] }
 0x290   :  { %v7370_v22 = vpack.c.bf16 %v2891_v30, %v2887_v1  ;;  %v6113_v30 = vld [vmem:[#allocation7 + $0x380] sm:$0xf]  ;;  %v5866_v6 = vor.u32 %v6678_v38, %v5865_v39  ;;  %3805 = vmatpush.bf16.msrb.mxu2 %v5990_v48  ;;  %v7399_v18 = vpop.f32.mrf.mxu1  ;;  %v6725_v38 = vld [vmem:[#allocation7 + $0x30c] sm:$0xf0] }
 0x291   :  { %v6114_v29 = vor.u32 %v6741_v10, %v6113_v30  ;;  %v6666_v10 = vld [vmem:[#allocation7 + $0x134] sm:$0xf0]  ;;  %v6049_v48 = vld [vmem:[#allocation7 + $0x300] sm:$0xf] }
 0x292   :  { %3715 = vmatmul.bf16.vlgmr.msra.gmra.mxu1 %v7370_v22  ;;  %3772 = vmatmul.bf16.vlgmr.msrb.gmra.mxu0 %v7325_v5 }
 0x293   :  { %v2729_v8 = vpop.f32.mrf.mxu3  ;;  %3859 = vmatpush.bf16.msra.mxu1 %v5914_v4  ;;  %3916 = vmatpush.bf16.msrb.mxu0 %v5790_v35  ;;  %v6097_v4 = vld [vmem:[#allocation7 + $0x360] sm:$0xf]  ;;  %v5971_v35 = vld [vmem:[#allocation7 + $0x270] sm:$0xf0] }
 0x294   :  { %v2730_v61 = vadd.f32 %v2729_v8, %v2711_v58  ;;  %3748 = vmatpush.bf16.msra.mxu3 %v6114_v29  ;;  %v5742_v8 = vor.u32 %v6644_v57, %v5739_v62  ;;  %v6098_v34 = vor.u32 %v6737_v17, %v6097_v4  ;;  %v5974_v42 = vor.u32 %v6703_v24, %v5971_v35  ;;  %v6699_v58 = vld [vmem:[#allocation7 + $0x244] sm:$0xf]  ;;  %v5801_v4 = vld [vmem:[#allocation7 + $0x108] sm:$0xf]  ;;  %v6628_v35 = vld [vmem:[#allocation7 + $0xc] sm:$0xf] }
 0x295   :  { %v5958_v53 = vor.u32 %v6699_v58, %v5955_v33  ;;  %v6691_v57 = vld [vmem:[#allocation7 + $0x204] sm:$0xf] }
 0x296   :  { %v2895_v59 = vmax.f32 %v2730_v61, 0.0  ;;  %v7403_v13 = vpop.f32.mrf.mxu2  ;;  %3806 = vmatpush.bf16.msrb.mxu2 %v5974_v42  ;;  %v5678_v42 = vor.u32 %v6628_v35, %v5675_v52  ;;  %v6735_v52 = vld [vmem:[#allocation7 + $0x364] sm:$0xf] }
 0x297   :  { %3860 = vmatpush.bf16.msra.mxu1 %v5898_v0  ;;  %3917 = vmatpush.bf16.msrb.mxu0 %v5774_v40  ;;  %v2746_v0 = vadd.f32 %v7381_v51, %v7391_v2  ;;  %v2763_v40 = vadd.f32 %v7368_v26, %v2744_v7  ;;  %v6729_v51 = vld [vmem:[#allocation7 + $0x32c] sm:$0xf0] }
 0x298   :  { %3749 = vmatpush.bf16.msra.mxu3 %v6098_v34  ;;  %v6066_v26 = vor.u32 %v6729_v51, %v6065_v44  ;;  %v2769_v39 = vpop.f32.mrf.mxu1  ;;  %v6662_v34 = vld [vmem:[#allocation7 + $0x114] sm:$0xf0]  ;;  %v6743_v51 = vld [vmem:[#allocation7 + $0x3a4] sm:$0xf] }
 0x299   :  { %v2782_v61 = vadd.f32 %v7372_v15, %v2763_v40  ;;  %v5918_v40 = vor.u32 %v6688_v25, %v5915_v46 }
 0x29a   :  { %3807 = vmatpush.bf16.msrb.mxu2 %v5958_v53  ;;  %v6147_v53 = vld [vmem:[#allocation7 + $0x3d0] sm:$0xf0] }
 0x29b   :  { %v2731_v11 = vpop.f32.mrf.mxu3  ;;  %3861 = vmatpush.bf16.msra.mxu1 %v5882_v60  ;;  %3918 = vmatpush.bf16.msrb.mxu0 %v5758_v31  ;;  %v5817_v60 = vld [vmem:[#allocation7 + $0x128] sm:$0xf] }
 0x29c   :  { %v2732_v1 = vadd.f32 %v2731_v11, %v2713_v45  ;;  %v2765_v45 = vadd.f32 %v7385_v21, %v2746_v0  ;;  %3750 = vmatpush.bf16.msra.mxu3 %v6082_v27  ;;  %v5939_v11 = vld [vmem:[#allocation7 + $0x230] sm:$0xf0]  ;;  %v2750_v21 = vpop.f32.mrf.mxu0  ;;  %v5818_v15 = vor.u32 %v6666_v10, %v5817_v60  ;;  %v2749_v27 = vadd.f32 %v7395_v55, %v7391_v2  ;;  %v5899_v55 = vld [vmem:[#allocation7 + $0x1d8] sm:$0xf0] }
 0x29d   :  { %v5942_v30 = vor.u32 %v6695_v28, %v5939_v11  ;;  %v2751_v9 = vadd.f32 %v2750_v21, %v7391_v2  ;;  %v6009_v2 = vld [vmem:[#allocation7 + $0x2a8] sm:$0xf]  ;;  %v5883_v21 = vld [vmem:[#allocation7 + $0x1b8] sm:$0xf0] }
 0x29e   :  { %v2899_v20 = vmax.f32 %v2732_v1, 0.0  ;;  %v2784_v31 = vadd.f32 %v7388_v32, %v2765_v45  ;;  %v2788_v17 = vpop.f32.mrf.mxu2  ;;  %v2768_v54 = vadd.f32 %v7399_v18, %v2749_v27  ;;  %v6150_v45 = vor.u32 %v6747_v41, %v6147_v53  ;;  %v6714_v18 = vld [vmem:[#allocation7 + $0x2b4] sm:$0xf0] }
 0x29f   :  { %3862 = vmatpush.bf16.msra.mxu1 %v5866_v6  ;;  %3919 = vmatpush.bf16.msrb.mxu0 %v5742_v8  ;;  %v6050_v6 = vor.u32 %v6725_v38, %v6049_v48  ;;  %v5923_v8 = vld [vmem:[#allocation7 + $0x210] sm:$0xf0]  ;;  %v2770_v28 = vadd.f32 %v2769_v39, %v2751_v9  ;;  %v5993_v39 = vld [vmem:[#allocation7 + $0x288] sm:$0xf]  ;;  %v6702_v53 = vld [vmem:[#allocation7 + $0x254] sm:$0xf0] }
 0x2a0   :  { %v7393_v56 = vpack.c.bf16 %v2899_v20, %v2895_v59  ;;  %v5691_v59 = vld [vmem:[#allocation7 + $0x38] sm:$0xf0]  ;;  %3751 = vmatpush.bf16.msra.mxu3 %v6066_v26  ;;  %3808 = vmatpush.bf16.msrb.mxu2 %v5942_v30  ;;  %v5926_v24 = vor.u32 %v6691_v57, %v5923_v8  ;;  %v6131_v26 = vld [vmem:[#allocation7 + $0x3b0] sm:$0xf0]  ;;  %v2787_v11 = vadd.f32 %v7403_v13, %v2768_v54  ;;  %v6680_v30 = vld [vmem:[#allocation7 + $0x1ac] sm:$0xf] }
 0x2a1   :  { %v5694_v29 = vor.u32 %v6632_v12, %v5691_v59  ;;  %v2789_v10 = vadd.f32 %v2788_v17, %v2770_v28  ;;  %v6010_v59 = vor.u32 %v6714_v18, %v6009_v2  ;;  %v6739_v13 = vld [vmem:[#allocation7 + $0x384] sm:$0xf]  ;;  %v7428_v17 = vperm.slane %v7300_v36, 3  ;;  %v5835_v9 = vld [vmem:[#allocation7 + $0x158] sm:$0xf0] }
 0x2a2   :  { %3720 = vmatmul.bf16.gmra.mxu1 %v7393_v56  ;;  %3777 = vmatmul.bf16.gmra.mxu0 %v7349_v50 }
 0x2a3   :  { %v2800_v23 = vpop.f32.mrf.mxu3  ;;  %3863 = vmatpush.bf16.msra.mxu1 %v5850_v47  ;;  %3920 = vmatpush.bf16.msrb.mxu0 %v5726_v19  ;;  %v6751_v47 = vld [vmem:[#allocation7 + $0x3e4] sm:$0xf]  ;;  %v6722_v19 = vld [vmem:[#allocation7 + $0x2f4] sm:$0xf0] }
 0x2a4   :  { %v2801_v1 = vadd.f32 %v2800_v23, %v2782_v61  ;;  %3752 = vmatpush.bf16.msra.mxu3 %v6050_v6  ;;  %v5802_v23 = vor.u32 %v6662_v34, %v5801_v4  ;;  %3809 = vmatpush.bf16.msrb.mxu2 %v5926_v24  ;;  %v6166_v7 = vor.u32 %v6751_v47, %v6163_v43  ;;  %v7418_v33 = vpop.f32.mrf.mxu0  ;;  %v6718_v61 = vld [vmem:[#allocation7 + $0x2d4] sm:$0xf0]  ;;  %v5867_v4 = vld [vmem:[#allocation7 + $0x198] sm:$0xf0] }
 0x2a5   :  { %v6042_v0 = vor.u32 %v6722_v19, %v6041_v3  ;;  %v6026_v44 = vor.u32 %v6718_v61, %v6025_v63  ;;  %v6706_v43 = vld [vmem:[#allocation7 + $0x274] sm:$0xf0]  ;;  %v6672_v3 = vld [vmem:[#allocation7 + $0x16c] sm:$0xf]  ;;  %v2820_v27 = vadd.f32 %v7418_v33, %v7428_v17  ;;  %v6067_v61 = vld [vmem:[#allocation7 + $0x330] sm:$0xf0] }
 0x2a6   :  { %v2888_v62 = vmax.f32 %v2801_v1, 0.0  ;;  %v7425_v1 = vpop.f32.mrf.mxu2  ;;  %v6668_v63 = vld [vmem:[#allocation7 + $0x14c] sm:$0xf] }
 0x2a7   :  { %3864 = vmatpush.bf16.msra.mxu1 %v5834_v37  ;;  %3921 = vmatpush.bf16.msrb.mxu0 %v5710_v14  ;;  %v6684_v37 = vld [vmem:[#allocation7 + $0x1cc] sm:$0xf]  ;;  %v7422_v14 = vpop.f32.mrf.mxu1 }
 0x2a8   :  { %3821 = vmatpush.bf16.msrb.mxu3 %v6166_v7  ;;  %v5902_v60 = vor.u32 %v6684_v37, %v5899_v55  ;;  %v5851_v7 = vld [vmem:[#allocation7 + $0x178] sm:$0xf0]  ;;  %v5945_v55 = vld [vmem:[#allocation7 + $0x228] sm:$0xf] }
 0x2a9   :  { %v5854_v46 = vor.u32 %v6672_v3, %v5851_v7  ;;  %v6750_v3 = vld [vmem:[#allocation7 + $0x3d4] sm:$0xf0] }
 0x2ab   :  { %v2802_v20 = vpop.f32.mrf.mxu3  ;;  %3865 = vmatpush.bf16.msra.mxu1 %v5818_v15  ;;  %3922 = vmatpush.bf16.msrb.mxu0 %v5694_v29  ;;  %v5886_v15 = vor.u32 %v6680_v30, %v5883_v21  ;;  %v6723_v30 = vld [vmem:[#allocation7 + $0x304] sm:$0xf] }
 0x2ac   :  { %v2803_v49 = vadd.f32 %v2802_v20, %v2784_v31  ;;  %3822 = vmatpush.bf16.msrb.mxu3 %v6150_v45  ;;  %v6134_v31 = vor.u32 %v6743_v51, %v6131_v26  ;;  %v2821_v6 = vpop.f32.mrf.mxu0  ;;  %v6727_v45 = vld [vmem:[#allocation7 + $0x324] sm:$0xf]  ;;  %v6698_v51 = vld [vmem:[#allocation7 + $0x234] sm:$0xf0]  ;;  %v5838_v26 = vor.u32 %v6668_v63, %v5835_v9  ;;  %v6712_v9 = vld [vmem:[#allocation7 + $0x2ac] sm:$0xf] }
 0x2ad   :  { %v2822_v37 = vadd.f32 %v2821_v6, %v7428_v17  ;;  %v5946_v18 = vor.u32 %v6698_v51, %v5945_v55  ;;  %v6746_v63 = vld [vmem:[#allocation7 + $0x3b4] sm:$0xf0] }
 0x2ae   :  { %v2892_v32 = vmax.f32 %v2803_v49, 0.0  ;;  %v6115_v49 = vld [vmem:[#allocation7 + $0x390] sm:$0xf0]  ;;  %v2859_v19 = vpop.f32.mrf.mxu2 }
 0x2af   :  { %3866 = vmatpush.bf16.msra.mxu1 %v5802_v23  ;;  %3923 = vmatpush.bf16.msrb.mxu0 %v5678_v42  ;;  %v6118_v57 = vor.u32 %v6739_v13, %v6115_v49  ;;  %v2840_v35 = vpop.f32.mrf.mxu1  ;;  %v6099_v23 = vld [vmem:[#allocation7 + $0x370] sm:$0xf0]  ;;  %v5977_v42 = vld [vmem:[#allocation7 + $0x268] sm:$0xf]  ;;  %v6694_v49 = vld [vmem:[#allocation7 + $0x214] sm:$0xf0] }
 0x2b0   :  { %v7411_v16 = vpack.c.bf16 %v2892_v32, %v2888_v62  ;;  %3823 = vmatpush.bf16.msrb.mxu3 %v6134_v31  ;;  %v6710_v62 = vld [vmem:[#allocation7 + $0x294] sm:$0xf0]  ;;  %v6676_v32 = vld [vmem:[#allocation7 + $0x18c] sm:$0xf]  ;;  %v6102_v47 = vor.u32 %v6735_v52, %v6099_v23  ;;  %v5978_v25 = vor.u32 %v6706_v43, %v5977_v42  ;;  %v2841_v28 = vadd.f32 %v2840_v35, %v2822_v37  ;;  %v5819_v31 = vld [vmem:[#allocation7 + $0x138] sm:$0xf0] }
 0x2b1   :  { %v5994_v8 = vor.u32 %v6710_v62, %v5993_v39  ;;  %v5870_v34 = vor.u32 %v6676_v32, %v5867_v4  ;;  %v6660_v39 = vld [vmem:[#allocation7 + $0x10c] sm:$0xf]  ;;  %v5803_v62 = vld [vmem:[#allocation7 + $0x118] sm:$0xf0]  ;;  %v6754_v4 = vld [vmem:[#allocation7 + $0x3f4] sm:$0xf0] }
 0x2b2   :  { %3734 = vmatmul.bf16.vlgmr.msra.gmra.mxu2 %v7411_v16  ;;  %3791 = vmatmul.bf16.vlgmr.msrb.gmra.mxu1 %v7370_v22  ;;  %v5806_v6 = vor.u32 %v6660_v39, %v5803_v62  ;;  %v6043_v52 = vld [vmem:[#allocation7 + $0x2f8] sm:$0xf0]  ;;  %v6153_v43 = vld [vmem:[#allocation7 + $0x3c8] sm:$0xf]  ;;  %v6742_v37 = vld [vmem:[#allocation7 + $0x394] sm:$0xf0] }
 0x2b3   :  { %3848 = vmatmul.bf16.vlgmr.msra.gmra.mxu0 %v7325_v5  ;;  %v2805_v58 = vpop.f32.mrf.mxu3  ;;  %3878 = vmatpush.bf16.msra.mxu2 %v6042_v0  ;;  %v6083_v0 = vld [vmem:[#allocation7 + $0x350] sm:$0xf0]  ;;  %v6073_v39 = vld [vmem:[#allocation7 + $0x328] sm:$0xf]  ;;  %v5947_v62 = vld [vmem:[#allocation7 + $0x238] sm:$0xf0] }
 0x2b4   :  { %3935 = vmatpush.bf16.msrb.mxu1 %v5918_v40  ;;  %v2806_v12 = vadd.f32 %v2805_v58, %v2787_v11  ;;  %3824 = vmatpush.bf16.msrb.mxu3 %v6118_v57  ;;  %v6731_v58 = vld [vmem:[#allocation7 + $0x344] sm:$0xf]  ;;  %v5961_v40 = vld [vmem:[#allocation7 + $0x248] sm:$0xf]  ;;  %v6070_v11 = vor.u32 %v6727_v45, %v6067_v61  ;;  %v2824_v2 = vpop.f32.mrf.mxu0  ;;  %v6011_v45 = vld [vmem:[#allocation7 + $0x2b8] sm:$0xf0] }
 0x2b5   :  { %v6086_v41 = vor.u32 %v6731_v58, %v6083_v0  ;;  %v5962_v54 = vor.u32 %v6702_v53, %v5961_v40  ;;  %v2825_v7 = vadd.f32 %v2824_v2, %v7428_v17  ;;  %v6137_v53 = vld [vmem:[#allocation7 + $0x3a8] sm:$0xf]  ;;  %v6014_v51 = vor.u32 %v6712_v9, %v6011_v45  ;;  %v6075_v9 = vld [vmem:[#allocation7 + $0x338] sm:$0xf0]  ;;  %v6724_v45 = vld [vmem:[#allocation7 + $0x30c] sm:$0xf] }
 0x2b6   :  { %v2896_v48 = vmax.f32 %v2806_v12, 0.0  ;;  %v2860_v12 = vadd.f32 %v2859_v19, %v2841_v28  ;;  %v2862_v13 = vpop.f32.mrf.mxu2  ;;  %v6154_v19 = vor.u32 %v6750_v3, %v6153_v43  ;;  %v6121_v61 = vld [vmem:[#allocation7 + $0x388] sm:$0xf]  ;;  %v6748_v43 = vld [vmem:[#allocation7 + $0x3cc] sm:$0xf] }
 0x2b7   :  { %3879 = vmatpush.bf16.msra.mxu2 %v6026_v44  ;;  %v2839_v44 = vadd.f32 %v7422_v14, %v2820_v27  ;;  %v2843_v21 = vpop.f32.mrf.mxu1  ;;  %v6155_v3 = vld [vmem:[#allocation7 + $0x3d8] sm:$0xf0] }
 0x2b8   :  { %3936 = vmatpush.bf16.msrb.mxu1 %v5902_v60  ;;  %3825 = vmatpush.bf16.msrb.mxu3 %v6102_v47  ;;  %v6664_v60 = vld [vmem:[#allocation7 + $0x12c] sm:$0xf]  ;;  %v2844_v0 = vadd.f32 %v2843_v21, %v2825_v7  ;;  %v5979_v21 = vld [vmem:[#allocation7 + $0x278] sm:$0xf0]  ;;  %v6158_v7 = vor.u32 %v6748_v43, %v6155_v3  ;;  %v6763_v3 = vld [vmem:[#allocation9 + $0x40] sm:$0xff] }
 0x2b9   :  { %v2858_v33 = vadd.f32 %v7425_v1, %v2839_v44  ;;  %v5929_v1 = vld [vmem:[#allocation7 + $0x208] sm:$0xf] }
 0x2ba   :  { %v5930_v57 = vor.u32 %v6694_v49, %v5929_v1  ;;  %v5963_v1 = vld [vmem:[#allocation7 + $0x258] sm:$0xf0] }
 0x2bb   :  { %v2807_v20 = vpop.f32.mrf.mxu3  ;;  %3880 = vmatpush.bf16.msra.mxu2 %v6010_v59 }
 0x2bc   :  { %v2808_v29 = vadd.f32 %v2807_v20, %v2789_v10  ;;  %3937 = vmatpush.bf16.msrb.mxu1 %v5886_v15  ;;  %3826 = vmatpush.bf16.msrb.mxu3 %v6086_v41  ;;  %v6051_v10 = vld [vmem:[#allocation7 + $0x310] sm:$0xf0]  ;;  %v5822_v20 = vor.u32 %v6664_v60, %v5819_v31  ;;  %v2826_v23 = vpop.f32.mrf.mxu0 }
 0x2bd   :  { %v2827_v58 = vadd.f32 %v2826_v23, %v7428_v17  ;;  %v6122_v17 = vor.u32 %v6742_v37, %v6121_v61  ;;  %v6752_v23 = vld [vmem:[#allocation7 + $0x3ec] sm:$0xf]  ;;  %v6059_v61 = vld [vmem:[#allocation7 + $0x318] sm:$0xf0] }
 0x2be   :  { %v2900_v38 = vmax.f32 %v2808_v29, 0.0  ;;  %v6054_v29 = vor.u32 %v6723_v30, %v6051_v10  ;;  %v2864_v27 = vpop.f32.mrf.mxu2  ;;  %v6105_v30 = vld [vmem:[#allocation7 + $0x368] sm:$0xf]  ;;  %v6738_v10 = vld [vmem:[#allocation7 + $0x374] sm:$0xf0]  ;;  %v6062_v37 = vor.u32 %v6724_v45, %v6059_v61 }
 0x2bf   :  { %3881 = vmatpush.bf16.msra.mxu2 %v5994_v8  ;;  %v6169_v8 = vld [vmem:[#allocation7 + $0x3e8] sm:$0xf] }
 0x2c0   :  { %v7430_v24 = vpack.c.bf16 %v2900_v38, %v2896_v48  ;;  %3938 = vmatpush.bf16.msrb.mxu1 %v5870_v34  ;;  %3827 = vmatpush.bf16.msrb.mxu3 %v6070_v11  ;;  %v6720_v34 = vld [vmem:[#allocation7 + $0x2ec] sm:$0xf]  ;;  %v6170_v35 = vor.u32 %v6754_v4, %v6169_v8  ;;  %v5995_v11 = vld [vmem:[#allocation7 + $0x298] sm:$0xf0]  ;;  %v6726_v8 = vld [vmem:[#allocation7 + $0x314] sm:$0xf0] }
 0x2c1   :  { %v6046_v47 = vor.u32 %v6720_v34, %v6043_v52  ;;  %v6692_v34 = vld [vmem:[#allocation7 + $0x20c] sm:$0xf] }
 0x2c2   :  { %3739 = vmatmul.bf16.gmra.mxu2 %v7430_v24  ;;  %3796 = vmatmul.bf16.gmra.mxu1 %v7393_v56 }
 0x2c3   :  { %3853 = vmatmul.bf16.gmra.mxu0 %v7349_v50  ;;  %v2876_v36 = vpop.f32.mrf.mxu3  ;;  %3882 = vmatpush.bf16.msra.mxu2 %v5978_v25  ;;  %v6716_v25 = vld [vmem:[#allocation7 + $0x2cc] sm:$0xf] }
 0x2c4   :  { %3939 = vmatpush.bf16.msrb.mxu1 %v5854_v46  ;;  %v2877_v59 = vadd.f32 %v2876_v36, %v2858_v33  ;;  %3828 = vmatpush.bf16.msrb.mxu3 %v6054_v29  ;;  %v2845_v36 = vpop.f32.mrf.mxu1  ;;  %v6027_v46 = vld [vmem:[#allocation7 + $0x2d8] sm:$0xf0]  ;;  %v6708_v33 = vld [vmem:[#allocation7 + $0x28c] sm:$0xf] }
 0x2c5   :  { %v6030_v40 = vor.u32 %v6716_v25, %v6027_v46  ;;  %v2846_v41 = vadd.f32 %v2845_v36, %v2827_v58  ;;  %v5998_v2 = vor.u32 %v6708_v33, %v5995_v11  ;;  %v6139_v36 = vld [vmem:[#allocation7 + $0x3b8] sm:$0xf0]  ;;  %v6740_v46 = vld [vmem:[#allocation7 + $0x38c] sm:$0xf] }
 0x2c6   :  { %v2889_v48 = vmax.f32 %v2877_v59, 0.0  ;;  %v6106_v59 = vor.u32 %v6738_v10, %v6105_v30  ;;  %v6123_v58 = vld [vmem:[#allocation7 + $0x398] sm:$0xf0] }
 0x2c7   :  { %3883 = vmatpush.bf16.msra.mxu2 %v5962_v54  ;;  %v6138_v54 = vor.u32 %v6746_v63, %v6137_v53  ;;  %v2865_v44 = vadd.f32 %v2864_v27, %v2846_v41  ;;  %v6107_v27 = vld [vmem:[#allocation7 + $0x378] sm:$0xf0]  ;;  %v6728_v63 = vld [vmem:[#allocation7 + $0x32c] sm:$0xf] }
 0x2c8   :  { %3940 = vmatpush.bf16.msrb.mxu1 %v5838_v26  ;;  %v6770_v10 = vld [vmem:[#allocation9 + $0x78] sm:$0xff] }
 0x2cb   :  { %v2878_v14 = vpop.f32.mrf.mxu3  ;;  %3884 = vmatpush.bf16.msra.mxu2 %v5946_v18 }
 0x2cc   :  { %v2879_v15 = vadd.f32 %v2878_v14, %v2860_v12  ;;  %3941 = vmatpush.bf16.msrb.mxu1 %v5822_v20  ;;  %v6704_v12 = vld [vmem:[#allocation7 + $0x26c] sm:$0xf]  ;;  %v6089_v20 = vld [vmem:[#allocation7 + $0x348] sm:$0xf] }
 0x2cd   :  { %v5982_v14 = vor.u32 %v6704_v12, %v5979_v21  ;;  %v6768_v21 = vld [vmem:[#allocation9 + $0x68] sm:$0xff] }
 0x2ce   :  { %v2893_v38 = vmax.f32 %v2879_v15, 0.0  ;;  %v6734_v15 = vld [vmem:[#allocation7 + $0x354] sm:$0xf0] }
 0x2cf   :  { %3885 = vmatpush.bf16.msra.mxu2 %v5930_v57  ;;  %v6090_v29 = vor.u32 %v6734_v15, %v6089_v20  ;;  %v7469_v20 = vld [vmem:[%s7496_s6 + $0xc] sm:$0xf] }
 0x2d0   :  { %v7440_v32 = vpack.c.bf16 %v2893_v38, %v2889_v48  ;;  %3942 = vmatpush.bf16.msrb.mxu1 %v5806_v6  ;;  %v6730_v48 = vld [vmem:[#allocation7 + $0x334] sm:$0xf0]  ;;  %v6696_v38 = vld [vmem:[#allocation7 + $0x22c] sm:$0xf]  ;;  %v6057_v6 = vld [vmem:[#allocation7 + $0x308] sm:$0xf] }
 0x2d1   :  { %v6074_v57 = vor.u32 %v6730_v48, %v6073_v39  ;;  %v5950_v4 = vor.u32 %v6696_v38, %v5947_v62  ;;  %v6765_v62 = vld [vmem:[#allocation9 + $0x50] sm:$0xff] }
 0x2d2   :  { %3753 = vmatmul.bf16.vlgmr.msra.gmra.mxu3 %v7440_v32  ;;  %3810 = vmatmul.bf16.vlgmr.msrb.gmra.mxu2 %v7411_v16 }
 0x2d3   :  { %3867 = vmatmul.bf16.vlgmr.msra.gmra.mxu1 %v7370_v22  ;;  %3924 = vmatmul.bf16.vlgmr.msrb.gmra.mxu0 %v7325_v5  ;;  %v2881_v42 = vpop.f32.mrf.mxu3  ;;  %v2863_v5 = vadd.f32 %v2862_v13, %v2844_v0  ;;  %v6700_v13 = vld [vmem:[#allocation7 + $0x24c] sm:$0xf]  ;;  %v6126_v0 = vor.u32 %v6740_v46, %v6123_v58 }
 0x2d4   :  { %3897 = vmatpush.bf16.msra.mxu3 %v6170_v35  ;;  %3954 = vmatpush.bf16.msrb.mxu2 %v6046_v47  ;;  %v5966_v49 = vor.u32 %v6700_v13, %v5963_v1  ;;  %v5931_v35 = vld [vmem:[#allocation7 + $0x218] sm:$0xf0] }
 0x2d5   :  { %v2882_v55 = vadd.f32 %v2881_v42, %v2863_v5  ;;  %v5934_v52 = vor.u32 %v6692_v34, %v5931_v35  ;;  %v6171_v42 = vld [vmem:[#allocation7 + $0x3f8] sm:$0xf0]  ;;  %v6732_v5 = vld [vmem:[#allocation7 + $0x34c] sm:$0xf]  ;;  %4295 = vmatpush.bf16.msra.mxu1 %v6770_v10 }
 0x2d6   :  { %v6174_v47 = vor.u32 %v6752_v23, %v6171_v42  ;;  %v6766_v1 = vld [vmem:[#allocation9 + $0x58] sm:$0xff] }
 0x2d7   :  { %v2897_v60 = vmax.f32 %v2882_v55, 0.0  ;;  %v6760_v55 = vld [vmem:[#allocation9 + $0x28] sm:$0xff] }
 0x2d8   :  { %3898 = vmatpush.bf16.msra.mxu3 %v6154_v19  ;;  %3955 = vmatpush.bf16.msrb.mxu2 %v6030_v40  ;;  %v6744_v19 = vld [vmem:[#allocation7 + $0x3ac] sm:$0xf] }
 0x2d9   :  { %v6142_v25 = vor.u32 %v6744_v19, %v6139_v36  ;;  %v6736_v40 = vld [vmem:[#allocation7 + $0x36c] sm:$0xf] }
 0x2da   :  { %v6110_v41 = vor.u32 %v6736_v40, %v6107_v27 }
 0x2db   :  { %v2883_v26 = vpop.f32.mrf.mxu3 }
 0x2dc   :  { %v2884_v28 = vadd.f32 %v2883_v26, %v2865_v44  ;;  %3899 = vmatpush.bf16.msra.mxu3 %v6138_v54  ;;  %3956 = vmatpush.bf16.msrb.mxu2 %v6014_v51  ;;  %v6078_v54 = vor.u32 %v6728_v63, %v6075_v9  ;;  %v6761_v44 = vld [vmem:[#allocation9 + $0x30] sm:$0xff]  ;;  %v6759_v26 = vld [vmem:[#allocation9 + $0x20] sm:$0xff] }
 0x2de   :  { %v2901_v31 = vmax.f32 %v2884_v28, 0.0 }
 0x2e0   :  { %v7448_v18 = vpack.c.bf16 %v2901_v31, %v2897_v60  ;;  %3900 = vmatpush.bf16.msra.mxu3 %v6122_v17  ;;  %3957 = vmatpush.bf16.msrb.mxu2 %v5998_v2  ;;  %v6758_v17 = vld [vmem:[#allocation9 + $0x18] sm:$0xff]  ;;  %v6755_v2 = vld [vmem:[#allocation9] sm:$0xff] }
 0x2e2   :  { %3758 = vmatmul.bf16.gmra.mxu3 %v7448_v18  ;;  %3815 = vmatmul.bf16.gmra.mxu2 %v7430_v24 }
 0x2e3   :  { %3872 = vmatmul.bf16.gmra.mxu1 %v7393_v56  ;;  %3929 = vmatmul.bf16.gmra.mxu0 %v7349_v50  ;;  %v6058_v50 = vor.u32 %v6726_v8, %v6057_v6 }
 0x2e4   :  { %3901 = vmatpush.bf16.msra.mxu3 %v6106_v59  ;;  %3958 = vmatpush.bf16.msrb.mxu2 %v5982_v14  ;;  %v6769_v59 = vld [vmem:[#allocation9 + $0x70] sm:$0xff] }
 0x2e5   :  { %4296 = vmatpush.bf16.msra.mxu1 %v6769_v59 }
 0x2e8   :  { %3902 = vmatpush.bf16.msra.mxu3 %v6090_v29  ;;  %3959 = vmatpush.bf16.msrb.mxu2 %v5966_v49  ;;  %v6767_v29 = vld [vmem:[#allocation9 + $0x60] sm:$0xff] }
 0x2e9   :  { %4297 = vmatpush.bf16.msra.mxu1 %v6768_v21  ;;  %v6772_v21 = vld [vmem:[#allocation9 + $0x88] sm:$0xff] }
 0x2ec   :  { %3903 = vmatpush.bf16.msra.mxu3 %v6074_v57  ;;  %3960 = vmatpush.bf16.msrb.mxu2 %v5950_v4 }
 0x2ed   :  { %4298 = vmatpush.bf16.msra.mxu1 %v6767_v29 }
 0x2ef   :  { %v3697_v51 = vpop.f32.mrf.mxu0 }
 0x2f0   :  { %3904 = vmatpush.bf16.msra.mxu3 %v6058_v50  ;;  %3961 = vmatpush.bf16.msrb.mxu2 %v5934_v52  ;;  %v6764_v52 = vld [vmem:[#allocation9 + $0x48] sm:$0xff] }
 0x2f1   :  { %4299 = vmatpush.bf16.msra.mxu1 %v6766_v1  ;;  %v6771_v1 = vld [vmem:[#allocation9 + $0x80] sm:$0xff] }
 0x2f2   :  { %3829 = vmatmul.bf16.vlgmr.msrb.gmra.mxu3 %v7440_v32  ;;  %3886 = vmatmul.bf16.vlgmr.msra.gmra.mxu2 %v7411_v16 }
 0x2f3   :  { %3943 = vmatmul.bf16.vlgmr.msrb.gmra.mxu1 %v7370_v22  ;;  %v6091_v22 = vld [vmem:[#allocation7 + $0x358] sm:$0xf0] }
 0x2f4   :  { %3973 = vmatpush.bf16.msrb.mxu3 %v6174_v47  ;;  %v6094_v53 = vor.u32 %v6732_v5, %v6091_v22 }
 0x2f5   :  { %4300 = vmatpush.bf16.msra.mxu1 %v6765_v62 }
 0x2f7   :  { %v3699_v11 = vpop.f32.mrf.mxu0 }
 0x2f8   :  { %3974 = vmatpush.bf16.msrb.mxu3 %v6158_v7 }
 0x2f9   :  { %4301 = vmatpush.bf16.msra.mxu1 %v6764_v52  ;;  %v6784_v52 = vld [vmem:[#allocation9 + $0xe8] sm:$0xff] }
 0x2fc   :  { %3975 = vmatpush.bf16.msrb.mxu3 %v6142_v25  ;;  %v6778_v25 = vld [vmem:[#allocation9 + $0xb8] sm:$0xff] }
 0x2fd   :  { %4302 = vmatpush.bf16.msra.mxu1 %v6763_v3  ;;  %4314 = vmatpush.bf16.msra.mxu2 %v6778_v25  ;;  %v6783_v25 = vld [vmem:[#allocation9 + $0xe0] sm:$0xff] }
 0x2ff   :  { %v3702_v30 = vpop.f32.mrf.mxu0 }
 0x300   :  { %3976 = vmatpush.bf16.msrb.mxu3 %v6126_v0 }
 0x302   :  { %3834 = vmatmul.bf16.gmra.mxu3 %v7448_v18  ;;  %3891 = vmatmul.bf16.gmra.mxu2 %v7430_v24 }
 0x303   :  { %3948 = vmatmul.bf16.gmra.mxu1 %v7393_v56  ;;  %v6762_v56 = vld [vmem:[#allocation9 + $0x38] sm:$0xff] }
 0x304   :  { %3977 = vmatpush.bf16.msrb.mxu3 %v6110_v41  ;;  %4276 = vmatpush.bf16.msra.mxu0 %v6762_v56  ;;  %v6777_v41 = vld [vmem:[#allocation9 + $0xb0] sm:$0xff] }
 0x305   :  { %4315 = vmatpush.bf16.msra.mxu2 %v6777_v41 }
 0x307   :  { %v3704_v14 = vpop.f32.mrf.mxu0 }
 0x308   :  { %3978 = vmatpush.bf16.msrb.mxu3 %v6094_v53  ;;  %4277 = vmatpush.bf16.msra.mxu0 %v6761_v44 }
 0x30c   :  { %3979 = vmatpush.bf16.msrb.mxu3 %v6078_v54  ;;  %4278 = vmatpush.bf16.msra.mxu0 %v6760_v55  ;;  %v6776_v54 = vld [vmem:[#allocation9 + $0xa8] sm:$0xff] }
 0x30d   :  { %4316 = vmatpush.bf16.msra.mxu2 %v6776_v54 }
 0x30f   :  { %v3716_v28 = vpop.f32.mrf.mxu1  ;;  %v3773_v48 = vpop.f32.mrf.mxu0 }
 0x310   :  { %3980 = vmatpush.bf16.msrb.mxu3 %v6062_v37  ;;  %4279 = vmatpush.bf16.msra.mxu0 %v6759_v26  ;;  %v3041_v26 = vperm.slane %v7469_v20, 1 }
 0x312   :  { %3905 = vmatmul.bf16.vlgmr.msra.gmra.mxu3 %v7440_v32  ;;  %3962 = vmatmul.bf16.vlgmr.msrb.gmra.mxu2 %v7411_v16  ;;  %v6757_v16 = vld [vmem:[#allocation9 + $0x10] sm:$0xff] }
 0x314   :  { %4280 = vmatpush.bf16.msra.mxu0 %v6758_v17  ;;  %v6774_v17 = vld [vmem:[#allocation9 + $0x98] sm:$0xff] }
 0x317   :  { %v3718_v60 = vpop.f32.mrf.mxu1  ;;  %v3775_v7 = vpop.f32.mrf.mxu0 }
 0x318   :  { %4281 = vmatpush.bf16.msra.mxu0 %v6757_v16 }
 0x31f   :  { %v3721_v12 = vpop.f32.mrf.mxu1  ;;  %v3778_v53 = vpop.f32.mrf.mxu0 }
 0x320   :  { %v3779_v62 = vadd.f32 %v3778_v53, %v3041_v26 }
 0x322   :  { %3910 = vmatmul.bf16.gmra.mxu3 %v7448_v18  ;;  %3967 = vmatmul.bf16.gmra.mxu2 %v7430_v24  ;;  %v6756_v24 = vld [vmem:[#allocation9 + $0x8] sm:$0xff] }
 0x323   :  { %4282 = vmatpush.bf16.msra.mxu0 %v6756_v24  ;;  %v3776_v24 = vadd.f32 %v3775_v7, %v3041_v26 }
 0x327   :  { %4283 = vmatpush.bf16.msra.mxu0 %v6755_v2  ;;  %v3723_v15 = vpop.f32.mrf.mxu1  ;;  %v6773_v2 = vld [vmem:[#allocation9 + $0x90] sm:$0xff] }
 0x32f   :  { %v3792_v6 = vpop.f32.mrf.mxu1 }
 0x332   :  { %3981 = vmatmul.bf16.vlgmr.msrb.gmra.mxu3 %v7440_v32 }
 0x335   :  { %v3735_v33 = vpop.f32.mrf.mxu2 }
 0x337   :  { %v3794_v36 = vpop.f32.mrf.mxu1 }
 0x338   :  { %v3795_v10 = vadd.f32 %v3794_v36, %v3776_v24 }
 0x33d   :  { %v3737_v31 = vpop.f32.mrf.mxu2 }
 0x33f   :  { %v3797_v45 = vpop.f32.mrf.mxu1 }
 0x342   :  { %3986 = vmatmul.bf16.gmra.mxu3 %v7448_v18  ;;  %v3040_v18 = vperm.slane %v7469_v20, 0 }
 0x344   :  { %v3698_v39 = vadd.f32 %v3697_v51, %v3040_v18  ;;  %v3700_v38 = vadd.f32 %v3699_v11, %v3040_v18  ;;  %v3703_v0 = vadd.f32 %v3702_v30, %v3040_v18  ;;  %v3705_v40 = vadd.f32 %v3704_v14, %v3040_v18  ;;  %v6775_v51 = vld [vmem:[#allocation9 + $0xa0] sm:$0xff] }
 0x345   :  { %v3740_v32 = vpop.f32.mrf.mxu2  ;;  %4317 = vmatpush.bf16.msra.mxu2 %v6775_v51  ;;  %v3774_v11 = vadd.f32 %v3773_v48, %v3041_v26 }
 0x346   :  { %v3717_v57 = vadd.f32 %v3716_v28, %v3698_v39  ;;  %v3719_v8 = vadd.f32 %v3718_v60, %v3700_v38  ;;  %v3722_v27 = vadd.f32 %v3721_v12, %v3703_v0  ;;  %v3724_v5 = vadd.f32 %v3723_v15, %v3705_v40  ;;  %v6786_v38 = vld [vmem:[#allocation9 + $0xf8] sm:$0xff] }
 0x347   :  { %v3799_v60 = vpop.f32.mrf.mxu1  ;;  %4333 = vmatpush.bf16.msra.mxu3 %v6786_v38  ;;  %v6782_v40 = vld [vmem:[#allocation9 + $0xd8] sm:$0xff] }
 0x348   :  { %v3736_v4 = vadd.f32 %v3735_v33, %v3717_v57  ;;  %v3738_v34 = vadd.f32 %v3737_v31, %v3719_v8  ;;  %v3741_v22 = vadd.f32 %v3740_v32, %v3722_v27  ;;  %v3780_v33 = vpop.f32.mrf.mxu0  ;;  %v3793_v31 = vadd.f32 %v3792_v6, %v3774_v11 }
 0x349   :  { %4318 = vmatpush.bf16.msra.mxu2 %v6774_v17  ;;  %v3781_v6 = vadd.f32 %v3780_v33, %v3041_v26  ;;  %v3798_v8 = vadd.f32 %v3797_v45, %v3779_v62  ;;  %v6779_v33 = vld [vmem:[#allocation9 + $0xc0] sm:$0xff] }
 0x34d   :  { %v3742_v13 = vpop.f32.mrf.mxu2  ;;  %4319 = vmatpush.bf16.msra.mxu2 %v6773_v2 }
 0x34e   :  { %v3743_v63 = vadd.f32 %v3742_v13, %v3724_v5 }
 0x350   :  { %v3849_v29 = vpop.f32.mrf.mxu0 }
 0x351   :  { %4320 = vmatpush.bf16.msra.mxu2 %v6772_v21 }
 0x355   :  { %v3754_v49 = vpop.f32.mrf.mxu3  ;;  %v3811_v50 = vpop.f32.mrf.mxu2  ;;  %4321 = vmatpush.bf16.msra.mxu2 %v6771_v1 }
 0x356   :  { %v3755_v35 = vadd.f32 %v3754_v49, %v3736_v4  ;;  %v3812_v12 = vadd.f32 %v3811_v50, %v3793_v31  ;;  %v3868_v49 = vpop.f32.mrf.mxu1  ;;  %v6785_v4 = vld [vmem:[#allocation9 + $0xf0] sm:$0xff] }
 0x357   :  { %4334 = vmatpush.bf16.msra.mxu3 %v6785_v4 }
 0x358   :  { %v3992_v47 = vmax.f32 %v3755_v35, 0.0  ;;  %v3851_v50 = vpop.f32.mrf.mxu0 }
 0x35b   :  { %4335 = vmatpush.bf16.msra.mxu3 %v6784_v52 }
 0x35d   :  { %v3756_v23 = vpop.f32.mrf.mxu3  ;;  %v3813_v46 = vpop.f32.mrf.mxu2 }
 0x35e   :  { %v3757_v42 = vadd.f32 %v3756_v23, %v3738_v34  ;;  %v3814_v32 = vadd.f32 %v3813_v46, %v3795_v10  ;;  %v3800_v34 = vadd.f32 %v3799_v60, %v3781_v6  ;;  %v3870_v23 = vpop.f32.mrf.mxu1  ;;  %v3042_v46 = vperm.slane %v7469_v20, 2 }
 0x35f   :  { %4336 = vmatpush.bf16.msra.mxu3 %v6783_v25 }
 0x360   :  { %v3996_v43 = vmax.f32 %v3757_v42, 0.0  ;;  %v3854_v0 = vpop.f32.mrf.mxu0  ;;  %v3850_v5 = vadd.f32 %v3849_v29, %v3042_v46  ;;  %v3852_v53 = vadd.f32 %v3851_v50, %v3042_v46 }
 0x361   :  { %v3855_v24 = vadd.f32 %v3854_v0, %v3042_v46 }
 0x362   :  { %v4008_v19 = vpack.c.bf16 %v3996_v43, %v3992_v47  ;;  %v3871_v54 = vadd.f32 %v3870_v23, %v3852_v53 }
 0x363   :  { %4337 = vmatpush.bf16.msra.mxu3 %v6782_v40 }
 0x364   :  { %4284 = vmatmul.bf16.vlgmr.msra.gmra.mxu0 %v4008_v19 }
 0x365   :  { %v3759_v58 = vpop.f32.mrf.mxu3  ;;  %v3816_v56 = vpop.f32.mrf.mxu2 }
 0x366   :  { %v3760_v9 = vadd.f32 %v3759_v58, %v3741_v22  ;;  %v3817_v35 = vadd.f32 %v3816_v56, %v3798_v8  ;;  %v3873_v27 = vpop.f32.mrf.mxu1 }
 0x368   :  { %v4000_v44 = vmax.f32 %v3760_v9, 0.0  ;;  %v6781_v9 = vld [vmem:[#allocation9 + $0xd0] sm:$0xff] }
 0x369   :  { %4338 = vmatpush.bf16.msra.mxu3 %v6781_v9 }
 0x36d   :  { %v3761_v61 = vpop.f32.mrf.mxu3  ;;  %v3818_v30 = vpop.f32.mrf.mxu2 }
 0x36e   :  { %v3762_v37 = vadd.f32 %v3761_v61, %v3743_v63  ;;  %v3819_v42 = vadd.f32 %v3818_v30, %v3800_v34  ;;  %v3869_v63 = vadd.f32 %v3868_v49, %v3850_v5  ;;  %v6780_v61 = vld [vmem:[#allocation9 + $0xc8] sm:$0xff]  ;;  %v3875_v26 = vpop.f32.mrf.mxu1  ;;  %v3874_v30 = vadd.f32 %v3873_v27, %v3855_v24 }
 0x36f   :  { %4339 = vmatpush.bf16.msra.mxu3 %v6780_v61  ;;  %v3043_v49 = vperm.slane %v7469_v20, 3 }
 0x370   :  { %v4004_v55 = vmax.f32 %v3762_v37, 0.0 }
 0x372   :  { %v4012_v28 = vpack.c.bf16 %v4004_v55, %v4000_v44  ;;  %v3856_v44 = vpop.f32.mrf.mxu0 }
 0x373   :  { %4340 = vmatpush.bf16.msra.mxu3 %v6779_v33  ;;  %v3857_v2 = vadd.f32 %v3856_v44, %v3042_v46  ;;  %v6796_v44 = vld [vmem:[%s7496_s6 + $0x10] ss:$0 sm:$0xff] }
 0x374   :  { %4289 = vmatmul.bf16.gmra.mxu0 %v4012_v28 }
 0x375   :  { %v3830_v16 = vpop.f32.mrf.mxu3  ;;  %v3887_v48 = vpop.f32.mrf.mxu2 }
 0x376   :  { %v3831_v59 = vadd.f32 %v3830_v16, %v3812_v12  ;;  %v3888_v45 = vadd.f32 %v3887_v48, %v3869_v63  ;;  %v3944_v10 = vpop.f32.mrf.mxu1  ;;  %v3876_v12 = vadd.f32 %v3875_v26, %v3857_v2 }
 0x378   :  { %v3993_v13 = vmax.f32 %v3831_v59, 0.0 }
 0x37a   :  { %v3925_v31 = vpop.f32.mrf.mxu0 }
 0x37b   :  { %v3926_v62 = vadd.f32 %v3925_v31, %v3043_v49 }
 0x37d   :  { %v3832_v14 = vpop.f32.mrf.mxu3  ;;  %v3889_v43 = vpop.f32.mrf.mxu2  ;;  %v3945_v8 = vadd.f32 %v3944_v10, %v3926_v62 }
 0x37e   :  { %v3833_v15 = vadd.f32 %v3832_v14, %v3814_v32  ;;  %v3890_v37 = vadd.f32 %v3889_v43, %v3871_v54  ;;  %v3946_v48 = vpop.f32.mrf.mxu1 }
 0x380   :  { %v3997_v18 = vmax.f32 %v3833_v15, 0.0 }
 0x382   :  { %v4009_v39 = vpack.c.bf16 %v3997_v18, %v3993_v13  ;;  %v3927_v1 = vpop.f32.mrf.mxu0 }
 0x383   :  { %v3928_v6 = vadd.f32 %v3927_v1, %v3043_v49 }
 0x384   :  { %4303 = vmatmul.bf16.vlgmr.msra.gmra.mxu1 %v4009_v39 }
 0x385   :  { %v3835_v57 = vpop.f32.mrf.mxu3  ;;  %v3892_v22 = vpop.f32.mrf.mxu2  ;;  %v3947_v4 = vadd.f32 %v3946_v48, %v3928_v6 }
 0x386   :  { %v3836_v47 = vadd.f32 %v3835_v57, %v3817_v35  ;;  %v3893_v32 = vadd.f32 %v3892_v22, %v3874_v30  ;;  %v3949_v23 = vpop.f32.mrf.mxu1 }
 0x388   :  { %v4001_v19 = vmax.f32 %v3836_v47, 0.0 }
 0x38a   :  { %v3930_v34 = vpop.f32.mrf.mxu0 }
 0x38b   :  { %v3931_v25 = vadd.f32 %v3930_v34, %v3043_v49 }
 0x38d   :  { %v3837_v3 = vpop.f32.mrf.mxu3  ;;  %v3894_v16 = vpop.f32.mrf.mxu2  ;;  %v3950_v0 = vadd.f32 %v3949_v23, %v3931_v25 }
 0x38e   :  { %v3838_v7 = vadd.f32 %v3837_v3, %v3819_v42  ;;  %v3895_v21 = vadd.f32 %v3894_v16, %v3876_v12  ;;  %v3951_v46 = vpop.f32.mrf.mxu1 }
 0x390   :  { %v4005_v36 = vmax.f32 %v3838_v7, 0.0 }
 0x392   :  { %v4013_v58 = vpack.c.bf16 %v4005_v36, %v4001_v19  ;;  %v3932_v19 = vpop.f32.mrf.mxu0 }
 0x394   :  { %4308 = vmatmul.bf16.gmra.mxu1 %v4013_v58  ;;  %v3933_v58 = vadd.f32 %v3932_v19, %v3043_v49 }
 0x395   :  { %v3906_v41 = vpop.f32.mrf.mxu3  ;;  %v3963_v59 = vpop.f32.mrf.mxu2 }
 0x396   :  { %v3907_v56 = vadd.f32 %v3906_v41, %v3888_v45  ;;  %v3964_v50 = vadd.f32 %v3963_v59, %v3945_v8  ;;  %v3952_v27 = vadd.f32 %v3951_v46, %v3933_v58 }
 0x398   :  { %v3994_v28 = vmax.f32 %v3907_v56, 0.0 }
 0x39d   :  { %v3908_v55 = vpop.f32.mrf.mxu3  ;;  %v3965_v38 = vpop.f32.mrf.mxu2 }
 0x39e   :  { %v3909_v51 = vadd.f32 %v3908_v55, %v3890_v37  ;;  %v3966_v35 = vadd.f32 %v3965_v38, %v3947_v4 }
 0x3a0   :  { %v3998_v17 = vmax.f32 %v3909_v51, 0.0 }
 0x3a2   :  { %v4010_v11 = vpack.c.bf16 %v3998_v17, %v3994_v28 }
 0x3a4   :  { %4322 = vmatmul.bf16.vlgmr.msra.gmra.mxu2 %v4010_v11 }
 0x3a5   :  { %v3911_v60 = vpop.f32.mrf.mxu3  ;;  %v3968_v43 = vpop.f32.mrf.mxu2 }
 0x3a6   :  { %v3912_v14 = vadd.f32 %v3911_v60, %v3893_v32  ;;  %v3969_v41 = vadd.f32 %v3968_v43, %v3950_v0 }
 0x3a8   :  { %v4002_v13 = vmax.f32 %v3912_v14, 0.0 }
 0x3ad   :  { %v3913_v15 = vpop.f32.mrf.mxu3  ;;  %v3970_v40 = vpop.f32.mrf.mxu2 }
 0x3ae   :  { %v3914_v29 = vadd.f32 %v3913_v15, %v3895_v21  ;;  %v3971_v5 = vadd.f32 %v3970_v40, %v3952_v27 }
 0x3b0   :  { %v4006_v18 = vmax.f32 %v3914_v29, 0.0 }
 0x3b2   :  { %v4014_v39 = vpack.c.bf16 %v4006_v18, %v4002_v13 }
 0x3b4   :  { %4327 = vmatmul.bf16.gmra.mxu2 %v4014_v39 }
 0x3b5   :  { %v3982_v57 = vpop.f32.mrf.mxu3 }
 0x3b6   :  { %v3983_v52 = vadd.f32 %v3982_v57, %v3964_v50 }
 0x3b8   :  { %v3995_v3 = vmax.f32 %v3983_v52, 0.0 }
 0x3bd   :  { %v3984_v42 = vpop.f32.mrf.mxu3 }
 0x3be   :  { %v3985_v47 = vadd.f32 %v3984_v42, %v3966_v35 }
 0x3c0   :  { %v3999_v7 = vmax.f32 %v3985_v47, 0.0 }
 0x3c2   :  { %v4011_v20 = vpack.c.bf16 %v3999_v7, %v3995_v3 }
 0x3c4   :  { %4341 = vmatmul.bf16.vlgmr.msra.gmra.mxu3 %v4011_v20 }
 0x3c5   :  { %v3987_v36 = vpop.f32.mrf.mxu3 }
 0x3c6   :  { %v3988_v22 = vadd.f32 %v3987_v36, %v3969_v41 }
 0x3c8   :  { %v4003_v9 = vmax.f32 %v3988_v22, 0.0 }
 0x3cd   :  { %v3989_v53 = vpop.f32.mrf.mxu3 }
 0x3ce   :  { %v3990_v63 = vadd.f32 %v3989_v53, %v3971_v5 }
 0x3d0   :  { %v4007_v54 = vmax.f32 %v3990_v63, 0.0 }
 0x3d2   :  { %v4015_v45 = vpack.c.bf16 %v4007_v54, %v4003_v9 }
 0x3d4   :  { %4346 = vmatmul.bf16.gmra.mxu3 %v4015_v45 }
 0x3e1   :  { %v4285_v61 = vpop.f32.mrf.mxu0 }
 0x3e2   :  { %v4286_v55 = vadd.f32 %v6796_v44, %v4285_v61 }
 0x3e9   :  { %v4287_v51 = vpop.f32.mrf.mxu0 }
 0x3ea   :  { %v4288_v60 = vadd.f32 %v6796_v44, %v4287_v51 }
 0x3f1   :  { %v4290_v31 = vpop.f32.mrf.mxu0 }
 0x3f2   :  { %v4291_v21 = vadd.f32 %v6796_v44, %v4290_v31 }
 0x3f9   :  { %v4292_v29 = vpop.f32.mrf.mxu0 }
 0x3fa   :  { %v4293_v39 = vadd.f32 %v6796_v44, %v4292_v29 }
 0x401   :  { %v4304_v37 = vpop.f32.mrf.mxu1 }
 0x402   :  { %v4305_v26 = vadd.f32 %v4304_v37, %v4286_v55 }
 0x409   :  { %v4306_v28 = vpop.f32.mrf.mxu1 }
 0x40a   :  { %v4307_v24 = vadd.f32 %v4306_v28, %v4288_v60 }
 0x411   :  { %v4309_v30 = vpop.f32.mrf.mxu1 }
 0x412   :  { %v4310_v14 = vadd.f32 %v4309_v30, %v4291_v21 }
 0x419   :  { %v4311_v49 = vpop.f32.mrf.mxu1 }
 0x41a   :  { %v4312_v38 = vadd.f32 %v4311_v49, %v4293_v39 }
 0x427   :  { %v4323_v56 = vpop.f32.mrf.mxu2 }
 0x428   :  { %v4324_v17 = vadd.f32 %v4323_v56, %v4305_v26 }
 0x42f   :  { %v4325_v33 = vpop.f32.mrf.mxu2 }
 0x430   :  { %v4326_v2 = vadd.f32 %v4325_v33, %v4307_v24 }
 0x437   :  { %v4328_v59 = vpop.f32.mrf.mxu2 }
 0x438   :  { %v4329_v15 = vadd.f32 %v4328_v59, %v4310_v14 }
 0x43f   :  { %v4330_v48 = vpop.f32.mrf.mxu2 }
 0x440   :  { %v4331_v57 = vadd.f32 %v4330_v48, %v4312_v38 }
 0x447   :  { %v4342_v16 = vpop.f32.mrf.mxu3 }
 0x448   :  { %v4343_v11 = vadd.f32 %v4342_v16, %v4324_v17 }
 0x44a   :  { %6797 = vtanh.f32 %v4343_v11 }
 0x44f   :  { %v4344_v10 = vpop.f32.mrf.mxu3 }
 0x450   :  { %v6798_v12 = vpop.eup %6797  ;;  %v4345_v32 = vadd.f32 %v4344_v10, %v4326_v2 }
 0x451   :  { %4356 = vst [vmem:[%s7497_s7] sm:$0xff] %v6798_v12 }
 0x452   :  { %6799 = vtanh.f32 %v4345_v32 }
 0x457   :  { %v4347_v13 = vpop.f32.mrf.mxu3 }
 0x458   :  { %v6800_v18 = vpop.eup %6799  ;;  %v4348_v1 = vadd.f32 %v4347_v13, %v4329_v15 }
 0x459   :  { %4357 = vst [vmem:[%s7497_s7 + $0x8] sm:$0xff] %v6800_v18 }
 0x45a   :  { %6801 = vtanh.f32 %v4348_v1 }
 0x45f   :  { %v4349_v62 = vpop.f32.mrf.mxu3 }
 0x460   :  { %v6802_v6 = vpop.eup %6801  ;;  %v4350_v8 = vadd.f32 %v4349_v62, %v4331_v57 }
 0x461   :  { %4358 = vst [vmem:[%s7497_s7 + $0x10] sm:$0xff] %v6802_v6 }
 0x462   :  { %6803 = vtanh.f32 %v4350_v8 }
 0x468   :  { %v6804_v4 = vpop.eup %6803 }
 0x469   :  { %4359 = vst [vmem:[%s7497_s7 + $0x18] sm:$0xff] %v6804_v4 }
 0x46a   :  { %4364 = vsyncpa [#allocation3], 1 }
 0x46b   :  { %4365 = vsyncpa [#allocation5], 1 }
 0x46c   :  { %4366 = vsyncpa [#allocation8], 1 }

</bundles_post_ra>
